<compile_context>
chip_gen: v7x
topology: tpu7x:2x2x1
jax: 0.10.0
libtpu: 0.0.40
codegen_flags: <defaults>
</compile_context>

<pallas_src>
import functools

import jax
import jax.numpy as jnp
from jax import lax
from jax.experimental import pallas as pl
from jax.experimental.pallas import tpu as pltpu

LANE = 128                        # lane granularity of the spatial axis
MAX_TILE = 2048                   # upper bound on a spatial lane tile
TILE_BUDGET = 36 * 1024 * 1024    # per-call working-set target (fits v7x VMEM)
VMEM_LIMIT = 48 * 1024 * 1024     # explicit scoped-VMEM limit for every call
MM_DTYPE = jnp.bfloat16           # MXU-native matmul operand dtype


def _round_up(x, m):
    return ((x + m - 1) // m) * m


def _pick_tile(npad, per_lane_bytes, fixed_bytes, halo):
    """Budget-aware lane tile: multiple of `halo`, aims for >=2 spatial tiles."""
    avail = max(TILE_BUDGET - fixed_bytes, 0)
    t_budget = avail // max(per_lane_bytes, 1)
    t_cap = _round_up(max(1, (npad + 1) // 2), halo)   # keep >= 2 grid steps
    t = min(t_budget, t_cap, MAX_TILE)
    t = (t // halo) * halo
    return max(halo, t)


# ---------------------------------------------------------------------------
# Pallas kernels
# ---------------------------------------------------------------------------
def _conv_taps(w_ref, xp, xc, xn, *, pad, taps):
    """Fused im2col: 9 shifted-tap matmuls of a 3x3 conv on one lane tile.

    xp/xc/xn: (Cin, halo)/(Cin, tile)/(Cin, halo) values of the work-layout
    input; `ext` covers lane window [tile_start - pad, tile_start + tile + pad).
    All slice offsets are static -> plain lane relayouts, no dynamic indexing.
    """
    halo = xp.shape[1]
    tile = xc.shape[1]
    ext = jnp.concatenate([xp[:, halo - pad:], xc, xn[:, :pad]], axis=1)
    acc = None
    for k, off in enumerate(taps):
        win = lax.slice_in_dim(ext, pad + off, pad + off + tile, axis=1)
        y = jnp.dot(w_ref[k], win, preferred_element_type=jnp.float32)
        acc = y if acc is None else acc + y
    return acc


def _enc_conv_kernel(w_ref, b_ref, xp_ref, xc_ref, xn_ref, m_ref,
                     feat_ref, gram_ref, sum_ref, *, pad, taps):
    """Encoder conv+ReLU with fused gram / row-sum statistics epilogue."""
    j = pl.program_id(1)

    @pl.when(j == 0)
    def _():
        gram_ref[...] = jnp.zeros_like(gram_ref)
        sum_ref[...] = jnp.zeros_like(sum_ref)

    y = _conv_taps(w_ref, xp_ref[...], xc_ref[...], xn_ref[...],
                   pad=pad, taps=taps)
    # bias + ReLU + interior mask (zeros the border ring / alignment tail so
    # the statistics below see exactly the H*W real pixels).
    y = jnp.maximum(y + b_ref[...], 0.0) * m_ref[...]

    # Fused statistics: accumulate sum(y y^T) and sum(y) into resident
    # per-batch output blocks (content/style split by the parallel batch axis).
    gram_ref[...] += lax.dot_general(
        y, y, dimension_numbers=(((1,), (1,)), ((), ())),
        preferred_element_type=jnp.float32)
    sum_ref[...] += jnp.sum(y, axis=1, keepdims=True)
    feat_ref[...] = y.astype(feat_ref.dtype)


def _dec_conv_kernel(w_ref, b_ref, xp_ref, xc_ref, xn_ref, o_ref, *, pad, taps):
    """Decoder conv (no ReLU, no statistics)."""
    y = _conv_taps(w_ref, xp_ref[...], xc_ref[...], xn_ref[...],
                   pad=pad, taps=taps)
    o_ref[...] = (y + b_ref[...]).astype(o_ref.dtype)


def _blend_kernel(t_ref, b_ref, x_ref, m_ref, o_ref):
    """Fully-folded WCT: out = mask * (T' @ x + b')   (single matmul + bias)."""
    y = jnp.dot(t_ref[...], x_ref[...], preferred_element_type=jnp.float32)
    o_ref[...] = ((y + b_ref[...]) * m_ref[...]).astype(o_ref.dtype)


def _transform_kernel(cv_ref, cd_ref, sv_ref, sd_ref, cm_ref, sm_ref,
                      t_ref, b_ref, *, alpha):
    """Fuse whiten + color + centering + style mean + alpha blend into (T', b')."""
    dn = (((1,), (1,)), ((), ()))     # A @ B^T: contract lane axes, no transpose
    step2 = lax.dot_general(cv_ref[...] * cd_ref[...], cv_ref[...], dn,
                            preferred_element_type=jnp.float32)
    color = lax.dot_general(sv_ref[...] * sd_ref[...], sv_ref[...], dn,
                            preferred_element_type=jnp.float32)
    t = jnp.dot(color, step2, preferred_element_type=jnp.float32)
    c = t.shape[0]
    eye = (lax.broadcasted_iota(jnp.int32, (c, c), 0)
           == lax.broadcasted_iota(jnp.int32, (c, c), 1)).astype(jnp.float32)
    # out = alpha*(T @ (x - mean_c) + mean_s) + (1-alpha)*x  ==  T' @ x + b'
    t_ref[...] = alpha * t + (1.0 - alpha) * eye
    t_dot_cm = jnp.sum(t * cm_ref[...], axis=1, keepdims=True)   # cm is (1, C)
    b_ref[...] = alpha * (sm_ref[...] - t_dot_cm)


# ---------------------------------------------------------------------------
# pallas_call wrappers
# ---------------------------------------------------------------------------
def _compiler_params(semantics):
    return pltpu.CompilerParams(dimension_semantics=semantics,
                                vmem_limit_bytes=VMEM_LIMIT)


def encoder_conv(x_work, w_taps, bias, mask, *, wp, tile, halo):
    """x_work: (2, Cin_p, L) bf16 -> feats (2,C,L) bf16, gram (2,C,C), sum (2,C,1)."""
    B, cin_p, L = x_work.shape
    cout_p = w_taps.shape[1]
    n_tiles = L // tile
    r = tile // halo
    nb = L // halo
    pad = wp + 1
    taps = tuple(((k // 3) - 1) * wp + ((k % 3) - 1) for k in range(9))
    kern = functools.partial(_enc_conv_kernel, pad=pad, taps=taps)
    return pl.pallas_call(
        kern,
        out_shape=(jax.ShapeDtypeStruct((B, cout_p, L), MM_DTYPE),
                   jax.ShapeDtypeStruct((B, cout_p, cout_p), jnp.float32),
                   jax.ShapeDtypeStruct((B, cout_p, 1), jnp.float32)),
        grid=(B, n_tiles),
        in_specs=[
            pl.BlockSpec((9, cout_p, cin_p), lambda b, j: (0, 0, 0),
                         pipeline_mode=pl.Buffered(1)),
            pl.BlockSpec((cout_p, 1), lambda b, j: (0, 0),
                         pipeline_mode=pl.Buffered(1)),
            pl.BlockSpec((None, cin_p, halo),
                         lambda b, j: (b, 0, jnp.maximum(j * r - 1, 0))),
            pl.BlockSpec((None, cin_p, tile), lambda b, j: (b, 0, j)),
            pl.BlockSpec((None, cin_p, halo),
                         lambda b, j: (b, 0, jnp.minimum((j + 1) * r, nb - 1))),
            pl.BlockSpec((1, tile), lambda b, j: (0, j)),
        ],
        out_specs=(
            pl.BlockSpec((None, cout_p, tile), lambda b, j: (b, 0, j)),
            pl.BlockSpec((None, cout_p, cout_p), lambda b, j: (b, 0, 0)),
            pl.BlockSpec((None, cout_p, 1), lambda b, j: (b, 0, 0)),
        ),
        compiler_params=_compiler_params(("parallel", "arbitrary")),
    )(w_taps, bias, x_work, x_work, x_work, mask)


def decoder_conv(x_work, w_taps, bias, *, wp, tile, halo):
    """x_work: (Cin_p, L) bf16 -> (Cout_p, L) f32 padded-layout conv output."""
    cin_p, L = x_work.shape
    cout_p = w_taps.shape[1]
    n_tiles = L // tile
    r = tile // halo
    nb = L // halo
    pad = wp + 1
    taps = tuple(((k // 3) - 1) * wp + ((k % 3) - 1) for k in range(9))
    kern = functools.partial(_dec_conv_kernel, pad=pad, taps=taps)
    return pl.pallas_call(
        kern,
        out_shape=jax.ShapeDtypeStruct((cout_p, L), jnp.float32),
        grid=(n_tiles,),
        in_specs=[
            pl.BlockSpec((9, cout_p, cin_p), lambda j: (0, 0, 0),
                         pipeline_mode=pl.Buffered(1)),
            pl.BlockSpec((cout_p, 1), lambda j: (0, 0),
                         pipeline_mode=pl.Buffered(1)),
            pl.BlockSpec((cin_p, halo),
                         lambda j: (0, jnp.maximum(j * r - 1, 0))),
            pl.BlockSpec((cin_p, tile), lambda j: (0, j)),
            pl.BlockSpec((cin_p, halo),
                         lambda j: (0, jnp.minimum((j + 1) * r, nb - 1))),
        ],
        out_specs=pl.BlockSpec((cout_p, tile), lambda j: (0, j)),
        compiler_params=_compiler_params(("parallel",)),
    )(w_taps, bias, x_work, x_work, x_work)


def make_transform(c_v, c_d, s_v, s_d, mean_c, mean_s, alpha):
    """(C,C) eigen pieces + means -> fused (T' (C,C), b' (C,1))."""
    cp = c_v.shape[0]
    return pl.pallas_call(
        functools.partial(_transform_kernel, alpha=float(alpha)),
        out_shape=(jax.ShapeDtypeStruct((cp, cp), jnp.float32),
                   jax.ShapeDtypeStruct((cp, 1), jnp.float32)),
        grid=(1,),
        in_specs=[
            pl.BlockSpec((cp, cp), lambda i: (0, 0)),
            pl.BlockSpec((1, cp), lambda i: (0, 0)),
            pl.BlockSpec((cp, cp), lambda i: (0, 0)),
            pl.BlockSpec((1, cp), lambda i: (0, 0)),
            pl.BlockSpec((1, cp), lambda i: (0, 0)),
            pl.BlockSpec((cp, 1), lambda i: (0, 0)),
        ],
        out_specs=(pl.BlockSpec((cp, cp), lambda i: (0, 0)),
                   pl.BlockSpec((cp, 1), lambda i: (0, 0))),
        compiler_params=pltpu.CompilerParams(vmem_limit_bytes=VMEM_LIMIT),
    )(c_v, c_d.reshape(1, cp), s_v, s_d.reshape(1, cp),
      mean_c.reshape(1, cp), mean_s)


def wct_blend(t_mm, b_prime, feats, mask, *, tile):
    """feats: (2, C, L); blends batch 0 (content) only: out = mask*(T'@x + b')."""
    _, cp, L = feats.shape
    n_tiles = L // tile
    return pl.pallas_call(
        _blend_kernel,
        out_shape=jax.ShapeDtypeStruct((cp, L), MM_DTYPE),
        grid=(n_tiles,),
        in_specs=[
            pl.BlockSpec((cp, cp), lambda j: (0, 0), pipeline_mode=pl.Buffered(1)),
            pl.BlockSpec((cp, 1), lambda j: (0, 0), pipeline_mode=pl.Buffered(1)),
            pl.BlockSpec((None, cp, tile), lambda j: (0, 0, j)),
            pl.BlockSpec((1, tile), lambda j: (0, j)),
        ],
        out_specs=pl.BlockSpec((cp, tile), lambda j: (0, j)),
        compiler_params=_compiler_params(("parallel",)),
    )(t_mm, b_prime, feats, mask)


# ---------------------------------------------------------------------------
# Glue: work layout, statistics -> transform, per-level pipeline
# ---------------------------------------------------------------------------
def _work_layout(x_chw, cin_pad, total_lanes):
    """(Cin, H, W) -> channel-padded, zero-bordered, flattened (cin_pad, L)."""
    cin, H, W = x_chw.shape
    hp, wp = H + 2, W + 2
    x = jnp.pad(x_chw, ((0, cin_pad - cin), (1, 1), (1, 1)))
    x = x.reshape(cin_pad, hp * wp)
    x = jnp.pad(x, ((0, 0), (0, total_lanes - hp * wp)))
    return x.astype(MM_DTYPE)


def _interior_mask(H, W, total_lanes):
    """(1, L) f32: 1 on interior pixels of the padded layout, 0 elsewhere."""
    hp, wp = H + 2, W + 2
    rows = (jnp.arange(hp) >= 1) & (jnp.arange(hp) <= H)
    cols = (jnp.arange(wp) >= 1) & (jnp.arange(wp) <= W)
    m = (rows[:, None] & cols[None, :]).reshape(1, hp * wp).astype(jnp.float32)
    return jnp.pad(m, ((0, 0), (0, total_lanes - hp * wp)))


def _prep_conv_weights(w, b, cin_pad, cout_pad):
    """Conv2d (Cout,Cin,3,3), (Cout,) -> per-tap (9,cout_p,cin_p) bf16, (cout_p,1) f32."""
    cout, cin = w.shape[:2]
    wt = jnp.transpose(w, (2, 3, 0, 1)).reshape(9, cout, cin)
    wt = jnp.pad(wt, ((0, 0), (0, cout_pad - cout), (0, cin_pad - cin)))
    bt = jnp.pad(b, (0, cout_pad - cout)).reshape(cout_pad, 1)
    return wt.astype(MM_DTYPE), bt.astype(jnp.float32)


def _wct_transform(gram, ssum, n_pix, alpha):
    """Accumulated gram/sum (2,C,C)/(2,C,1) -> fused WCT transform (T', b')."""
    cp = gram.shape[1]
    mean = ssum / float(n_pix)                                       # (2, C, 1)
    # TODO(synk): one-pass covariance can lose precision when the post-ReLU
    # mean is large relative to the variance; torch centers before f @ f^T.
    cov = (gram - float(n_pix) * (mean @ jnp.swapaxes(mean, 1, 2))) / float(n_pix - 1)
    cov = cov.at[0].add(jnp.eye(cp, dtype=jnp.float32))              # content +I
    # TODO(synk): torch.svd has no Pallas equivalent; batched symmetric eigh
    # (equivalent for PSD covariances) runs once per level through XLA.
    evals, evecs = jnp.linalg.eigh(cov)
    # torch drops singular values below 1e-5 (sorted spectrum) -> elementwise mask.
    c_d = jnp.where(evals[0] >= 1e-5,
                    lax.rsqrt(jnp.maximum(evals[0], 1e-30)), 0.0)
    s_d = jnp.where(evals[1] >= 1e-5,
                    jnp.sqrt(jnp.maximum(evals[1], 0.0)), 0.0)
    return make_transform(evecs[0], c_d, evecs[1], s_d, mean[0], mean[1], alpha)


def _wct_level(img_c, img_s, we, be, wd, bd, alpha):
    """(encoder conv+ReLU) -> WCT blend -> (decoder conv) for one level."""
    cin, cf, cdec = we.shape[1], we.shape[0], wd.shape[0]
    _, H, W = img_c.shape
    hp, wp = H + 2, W + 2
    npad = hp * wp
    n_pix = H * W

    halo = _round_up(wp + 1, LANE)
    cin_p = _round_up(cin, 8)
    cf_p = _round_up(cf, 16)        # 16-sublane padding for bf16 packing
    cdec_p = _round_up(cdec, 16)

    # Budget-aware lane tile shared by conv / blend at this level.
    per_lane = 4 * cin_p + 4 * cf_p + 8           # dbl-buffered in + out + mask
    fixed = (18 * cf_p * cin_p                    # single-buffered bf16 tap weights
             + 8 * cf_p * cf_p                    # dbl-buffered gram accumulator
             + 8 * cin_p * halo + 4096)           # halo blocks + slack
    tile = _pick_tile(npad, per_lane, fixed, halo)
    L = _round_up(npad, tile)

    mask = _interior_mask(H, W, L)
    # Content & style stacked on a leading (parallel) axis -- no HBM concat.
    x_work = jnp.stack([_work_layout(img_c, cin_p, L),
                        _work_layout(img_s, cin_p, L)], axis=0)

    w_enc, b_enc = _prep_conv_weights(we, be, cin_p, cf_p)
    w_dec, b_dec = _prep_conv_weights(wd, bd, cf_p, cdec_p)

    feats, gram, ssum = encoder_conv(x_work, w_enc, b_enc, mask,
                                     wp=wp, tile=tile, halo=halo)
    t_prime, b_prime = _wct_transform(gram, ssum, n_pix, alpha)
    blended = wct_blend(t_prime.astype(MM_DTYPE), b_prime, feats, mask, tile=tile)
    y = decoder_conv(blended, w_dec, b_dec, wp=wp, tile=tile, halo=halo)

    # Back to a dense (3, H, W) image: interior of the padded layout.
    return y[:cdec, :npad].reshape(cdec, hp, wp)[:, 1:H + 1, 1:W + 1]


def wct_forward(img_content, img_style, enc_params, dec_params, alpha):
    # img_*: (3, H, W); PyTorch feeds (1,3,H,W) NCHW and squeezes batch.
    x = img_content
    for (we, be), (wd, bd) in zip(enc_params, dec_params):
        x = _wct_level(x, img_style, we, be, wd, bd, alpha)
    return x


_wct_forward_jit = jax.jit(wct_forward, static_argnames=("alpha",))


# ---------------------------------------------------------------------------
if __name__ == "__main__":
    key = jax.random.PRNGKey(0)
    k_c, k_s, k_w = jax.random.split(key, 3)

    H = W = 16
    C_FEAT = 32
    N_LEVELS = 2
    ALPHA = 0.6

    img_content = jax.random.normal(k_c, (3, H, W), jnp.float32)
    img_style = jax.random.normal(k_s, (3, H, W), jnp.float32)

    # Deterministic synthetic encoder/decoder weights (Conv2d 3x3, padding=1).
    enc_params, dec_params = [], []
    wkeys = jax.random.split(k_w, N_LEVELS * 4)
    for lvl in range(N_LEVELS):
        we = 0.1 * jax.random.normal(wkeys[4 * lvl + 0], (C_FEAT, 3, 3, 3), jnp.float32)
        be = 0.1 * jax.random.normal(wkeys[4 * lvl + 1], (C_FEAT,), jnp.float32)
        wd = 0.1 * jax.random.normal(wkeys[4 * lvl + 2], (3, C_FEAT, 3, 3), jnp.float32)
        bd = 0.1 * jax.random.normal(wkeys[4 * lvl + 3], (3,), jnp.float32)
        enc_params.append((we, be))
        dec_params.append((wd, bd))

    out = _wct_forward_jit(img_content, img_style, enc_params, dec_params, alpha=ALPHA)
    out = jax.block_until_ready(out)
    assert out.shape == (3, H, W) and out.dtype == jnp.float32
    assert bool(jnp.all(jnp.isfinite(out)))
    print("KERNEL_OK")
</pallas_src>

<mosaic_0001>
module attributes {stable_mosaic.version = 11 : i64} {
  func.func @_enc_conv_kernel(%arg0: i32, %arg1: i32, %arg2: memref<9x32x8xbf16, #tpu.memory_space<vmem>>, %arg3: memref<32x1xf32, #tpu.memory_space<vmem>>, %arg4: memref<1x8x128xbf16, #tpu.memory_space<vmem>>, %arg5: memref<1x8x256xbf16, #tpu.memory_space<vmem>>, %arg6: memref<1x8x128xbf16, #tpu.memory_space<vmem>>, %arg7: memref<1x256xf32, #tpu.memory_space<vmem>>, %arg8: memref<1x32x256xbf16, #tpu.memory_space<vmem>>, %arg9: memref<1x32x32xf32, #tpu.memory_space<vmem>>, %arg10: memref<1x32x1xf32, #tpu.memory_space<vmem>>) attributes {dimension_semantics = [#tpu.dimension_semantics<parallel>, #tpu.dimension_semantics<arbitrary>], iteration_bounds = array<i64: 2, 2>, scalar_prefetch = 0 : i64, scratch_operands = 0 : i64, tpu.core_type = #tpu.core_type<tc>, window_params = [{pipeline_mode = #tpu.pipeline_mode<synchronous>, transform_indices = @transform_0, window_bounds = array<i64: 9, 32, 8>}, {pipeline_mode = #tpu.pipeline_mode<synchronous>, transform_indices = @transform_1, window_bounds = array<i64: 32, 1>}, {transform_indices = @transform_2, window_bounds = array<i64: 1, 8, 128>}, {transform_indices = @transform_3, window_bounds = array<i64: 1, 8, 256>}, {transform_indices = @transform_4, window_bounds = array<i64: 1, 8, 128>}, {transform_indices = @transform_5, window_bounds = array<i64: 1, 256>}, {transform_indices = @transform_6, window_bounds = array<i64: 1, 32, 256>}, {transform_indices = @transform_7, window_bounds = array<i64: 1, 32, 32>}, {transform_indices = @transform_8, window_bounds = array<i64: 1, 32, 1>}]} {
    %c0_i32 = arith.constant 0 : i32
    %0 = arith.cmpi eq, %arg1, %c0_i32 : i32
    %1 = arith.extui %0 : i1 to i32
    %c0_i32_0 = arith.constant 0 : i32
    %2 = arith.cmpi ne, %1, %c0_i32_0 : i32
    scf.if %2 {
      %cst_58 = arith.constant 0.000000e+00 : f32
      %83 = vector.broadcast %cst_58 : f32 to vector<32x32xf32>
      %c0_59 = arith.constant 0 : index
      %c0_60 = arith.constant 0 : index
      %c0_61 = arith.constant 0 : index
      %84 = vector.load %arg9[%c0_59, %c0_60, %c0_61] : memref<1x32x32xf32, #tpu.memory_space<vmem>>, vector<1x32x32xf32>
      %85 = vector.shape_cast %84 : vector<1x32x32xf32> to vector<32x32xf32>
      %86 = vector.shape_cast %83 : vector<32x32xf32> to vector<1x32x32xf32>
      tpu.vector_store %arg9[%c0_59, %c0_60, %c0_61], %86 {strides = array<i32>} : memref<1x32x32xf32, #tpu.memory_space<vmem>>, vector<1x32x32xf32>,
      %cst_62 = arith.constant 0.000000e+00 : f32
      %87 = vector.broadcast %cst_62 : f32 to vector<32x1xf32>
      %c0_63 = arith.constant 0 : index
      %c0_64 = arith.constant 0 : index
      %c0_65 = arith.constant 0 : index
      %88 = vector.load %arg10[%c0_63, %c0_64, %c0_65] : memref<1x32x1xf32, #tpu.memory_space<vmem>>, vector<1x32x1xf32>
      %89 = vector.shape_cast %88 : vector<1x32x1xf32> to vector<32x1xf32>
      %90 = vector.shape_cast %87 : vector<32x1xf32> to vector<1x32x1xf32>
      tpu.vector_store %arg10[%c0_63, %c0_64, %c0_65], %90 {strides = array<i32>} : memref<1x32x1xf32, #tpu.memory_space<vmem>>, vector<1x32x1xf32>,
    } else {
    }
    %c0 = arith.constant 0 : index
    %c0_1 = arith.constant 0 : index
    %c0_2 = arith.constant 0 : index
    %3 = vector.load %arg4[%c0, %c0_1, %c0_2] : memref<1x8x128xbf16, #tpu.memory_space<vmem>>, vector<1x8x128xbf16>
    %4 = vector.shape_cast %3 : vector<1x8x128xbf16> to vector<8x128xbf16>
    %c0_3 = arith.constant 0 : index
    %c0_4 = arith.constant 0 : index
    %c0_5 = arith.constant 0 : index
    %5 = vector.load %arg5[%c0_3, %c0_4, %c0_5] : memref<1x8x256xbf16, #tpu.memory_space<vmem>>, vector<1x8x256xbf16>
    %6 = vector.shape_cast %5 : vector<1x8x256xbf16> to vector<8x256xbf16>
    %c0_6 = arith.constant 0 : index
    %c0_7 = arith.constant 0 : index
    %c0_8 = arith.constant 0 : index
    %7 = vector.load %arg6[%c0_6, %c0_7, %c0_8] : memref<1x8x128xbf16, #tpu.memory_space<vmem>>, vector<1x8x128xbf16>
    %8 = vector.shape_cast %7 : vector<1x8x128xbf16> to vector<8x128xbf16>
    %9 = vector.extract_strided_slice %4 {offsets = [0, 109], sizes = [8, 19], strides = [1, 1]} : vector<8x128xbf16> to vector<8x19xbf16>
    %10 = vector.extract_strided_slice %8 {offsets = [0, 0], sizes = [8, 19], strides = [1, 1]} : vector<8x128xbf16> to vector<8x19xbf16>
    %11 = tpu.concatenate %9, %6, %10 in 1 : vector<8x19xbf16>, vector<8x256xbf16>, vector<8x19xbf16> -> vector<8x294xbf16>
    %12 = vector.extract_strided_slice %11 {offsets = [0, 0], sizes = [8, 256], strides = [1, 1]} : vector<8x294xbf16> to vector<8x256xbf16>
    %c0_9 = arith.constant 0 : index
    %c0_10 = arith.constant 0 : index
    %c0_11 = arith.constant 0 : index
    %13 = vector.load %arg2[%c0_9, %c0_10, %c0_11] : memref<9x32x8xbf16, #tpu.memory_space<vmem>>, vector<1x32x8xbf16>
    %14 = vector.shape_cast %13 : vector<1x32x8xbf16> to vector<32x8xbf16>
    %cst = arith.constant dense<0.000000e+00> : vector<32x256xf32>
    %15 = tpu.matmul %14, %12, %cst {dimension_numbers = #tpu.dot_dimension_numbers<[1], [0], [0], [1], [0, 0, 1, 1], [], []>} : vector<32x8xbf16>, vector<8x256xbf16>, vector<32x256xf32> -> vector<32x256xf32>
    %16 = vector.extract_strided_slice %11 {offsets = [0, 1], sizes = [8, 256], strides = [1, 1]} : vector<8x294xbf16> to vector<8x256xbf16>
    %c1 = arith.constant 1 : index
    %c0_12 = arith.constant 0 : index
    %c0_13 = arith.constant 0 : index
    %17 = vector.load %arg2[%c1, %c0_12, %c0_13] : memref<9x32x8xbf16, #tpu.memory_space<vmem>>, vector<1x32x8xbf16>
    %18 = vector.shape_cast %17 : vector<1x32x8xbf16> to vector<32x8xbf16>
    %cst_14 = arith.constant dense<0.000000e+00> : vector<32x256xf32>
    %19 = tpu.matmul %18, %16, %cst_14 {dimension_numbers = #tpu.dot_dimension_numbers<[1], [0], [0], [1], [0, 0, 1, 1], [], []>} : vector<32x8xbf16>, vector<8x256xbf16>, vector<32x256xf32> -> vector<32x256xf32>
    %20 = arith.addf %15, %19 : vector<32x256xf32>
    %21 = vector.extract_strided_slice %11 {offsets = [0, 2], sizes = [8, 256], strides = [1, 1]} : vector<8x294xbf16> to vector<8x256xbf16>
    %c2 = arith.constant 2 : index
    %c0_15 = arith.constant 0 : index
    %c0_16 = arith.constant 0 : index
    %22 = vector.load %arg2[%c2, %c0_15, %c0_16] : memref<9x32x8xbf16, #tpu.memory_space<vmem>>, vector<1x32x8xbf16>
    %23 = vector.shape_cast %22 : vector<1x32x8xbf16> to vector<32x8xbf16>
    %cst_17 = arith.constant dense<0.000000e+00> : vector<32x256xf32>
    %24 = tpu.matmul %23, %21, %cst_17 {dimension_numbers = #tpu.dot_dimension_numbers<[1], [0], [0], [1], [0, 0, 1, 1], [], []>} : vector<32x8xbf16>, vector<8x256xbf16>, vector<32x256xf32> -> vector<32x256xf32>
    %25 = arith.addf %20, %24 : vector<32x256xf32>
    %26 = vector.extract_strided_slice %11 {offsets = [0, 18], sizes = [8, 256], strides = [1, 1]} : vector<8x294xbf16> to vector<8x256xbf16>
    %c3 = arith.constant 3 : index
    %c0_18 = arith.constant 0 : index
    %c0_19 = arith.constant 0 : index
    %27 = vector.load %arg2[%c3, %c0_18, %c0_19] : memref<9x32x8xbf16, #tpu.memory_space<vmem>>, vector<1x32x8xbf16>
    %28 = vector.shape_cast %27 : vector<1x32x8xbf16> to vector<32x8xbf16>
    %cst_20 = arith.constant dense<0.000000e+00> : vector<32x256xf32>
    %29 = tpu.matmul %28, %26, %cst_20 {dimension_numbers = #tpu.dot_dimension_numbers<[1], [0], [0], [1], [0, 0, 1, 1], [], []>} : vector<32x8xbf16>, vector<8x256xbf16>, vector<32x256xf32> -> vector<32x256xf32>
    %30 = arith.addf %25, %29 : vector<32x256xf32>
    %31 = vector.extract_strided_slice %11 {offsets = [0, 19], sizes = [8, 256], strides = [1, 1]} : vector<8x294xbf16> to vector<8x256xbf16>
    %c4 = arith.constant 4 : index
    %c0_21 = arith.constant 0 : index
    %c0_22 = arith.constant 0 : index
    %32 = vector.load %arg2[%c4, %c0_21, %c0_22] : memref<9x32x8xbf16, #tpu.memory_space<vmem>>, vector<1x32x8xbf16>
    %33 = vector.shape_cast %32 : vector<1x32x8xbf16> to vector<32x8xbf16>
    %cst_23 = arith.constant dense<0.000000e+00> : vector<32x256xf32>
    %34 = tpu.matmul %33, %31, %cst_23 {dimension_numbers = #tpu.dot_dimension_numbers<[1], [0], [0], [1], [0, 0, 1, 1], [], []>} : vector<32x8xbf16>, vector<8x256xbf16>, vector<32x256xf32> -> vector<32x256xf32>
    %35 = arith.addf %30, %34 : vector<32x256xf32>
    %36 = vector.extract_strided_slice %11 {offsets = [0, 20], sizes = [8, 256], strides = [1, 1]} : vector<8x294xbf16> to vector<8x256xbf16>
    %c5 = arith.constant 5 : index
    %c0_24 = arith.constant 0 : index
    %c0_25 = arith.constant 0 : index
    %37 = vector.load %arg2[%c5, %c0_24, %c0_25] : memref<9x32x8xbf16, #tpu.memory_space<vmem>>, vector<1x32x8xbf16>
    %38 = vector.shape_cast %37 : vector<1x32x8xbf16> to vector<32x8xbf16>
    %cst_26 = arith.constant dense<0.000000e+00> : vector<32x256xf32>
    %39 = tpu.matmul %38, %36, %cst_26 {dimension_numbers = #tpu.dot_dimension_numbers<[1], [0], [0], [1], [0, 0, 1, 1], [], []>} : vector<32x8xbf16>, vector<8x256xbf16>, vector<32x256xf32> -> vector<32x256xf32>
    %40 = arith.addf %35, %39 : vector<32x256xf32>
    %41 = vector.extract_strided_slice %11 {offsets = [0, 36], sizes = [8, 256], strides = [1, 1]} : vector<8x294xbf16> to vector<8x256xbf16>
    %c6 = arith.constant 6 : index
    %c0_27 = arith.constant 0 : index
    %c0_28 = arith.constant 0 : index
    %42 = vector.load %arg2[%c6, %c0_27, %c0_28] : memref<9x32x8xbf16, #tpu.memory_space<vmem>>, vector<1x32x8xbf16>
    %43 = vector.shape_cast %42 : vector<1x32x8xbf16> to vector<32x8xbf16>
    %cst_29 = arith.constant dense<0.000000e+00> : vector<32x256xf32>
    %44 = tpu.matmul %43, %41, %cst_29 {dimension_numbers = #tpu.dot_dimension_numbers<[1], [0], [0], [1], [0, 0, 1, 1], [], []>} : vector<32x8xbf16>, vector<8x256xbf16>, vector<32x256xf32> -> vector<32x256xf32>
    %45 = arith.addf %40, %44 : vector<32x256xf32>
    %46 = vector.extract_strided_slice %11 {offsets = [0, 37], sizes = [8, 256], strides = [1, 1]} : vector<8x294xbf16> to vector<8x256xbf16>
    %c7 = arith.constant 7 : index
    %c0_30 = arith.constant 0 : index
    %c0_31 = arith.constant 0 : index
    %47 = vector.load %arg2[%c7, %c0_30, %c0_31] : memref<9x32x8xbf16, #tpu.memory_space<vmem>>, vector<1x32x8xbf16>
    %48 = vector.shape_cast %47 : vector<1x32x8xbf16> to vector<32x8xbf16>
    %cst_32 = arith.constant dense<0.000000e+00> : vector<32x256xf32>
    %49 = tpu.matmul %48, %46, %cst_32 {dimension_numbers = #tpu.dot_dimension_numbers<[1], [0], [0], [1], [0, 0, 1, 1], [], []>} : vector<32x8xbf16>, vector<8x256xbf16>, vector<32x256xf32> -> vector<32x256xf32>
    %50 = arith.addf %45, %49 : vector<32x256xf32>
    %51 = vector.extract_strided_slice %11 {offsets = [0, 38], sizes = [8, 256], strides = [1, 1]} : vector<8x294xbf16> to vector<8x256xbf16>
    %c8 = arith.constant 8 : index
    %c0_33 = arith.constant 0 : index
    %c0_34 = arith.constant 0 : index
    %52 = vector.load %arg2[%c8, %c0_33, %c0_34] : memref<9x32x8xbf16, #tpu.memory_space<vmem>>, vector<1x32x8xbf16>
    %53 = vector.shape_cast %52 : vector<1x32x8xbf16> to vector<32x8xbf16>
    %cst_35 = arith.constant dense<0.000000e+00> : vector<32x256xf32>
    %54 = tpu.matmul %53, %51, %cst_35 {dimension_numbers = #tpu.dot_dimension_numbers<[1], [0], [0], [1], [0, 0, 1, 1], [], []>} : vector<32x8xbf16>, vector<8x256xbf16>, vector<32x256xf32> -> vector<32x256xf32>
    %55 = arith.addf %50, %54 : vector<32x256xf32>
    %c0_36 = arith.constant 0 : index
    %c0_37 = arith.constant 0 : index
    %56 = vector.load %arg3[%c0_36, %c0_37] : memref<32x1xf32, #tpu.memory_space<vmem>>, vector<32x1xf32>
    %57 = vector.broadcast %56 : vector<32x1xf32> to vector<32x256xf32>
    %58 = arith.addf %55, %57 : vector<32x256xf32>
    %cst_38 = arith.constant 0.000000e+00 : f32
    %59 = vector.broadcast %cst_38 : f32 to vector<32x256xf32>
    %60 = arith.maximumf %58, %59 : vector<32x256xf32>
    %c0_39 = arith.constant 0 : index
    %c0_40 = arith.constant 0 : index
    %61 = vector.load %arg7[%c0_39, %c0_40] : memref<1x256xf32, #tpu.memory_space<vmem>>, vector<1x256xf32>
    %62 = vector.broadcast %61 : vector<1x256xf32> to vector<32x256xf32>
    %63 = arith.mulf %60, %62 : vector<32x256xf32>
    %c0_41 = arith.constant 0 : index
    %c0_42 = arith.constant 0 : index
    %c0_43 = arith.constant 0 : index
    %64 = vector.load %arg9[%c0_41, %c0_42, %c0_43] : memref<1x32x32xf32, #tpu.memory_space<vmem>>, vector<1x32x32xf32>
    %65 = vector.shape_cast %64 : vector<1x32x32xf32> to vector<32x32xf32>
    %cst_44 = arith.constant dense<0.000000e+00> : vector<32x32xf32>
    %66 = tpu.matmul %63, %63, %cst_44 {dimension_numbers = #tpu.dot_dimension_numbers<[1], [1], [0], [0], [0, 0, 1, 0], [], []>} : vector<32x256xf32>, vector<32x256xf32>, vector<32x32xf32> -> vector<32x32xf32>
    %67 = arith.addf %65, %66 : vector<32x32xf32>
    %c0_45 = arith.constant 0 : index
    %c0_46 = arith.constant 0 : index
    %c0_47 = arith.constant 0 : index
    %68 = vector.load %arg9[%c0_45, %c0_46, %c0_47] : memref<1x32x32xf32, #tpu.memory_space<vmem>>, vector<1x32x32xf32>
    %69 = vector.shape_cast %68 : vector<1x32x32xf32> to vector<32x32xf32>
    %70 = vector.shape_cast %67 : vector<32x32xf32> to vector<1x32x32xf32>
    tpu.vector_store %arg9[%c0_45, %c0_46, %c0_47], %70 {strides = array<i32>} : memref<1x32x32xf32, #tpu.memory_space<vmem>>, vector<1x32x32xf32>,
    %c0_48 = arith.constant 0 : index
    %c0_49 = arith.constant 0 : index
    %c0_50 = arith.constant 0 : index
    %71 = vector.load %arg10[%c0_48, %c0_49, %c0_50] : memref<1x32x1xf32, #tpu.memory_space<vmem>>, vector<1x32x1xf32>
    %72 = vector.shape_cast %71 : vector<1x32x1xf32> to vector<32x1xf32>
    %cst_51 = arith.constant dense<0.000000e+00> : vector<32xf32>
    %73 = vector.multi_reduction <add>, %63, %cst_51 [1] : vector<32x256xf32> to vector<32xf32>
    %74 = vector.shape_cast %73 : vector<32xf32> to vector<32x1xf32>
    %75 = arith.addf %72, %74 : vector<32x1xf32>
    %c0_52 = arith.constant 0 : index
    %c0_53 = arith.constant 0 : index
    %c0_54 = arith.constant 0 : index
    %76 = vector.load %arg10[%c0_52, %c0_53, %c0_54] : memref<1x32x1xf32, #tpu.memory_space<vmem>>, vector<1x32x1xf32>
    %77 = vector.shape_cast %76 : vector<1x32x1xf32> to vector<32x1xf32>
    %78 = vector.shape_cast %75 : vector<32x1xf32> to vector<1x32x1xf32>
    tpu.vector_store %arg10[%c0_52, %c0_53, %c0_54], %78 {strides = array<i32>} : memref<1x32x1xf32, #tpu.memory_space<vmem>>, vector<1x32x1xf32>,
    %79 = arith.truncf %63 : vector<32x256xf32> to vector<32x256xbf16>
    %c0_55 = arith.constant 0 : index
    %c0_56 = arith.constant 0 : index
    %c0_57 = arith.constant 0 : index
    %80 = vector.load %arg8[%c0_55, %c0_56, %c0_57] : memref<1x32x256xbf16, #tpu.memory_space<vmem>>, vector<1x32x256xbf16>
    %81 = vector.shape_cast %80 : vector<1x32x256xbf16> to vector<32x256xbf16>
    %82 = vector.shape_cast %79 : vector<32x256xbf16> to vector<1x32x256xbf16>
    tpu.vector_store %arg8[%c0_55, %c0_56, %c0_57], %82 {strides = array<i32>} : memref<1x32x256xbf16, #tpu.memory_space<vmem>>, vector<1x32x256xbf16>,
    return
  }
  func.func @transform_0(%arg0: i32, %arg1: i32) -> (i32, i32, i32) {
    %c0_i32 = arith.constant 0 : i32
    %c0_i32_0 = arith.constant 0 : i32
    %c0_i32_1 = arith.constant 0 : i32
    %c0_i32_2 = arith.constant 0 : i32
    return %c0_i32, %c0_i32_0, %c0_i32_1 : i32, i32, i32
  }
  func.func @transform_1(%arg0: i32, %arg1: i32) -> (i32, i32) {
    %c0_i32 = arith.constant 0 : i32
    %c0_i32_0 = arith.constant 0 : i32
    %c0_i32_1 = arith.constant 0 : i32
    return %c0_i32, %c0_i32_0 : i32, i32
  }
  func.func @transform_2(%arg0: i32, %arg1: i32) -> (i32, i32, i32) {
    %c2_i32 = arith.constant 2 : i32
    %0 = arith.muli %arg1, %c2_i32 : i32
    %c1_i32 = arith.constant 1 : i32
    %1 = arith.subi %0, %c1_i32 : i32
    %c0_i32 = arith.constant 0 : i32
    %2 = arith.maxsi %1, %c0_i32 : i32
    %c0_i32_0 = arith.constant 0 : i32
    %c0_i32_1 = arith.constant 0 : i32
    return %arg0, %c0_i32_0, %2 : i32, i32, i32
  }
  func.func @transform_3(%arg0: i32, %arg1: i32) -> (i32, i32, i32) {
    %c0_i32 = arith.constant 0 : i32
    %c0_i32_0 = arith.constant 0 : i32
    return %arg0, %c0_i32, %arg1 : i32, i32, i32
  }
  func.func @transform_4(%arg0: i32, %arg1: i32) -> (i32, i32, i32) {
    %c1_i32 = arith.constant 1 : i32
    %0 = arith.addi %arg1, %c1_i32 : i32
    %c2_i32 = arith.constant 2 : i32
    %1 = arith.muli %0, %c2_i32 : i32
    %c3_i32 = arith.constant 3 : i32
    %2 = arith.minsi %1, %c3_i32 : i32
    %c0_i32 = arith.constant 0 : i32
    %c0_i32_0 = arith.constant 0 : i32
    return %arg0, %c0_i32, %2 : i32, i32, i32
  }
  func.func @transform_5(%arg0: i32, %arg1: i32) -> (i32, i32) {
    %c0_i32 = arith.constant 0 : i32
    %c0_i32_0 = arith.constant 0 : i32
    return %c0_i32, %arg1 : i32, i32
  }
  func.func @transform_6(%arg0: i32, %arg1: i32) -> (i32, i32, i32) {
    %c0_i32 = arith.constant 0 : i32
    %c0_i32_0 = arith.constant 0 : i32
    return %arg0, %c0_i32, %arg1 : i32, i32, i32
  }
  func.func @transform_7(%arg0: i32, %arg1: i32) -> (i32, i32, i32) {
    %c0_i32 = arith.constant 0 : i32
    %c0_i32_0 = arith.constant 0 : i32
    %c0_i32_1 = arith.constant 0 : i32
    return %arg0, %c0_i32, %c0_i32_0 : i32, i32, i32
  }
  func.func @transform_8(%arg0: i32, %arg1: i32) -> (i32, i32, i32) {
    %c0_i32 = arith.constant 0 : i32
    %c0_i32_0 = arith.constant 0 : i32
    %c0_i32_1 = arith.constant 0 : i32
    return %arg0, %c0_i32, %c0_i32_0 : i32, i32, i32
  }
}

module attributes {stable_mosaic.version = 11 : i64} {
  func.func @_blend_kernel(%arg0: i32, %arg1: memref<32x32xbf16, #tpu.memory_space<vmem>>, %arg2: memref<32x1xf32, #tpu.memory_space<vmem>>, %arg3: memref<1x32x256xbf16, #tpu.memory_space<vmem>>, %arg4: memref<1x256xf32, #tpu.memory_space<vmem>>, %arg5: memref<32x256xbf16, #tpu.memory_space<vmem>>) attributes {dimension_semantics = [#tpu.dimension_semantics<parallel>], iteration_bounds = array<i64: 2>, scalar_prefetch = 0 : i64, scratch_operands = 0 : i64, tpu.core_type = #tpu.core_type<tc>, window_params = [{pipeline_mode = #tpu.pipeline_mode<synchronous>, transform_indices = @transform_0, window_bounds = array<i64: 32, 32>}, {pipeline_mode = #tpu.pipeline_mode<synchronous>, transform_indices = @transform_1, window_bounds = array<i64: 32, 1>}, {transform_indices = @transform_2, window_bounds = array<i64: 1, 32, 256>}, {transform_indices = @transform_3, window_bounds = array<i64: 1, 256>}, {transform_indices = @transform_4, window_bounds = array<i64: 32, 256>}]} {
    %c0 = arith.constant 0 : index
    %c0_0 = arith.constant 0 : index
    %0 = vector.load %arg1[%c0, %c0_0] : memref<32x32xbf16, #tpu.memory_space<vmem>>, vector<32x32xbf16>
    %c0_1 = arith.constant 0 : index
    %c0_2 = arith.constant 0 : index
    %c0_3 = arith.constant 0 : index
    %1 = vector.load %arg3[%c0_1, %c0_2, %c0_3] : memref<1x32x256xbf16, #tpu.memory_space<vmem>>, vector<1x32x256xbf16>
    %2 = vector.shape_cast %1 : vector<1x32x256xbf16> to vector<32x256xbf16>
    %cst = arith.constant dense<0.000000e+00> : vector<32x256xf32>
    %3 = tpu.matmul %0, %2, %cst {dimension_numbers = #tpu.dot_dimension_numbers<[1], [0], [0], [1], [0, 0, 1, 1], [], []>} : vector<32x32xbf16>, vector<32x256xbf16>, vector<32x256xf32> -> vector<32x256xf32>
    %c0_4 = arith.constant 0 : index
    %c0_5 = arith.constant 0 : index
    %4 = vector.load %arg2[%c0_4, %c0_5] : memref<32x1xf32, #tpu.memory_space<vmem>>, vector<32x1xf32>
    %5 = vector.broadcast %4 : vector<32x1xf32> to vector<32x256xf32>
    %6 = arith.addf %3, %5 : vector<32x256xf32>
    %c0_6 = arith.constant 0 : index
    %c0_7 = arith.constant 0 : index
    %7 = vector.load %arg4[%c0_6, %c0_7] : memref<1x256xf32, #tpu.memory_space<vmem>>, vector<1x256xf32>
    %8 = vector.broadcast %7 : vector<1x256xf32> to vector<32x256xf32>
    %9 = arith.mulf %6, %8 : vector<32x256xf32>
    %10 = arith.truncf %9 : vector<32x256xf32> to vector<32x256xbf16>
    %c0_8 = arith.constant 0 : index
    %c0_9 = arith.constant 0 : index
    %11 = vector.load %arg5[%c0_8, %c0_9] : memref<32x256xbf16, #tpu.memory_space<vmem>>, vector<32x256xbf16>
    tpu.vector_store %arg5[%c0_8, %c0_9], %10 {strides = array<i32>} : memref<32x256xbf16, #tpu.memory_space<vmem>>, vector<32x256xbf16>,
    return
  }
  func.func @transform_0(%arg0: i32) -> (i32, i32) {
    %c0_i32 = arith.constant 0 : i32
    %c0_i32_0 = arith.constant 0 : i32
    %c0_i32_1 = arith.constant 0 : i32
    return %c0_i32, %c0_i32_0 : i32, i32
  }
  func.func @transform_1(%arg0: i32) -> (i32, i32) {
    %c0_i32 = arith.constant 0 : i32
    %c0_i32_0 = arith.constant 0 : i32
    %c0_i32_1 = arith.constant 0 : i32
    return %c0_i32, %c0_i32_0 : i32, i32
  }
  func.func @transform_2(%arg0: i32) -> (i32, i32, i32) {
    %c0_i32 = arith.constant 0 : i32
    %c0_i32_0 = arith.constant 0 : i32
    %c0_i32_1 = arith.constant 0 : i32
    return %c0_i32, %c0_i32_0, %arg0 : i32, i32, i32
  }
  func.func @transform_3(%arg0: i32) -> (i32, i32) {
    %c0_i32 = arith.constant 0 : i32
    %c0_i32_0 = arith.constant 0 : i32
    return %c0_i32, %arg0 : i32, i32
  }
  func.func @transform_4(%arg0: i32) -> (i32, i32) {
    %c0_i32 = arith.constant 0 : i32
    %c0_i32_0 = arith.constant 0 : i32
    return %c0_i32, %arg0 : i32, i32
  }
}

module attributes {stable_mosaic.version = 11 : i64} {
  func.func @_transform_kernel(%arg0: i32, %arg1: memref<32x32xf32, #tpu.memory_space<vmem>>, %arg2: memref<1x32xf32, #tpu.memory_space<vmem>>, %arg3: memref<32x32xf32, #tpu.memory_space<vmem>>, %arg4: memref<1x32xf32, #tpu.memory_space<vmem>>, %arg5: memref<1x32xf32, #tpu.memory_space<vmem>>, %arg6: memref<32x1xf32, #tpu.memory_space<vmem>>, %arg7: memref<32x32xf32, #tpu.memory_space<vmem>>, %arg8: memref<32x1xf32, #tpu.memory_space<vmem>>) attributes {dimension_semantics = [#tpu.dimension_semantics<arbitrary>], iteration_bounds = array<i64: 1>, scalar_prefetch = 0 : i64, scratch_operands = 0 : i64, tpu.core_type = #tpu.core_type<tc>, window_params = [{pipeline_mode = #tpu.pipeline_mode<synchronous>, transform_indices = @transform_0, window_bounds = array<i64: 32, 32>}, {pipeline_mode = #tpu.pipeline_mode<synchronous>, transform_indices = @transform_1, window_bounds = array<i64: 1, 32>}, {pipeline_mode = #tpu.pipeline_mode<synchronous>, transform_indices = @transform_2, window_bounds = array<i64: 32, 32>}, {pipeline_mode = #tpu.pipeline_mode<synchronous>, transform_indices = @transform_3, window_bounds = array<i64: 1, 32>}, {pipeline_mode = #tpu.pipeline_mode<synchronous>, transform_indices = @transform_4, window_bounds = array<i64: 1, 32>}, {pipeline_mode = #tpu.pipeline_mode<synchronous>, transform_indices = @transform_5, window_bounds = array<i64: 32, 1>}, {pipeline_mode = #tpu.pipeline_mode<synchronous>, transform_indices = @transform_6, window_bounds = array<i64: 32, 32>}, {pipeline_mode = #tpu.pipeline_mode<synchronous>, transform_indices = @transform_7, window_bounds = array<i64: 32, 1>}]} {
    %c0 = arith.constant 0 : index
    %c0_0 = arith.constant 0 : index
    %0 = vector.load %arg1[%c0, %c0_0] : memref<32x32xf32, #tpu.memory_space<vmem>>, vector<32x32xf32>
    %c0_1 = arith.constant 0 : index
    %c0_2 = arith.constant 0 : index
    %1 = vector.load %arg2[%c0_1, %c0_2] : memref<1x32xf32, #tpu.memory_space<vmem>>, vector<1x32xf32>
    %2 = vector.broadcast %1 : vector<1x32xf32> to vector<32x32xf32>
    %3 = arith.mulf %0, %2 : vector<32x32xf32>
    %c0_3 = arith.constant 0 : index
    %c0_4 = arith.constant 0 : index
    %4 = vector.load %arg1[%c0_3, %c0_4] : memref<32x32xf32, #tpu.memory_space<vmem>>, vector<32x32xf32>
    %cst = arith.constant dense<0.000000e+00> : vector<32x32xf32>
    %5 = tpu.matmul %3, %4, %cst {dimension_numbers = #tpu.dot_dimension_numbers<[1], [1], [0], [0], [0, 0, 1, 0], [], []>} : vector<32x32xf32>, vector<32x32xf32>, vector<32x32xf32> -> vector<32x32xf32>
    %c0_5 = arith.constant 0 : index
    %c0_6 = arith.constant 0 : index
    %6 = vector.load %arg3[%c0_5, %c0_6] : memref<32x32xf32, #tpu.memory_space<vmem>>, vector<32x32xf32>
    %c0_7 = arith.constant 0 : index
    %c0_8 = arith.constant 0 : index
    %7 = vector.load %arg4[%c0_7, %c0_8] : memref<1x32xf32, #tpu.memory_space<vmem>>, vector<1x32xf32>
    %8 = vector.broadcast %7 : vector<1x32xf32> to vector<32x32xf32>
    %9 = arith.mulf %6, %8 : vector<32x32xf32>
    %c0_9 = arith.constant 0 : index
    %c0_10 = arith.constant 0 : index
    %10 = vector.load %arg3[%c0_9, %c0_10] : memref<32x32xf32, #tpu.memory_space<vmem>>, vector<32x32xf32>
    %cst_11 = arith.constant dense<0.000000e+00> : vector<32x32xf32>
    %11 = tpu.matmul %9, %10, %cst_11 {dimension_numbers = #tpu.dot_dimension_numbers<[1], [1], [0], [0], [0, 0, 1, 0], [], []>} : vector<32x32xf32>, vector<32x32xf32>, vector<32x32xf32> -> vector<32x32xf32>
    %cst_12 = arith.constant dense<0.000000e+00> : vector<32x32xf32>
    %12 = tpu.matmul %11, %5, %cst_12 {dimension_numbers = #tpu.dot_dimension_numbers<[1], [0], [0], [1], [0, 0, 1, 1], [], []>} : vector<32x32xf32>, vector<32x32xf32>, vector<32x32xf32> -> vector<32x32xf32>
    %13 = tpu.iota {dimensions = array<i32: 0>} : vector<32x32xi32>
    %14 = tpu.iota {dimensions = array<i32: 1>} : vector<32x32xi32>
    %15 = arith.cmpi eq, %13, %14 : vector<32x32xi32>
    %16 = arith.extui %15 : vector<32x32xi1> to vector<32x32xi32>
    %17 = arith.sitofp %16 : vector<32x32xi32> to vector<32x32xf32>
    %cst_13 = arith.constant 6.000000e-01 : f32
    %18 = vector.broadcast %cst_13 : f32 to vector<32x32xf32>
    %19 = arith.mulf %18, %12 : vector<32x32xf32>
    %cst_14 = arith.constant 4.000000e-01 : f32
    %20 = vector.broadcast %cst_14 : f32 to vector<32x32xf32>
    %21 = arith.mulf %20, %17 : vector<32x32xf32>
    %22 = arith.addf %19, %21 : vector<32x32xf32>
    %c0_15 = arith.constant 0 : index
    %c0_16 = arith.constant 0 : index
    %23 = vector.load %arg7[%c0_15, %c0_16] : memref<32x32xf32, #tpu.memory_space<vmem>>, vector<32x32xf32>
    tpu.vector_store %arg7[%c0_15, %c0_16], %22 {strides = array<i32>} : memref<32x32xf32, #tpu.memory_space<vmem>>, vector<32x32xf32>,
    %c0_17 = arith.constant 0 : index
    %c0_18 = arith.constant 0 : index
    %24 = vector.load %arg5[%c0_17, %c0_18] : memref<1x32xf32, #tpu.memory_space<vmem>>, vector<1x32xf32>
    %25 = vector.broadcast %24 : vector<1x32xf32> to vector<32x32xf32>
    %26 = arith.mulf %12, %25 : vector<32x32xf32>
    %cst_19 = arith.constant dense<0.000000e+00> : vector<32xf32>
    %27 = vector.multi_reduction <add>, %26, %cst_19 [1] : vector<32x32xf32> to vector<32xf32>
    %28 = vector.shape_cast %27 : vector<32xf32> to vector<32x1xf32>
    %c0_20 = arith.constant 0 : index
    %c0_21 = arith.constant 0 : index
    %29 = vector.load %arg6[%c0_20, %c0_21] : memref<32x1xf32, #tpu.memory_space<vmem>>, vector<32x1xf32>
    %30 = arith.subf %29, %28 : vector<32x1xf32>
    %cst_22 = arith.constant 6.000000e-01 : f32
    %31 = vector.broadcast %cst_22 : f32 to vector<32x1xf32>
    %32 = arith.mulf %31, %30 : vector<32x1xf32>
    %c0_23 = arith.constant 0 : index
    %c0_24 = arith.constant 0 : index
    %33 = vector.load %arg8[%c0_23, %c0_24] : memref<32x1xf32, #tpu.memory_space<vmem>>, vector<32x1xf32>
    tpu.vector_store %arg8[%c0_23, %c0_24], %32 {strides = array<i32>} : memref<32x1xf32, #tpu.memory_space<vmem>>, vector<32x1xf32>,
    return
  }
  func.func @transform_0(%arg0: i32) -> (i32, i32) {
    %c0_i32 = arith.constant 0 : i32
    %c0_i32_0 = arith.constant 0 : i32
    %c0_i32_1 = arith.constant 0 : i32
    return %c0_i32, %c0_i32_0 : i32, i32
  }
  func.func @transform_1(%arg0: i32) -> (i32, i32) {
    %c0_i32 = arith.constant 0 : i32
    %c0_i32_0 = arith.constant 0 : i32
    %c0_i32_1 = arith.constant 0 : i32
    return %c0_i32, %c0_i32_0 : i32, i32
  }
  func.func @transform_2(%arg0: i32) -> (i32, i32) {
    %c0_i32 = arith.constant 0 : i32
    %c0_i32_0 = arith.constant 0 : i32
    %c0_i32_1 = arith.constant 0 : i32
    return %c0_i32, %c0_i32_0 : i32, i32
  }
  func.func @transform_3(%arg0: i32) -> (i32, i32) {
    %c0_i32 = arith.constant 0 : i32
    %c0_i32_0 = arith.constant 0 : i32
    %c0_i32_1 = arith.constant 0 : i32
    return %c0_i32, %c0_i32_0 : i32, i32
  }
  func.func @transform_4(%arg0: i32) -> (i32, i32) {
    %c0_i32 = arith.constant 0 : i32
    %c0_i32_0 = arith.constant 0 : i32
    %c0_i32_1 = arith.constant 0 : i32
    return %c0_i32, %c0_i32_0 : i32, i32
  }
  func.func @transform_5(%arg0: i32) -> (i32, i32) {
    %c0_i32 = arith.constant 0 : i32
    %c0_i32_0 = arith.constant 0 : i32
    %c0_i32_1 = arith.constant 0 : i32
    return %c0_i32, %c0_i32_0 : i32, i32
  }
  func.func @transform_6(%arg0: i32) -> (i32, i32) {
    %c0_i32 = arith.constant 0 : i32
    %c0_i32_0 = arith.constant 0 : i32
    %c0_i32_1 = arith.constant 0 : i32
    return %c0_i32, %c0_i32_0 : i32, i32
  }
  func.func @transform_7(%arg0: i32) -> (i32, i32) {
    %c0_i32 = arith.constant 0 : i32
    %c0_i32_0 = arith.constant 0 : i32
    %c0_i32_1 = arith.constant 0 : i32
    return %c0_i32, %c0_i32_0 : i32, i32
  }
}

module attributes {stable_mosaic.version = 11 : i64} {
  func.func @_dec_conv_kernel(%arg0: i32, %arg1: memref<9x16x32xbf16, #tpu.memory_space<vmem>>, %arg2: memref<16x1xf32, #tpu.memory_space<vmem>>, %arg3: memref<32x128xbf16, #tpu.memory_space<vmem>>, %arg4: memref<32x256xbf16, #tpu.memory_space<vmem>>, %arg5: memref<32x128xbf16, #tpu.memory_space<vmem>>, %arg6: memref<16x256xf32, #tpu.memory_space<vmem>>) attributes {dimension_semantics = [#tpu.dimension_semantics<parallel>], iteration_bounds = array<i64: 2>, scalar_prefetch = 0 : i64, scratch_operands = 0 : i64, tpu.core_type = #tpu.core_type<tc>, window_params = [{pipeline_mode = #tpu.pipeline_mode<synchronous>, transform_indices = @transform_0, window_bounds = array<i64: 9, 16, 32>}, {pipeline_mode = #tpu.pipeline_mode<synchronous>, transform_indices = @transform_1, window_bounds = array<i64: 16, 1>}, {transform_indices = @transform_2, window_bounds = array<i64: 32, 128>}, {transform_indices = @transform_3, window_bounds = array<i64: 32, 256>}, {transform_indices = @transform_4, window_bounds = array<i64: 32, 128>}, {transform_indices = @transform_5, window_bounds = array<i64: 16, 256>}]} {
    %c0 = arith.constant 0 : index
    %c0_0 = arith.constant 0 : index
    %0 = vector.load %arg3[%c0, %c0_0] : memref<32x128xbf16, #tpu.memory_space<vmem>>, vector<32x128xbf16>
    %c0_1 = arith.constant 0 : index
    %c0_2 = arith.constant 0 : index
    %1 = vector.load %arg4[%c0_1, %c0_2] : memref<32x256xbf16, #tpu.memory_space<vmem>>, vector<32x256xbf16>
    %c0_3 = arith.constant 0 : index
    %c0_4 = arith.constant 0 : index
    %2 = vector.load %arg5[%c0_3, %c0_4] : memref<32x128xbf16, #tpu.memory_space<vmem>>, vector<32x128xbf16>
    %3 = vector.extract_strided_slice %0 {offsets = [0, 109], sizes = [32, 19], strides = [1, 1]} : vector<32x128xbf16> to vector<32x19xbf16>
    %4 = vector.extract_strided_slice %2 {offsets = [0, 0], sizes = [32, 19], strides = [1, 1]} : vector<32x128xbf16> to vector<32x19xbf16>
    %5 = tpu.concatenate %3, %1, %4 in 1 : vector<32x19xbf16>, vector<32x256xbf16>, vector<32x19xbf16> -> vector<32x294xbf16>
    %6 = vector.extract_strided_slice %5 {offsets = [0, 0], sizes = [32, 256], strides = [1, 1]} : vector<32x294xbf16> to vector<32x256xbf16>
    %c0_5 = arith.constant 0 : index
    %c0_6 = arith.constant 0 : index
    %c0_7 = arith.constant 0 : index
    %7 = vector.load %arg1[%c0_5, %c0_6, %c0_7] : memref<9x16x32xbf16, #tpu.memory_space<vmem>>, vector<1x16x32xbf16>
    %8 = vector.shape_cast %7 : vector<1x16x32xbf16> to vector<16x32xbf16>
    %cst = arith.constant dense<0.000000e+00> : vector<16x256xf32>
    %9 = tpu.matmul %8, %6, %cst {dimension_numbers = #tpu.dot_dimension_numbers<[1], [0], [0], [1], [0, 0, 1, 1], [], []>} : vector<16x32xbf16>, vector<32x256xbf16>, vector<16x256xf32> -> vector<16x256xf32>
    %10 = vector.extract_strided_slice %5 {offsets = [0, 1], sizes = [32, 256], strides = [1, 1]} : vector<32x294xbf16> to vector<32x256xbf16>
    %c1 = arith.constant 1 : index
    %c0_8 = arith.constant 0 : index
    %c0_9 = arith.constant 0 : index
    %11 = vector.load %arg1[%c1, %c0_8, %c0_9] : memref<9x16x32xbf16, #tpu.memory_space<vmem>>, vector<1x16x32xbf16>
    %12 = vector.shape_cast %11 : vector<1x16x32xbf16> to vector<16x32xbf16>
    %cst_10 = arith.constant dense<0.000000e+00> : vector<16x256xf32>
    %13 = tpu.matmul %12, %10, %cst_10 {dimension_numbers = #tpu.dot_dimension_numbers<[1], [0], [0], [1], [0, 0, 1, 1], [], []>} : vector<16x32xbf16>, vector<32x256xbf16>, vector<16x256xf32> -> vector<16x256xf32>
    %14 = arith.addf %9, %13 : vector<16x256xf32>
    %15 = vector.extract_strided_slice %5 {offsets = [0, 2], sizes = [32, 256], strides = [1, 1]} : vector<32x294xbf16> to vector<32x256xbf16>
    %c2 = arith.constant 2 : index
    %c0_11 = arith.constant 0 : index
    %c0_12 = arith.constant 0 : index
    %16 = vector.load %arg1[%c2, %c0_11, %c0_12] : memref<9x16x32xbf16, #tpu.memory_space<vmem>>, vector<1x16x32xbf16>
    %17 = vector.shape_cast %16 : vector<1x16x32xbf16> to vector<16x32xbf16>
    %cst_13 = arith.constant dense<0.000000e+00> : vector<16x256xf32>
    %18 = tpu.matmul %17, %15, %cst_13 {dimension_numbers = #tpu.dot_dimension_numbers<[1], [0], [0], [1], [0, 0, 1, 1], [], []>} : vector<16x32xbf16>, vector<32x256xbf16>, vector<16x256xf32> -> vector<16x256xf32>
    %19 = arith.addf %14, %18 : vector<16x256xf32>
    %20 = vector.extract_strided_slice %5 {offsets = [0, 18], sizes = [32, 256], strides = [1, 1]} : vector<32x294xbf16> to vector<32x256xbf16>
    %c3 = arith.constant 3 : index
    %c0_14 = arith.constant 0 : index
    %c0_15 = arith.constant 0 : index
    %21 = vector.load %arg1[%c3, %c0_14, %c0_15] : memref<9x16x32xbf16, #tpu.memory_space<vmem>>, vector<1x16x32xbf16>
    %22 = vector.shape_cast %21 : vector<1x16x32xbf16> to vector<16x32xbf16>
    %cst_16 = arith.constant dense<0.000000e+00> : vector<16x256xf32>
    %23 = tpu.matmul %22, %20, %cst_16 {dimension_numbers = #tpu.dot_dimension_numbers<[1], [0], [0], [1], [0, 0, 1, 1], [], []>} : vector<16x32xbf16>, vector<32x256xbf16>, vector<16x256xf32> -> vector<16x256xf32>
    %24 = arith.addf %19, %23 : vector<16x256xf32>
    %25 = vector.extract_strided_slice %5 {offsets = [0, 19], sizes = [32, 256], strides = [1, 1]} : vector<32x294xbf16> to vector<32x256xbf16>
    %c4 = arith.constant 4 : index
    %c0_17 = arith.constant 0 : index
    %c0_18 = arith.constant 0 : index
    %26 = vector.load %arg1[%c4, %c0_17, %c0_18] : memref<9x16x32xbf16, #tpu.memory_space<vmem>>, vector<1x16x32xbf16>
    %27 = vector.shape_cast %26 : vector<1x16x32xbf16> to vector<16x32xbf16>
    %cst_19 = arith.constant dense<0.000000e+00> : vector<16x256xf32>
    %28 = tpu.matmul %27, %25, %cst_19 {dimension_numbers = #tpu.dot_dimension_numbers<[1], [0], [0], [1], [0, 0, 1, 1], [], []>} : vector<16x32xbf16>, vector<32x256xbf16>, vector<16x256xf32> -> vector<16x256xf32>
    %29 = arith.addf %24, %28 : vector<16x256xf32>
    %30 = vector.extract_strided_slice %5 {offsets = [0, 20], sizes = [32, 256], strides = [1, 1]} : vector<32x294xbf16> to vector<32x256xbf16>
    %c5 = arith.constant 5 : index
    %c0_20 = arith.constant 0 : index
    %c0_21 = arith.constant 0 : index
    %31 = vector.load %arg1[%c5, %c0_20, %c0_21] : memref<9x16x32xbf16, #tpu.memory_space<vmem>>, vector<1x16x32xbf16>
    %32 = vector.shape_cast %31 : vector<1x16x32xbf16> to vector<16x32xbf16>
    %cst_22 = arith.constant dense<0.000000e+00> : vector<16x256xf32>
    %33 = tpu.matmul %32, %30, %cst_22 {dimension_numbers = #tpu.dot_dimension_numbers<[1], [0], [0], [1], [0, 0, 1, 1], [], []>} : vector<16x32xbf16>, vector<32x256xbf16>, vector<16x256xf32> -> vector<16x256xf32>
    %34 = arith.addf %29, %33 : vector<16x256xf32>
    %35 = vector.extract_strided_slice %5 {offsets = [0, 36], sizes = [32, 256], strides = [1, 1]} : vector<32x294xbf16> to vector<32x256xbf16>
    %c6 = arith.constant 6 : index
    %c0_23 = arith.constant 0 : index
    %c0_24 = arith.constant 0 : index
    %36 = vector.load %arg1[%c6, %c0_23, %c0_24] : memref<9x16x32xbf16, #tpu.memory_space<vmem>>, vector<1x16x32xbf16>
    %37 = vector.shape_cast %36 : vector<1x16x32xbf16> to vector<16x32xbf16>
    %cst_25 = arith.constant dense<0.000000e+00> : vector<16x256xf32>
    %38 = tpu.matmul %37, %35, %cst_25 {dimension_numbers = #tpu.dot_dimension_numbers<[1], [0], [0], [1], [0, 0, 1, 1], [], []>} : vector<16x32xbf16>, vector<32x256xbf16>, vector<16x256xf32> -> vector<16x256xf32>
    %39 = arith.addf %34, %38 : vector<16x256xf32>
    %40 = vector.extract_strided_slice %5 {offsets = [0, 37], sizes = [32, 256], strides = [1, 1]} : vector<32x294xbf16> to vector<32x256xbf16>
    %c7 = arith.constant 7 : index
    %c0_26 = arith.constant 0 : index
    %c0_27 = arith.constant 0 : index
    %41 = vector.load %arg1[%c7, %c0_26, %c0_27] : memref<9x16x32xbf16, #tpu.memory_space<vmem>>, vector<1x16x32xbf16>
    %42 = vector.shape_cast %41 : vector<1x16x32xbf16> to vector<16x32xbf16>
    %cst_28 = arith.constant dense<0.000000e+00> : vector<16x256xf32>
    %43 = tpu.matmul %42, %40, %cst_28 {dimension_numbers = #tpu.dot_dimension_numbers<[1], [0], [0], [1], [0, 0, 1, 1], [], []>} : vector<16x32xbf16>, vector<32x256xbf16>, vector<16x256xf32> -> vector<16x256xf32>
    %44 = arith.addf %39, %43 : vector<16x256xf32>
    %45 = vector.extract_strided_slice %5 {offsets = [0, 38], sizes = [32, 256], strides = [1, 1]} : vector<32x294xbf16> to vector<32x256xbf16>
    %c8 = arith.constant 8 : index
    %c0_29 = arith.constant 0 : index
    %c0_30 = arith.constant 0 : index
    %46 = vector.load %arg1[%c8, %c0_29, %c0_30] : memref<9x16x32xbf16, #tpu.memory_space<vmem>>, vector<1x16x32xbf16>
    %47 = vector.shape_cast %46 : vector<1x16x32xbf16> to vector<16x32xbf16>
    %cst_31 = arith.constant dense<0.000000e+00> : vector<16x256xf32>
    %48 = tpu.matmul %47, %45, %cst_31 {dimension_numbers = #tpu.dot_dimension_numbers<[1], [0], [0], [1], [0, 0, 1, 1], [], []>} : vector<16x32xbf16>, vector<32x256xbf16>, vector<16x256xf32> -> vector<16x256xf32>
    %49 = arith.addf %44, %48 : vector<16x256xf32>
    %c0_32 = arith.constant 0 : index
    %c0_33 = arith.constant 0 : index
    %50 = vector.load %arg2[%c0_32, %c0_33] : memref<16x1xf32, #tpu.memory_space<vmem>>, vector<16x1xf32>
    %51 = vector.broadcast %50 : vector<16x1xf32> to vector<16x256xf32>
    %52 = arith.addf %49, %51 : vector<16x256xf32>
    %c0_34 = arith.constant 0 : index
    %c0_35 = arith.constant 0 : index
    %53 = vector.load %arg6[%c0_34, %c0_35] : memref<16x256xf32, #tpu.memory_space<vmem>>, vector<16x256xf32>
    tpu.vector_store %arg6[%c0_34, %c0_35], %52 {strides = array<i32>} : memref<16x256xf32, #tpu.memory_space<vmem>>, vector<16x256xf32>,
    return
  }
  func.func @transform_0(%arg0: i32) -> (i32, i32, i32) {
    %c0_i32 = arith.constant 0 : i32
    %c0_i32_0 = arith.constant 0 : i32
    %c0_i32_1 = arith.constant 0 : i32
    %c0_i32_2 = arith.constant 0 : i32
    return %c0_i32, %c0_i32_0, %c0_i32_1 : i32, i32, i32
  }
  func.func @transform_1(%arg0: i32) -> (i32, i32) {
    %c0_i32 = arith.constant 0 : i32
    %c0_i32_0 = arith.constant 0 : i32
    %c0_i32_1 = arith.constant 0 : i32
    return %c0_i32, %c0_i32_0 : i32, i32
  }
  func.func @transform_2(%arg0: i32) -> (i32, i32) {
    %c2_i32 = arith.constant 2 : i32
    %0 = arith.muli %arg0, %c2_i32 : i32
    %c1_i32 = arith.constant 1 : i32
    %1 = arith.subi %0, %c1_i32 : i32
    %c0_i32 = arith.constant 0 : i32
    %2 = arith.maxsi %1, %c0_i32 : i32
    %c0_i32_0 = arith.constant 0 : i32
    %c0_i32_1 = arith.constant 0 : i32
    return %c0_i32_0, %2 : i32, i32
  }
  func.func @transform_3(%arg0: i32) -> (i32, i32) {
    %c0_i32 = arith.constant 0 : i32
    %c0_i32_0 = arith.constant 0 : i32
    return %c0_i32, %arg0 : i32, i32
  }
  func.func @transform_4(%arg0: i32) -> (i32, i32) {
    %c1_i32 = arith.constant 1 : i32
    %0 = arith.addi %arg0, %c1_i32 : i32
    %c2_i32 = arith.constant 2 : i32
    %1 = arith.muli %0, %c2_i32 : i32
    %c3_i32 = arith.constant 3 : i32
    %2 = arith.minsi %1, %c3_i32 : i32
    %c0_i32 = arith.constant 0 : i32
    %c0_i32_0 = arith.constant 0 : i32
    return %c0_i32, %2 : i32, i32
  }
  func.func @transform_5(%arg0: i32) -> (i32, i32) {
    %c0_i32 = arith.constant 0 : i32
    %c0_i32_0 = arith.constant 0 : i32
    return %c0_i32, %arg0 : i32, i32
  }
}

</mosaic_0001>

<bundles_post_ra>
// kernel: custom-call.3
= control target key start
LH: loop header
LB: loop body
LE: loop exit
PB: predicated region body
PF: predicated region fallthrough
CT: control target
= control target key end

     0   :  { %s2649_s0 = inlined_call_operand.vmem [shape: f32[2,16,16], index: 0, kind: input, shape index: {}]   ;;  %s2650_s1 = inlined_call_operand.vmem [shape: f32[2,16,16], index: 1, kind: input, shape index: {}]   ;;  %s2651_s2 = inlined_call_operand.vmem [shape: f32[2,16,16], index: 2, kind: input, shape index: {}]   ;;  %s2652_s3 = inlined_call_operand.vmem [shape: f32[2,16,16], index: 3, kind: input, shape index: {}]   ;;  %s2653_s4 = inlined_call_operand.vmem [shape: f32[2,16], index: 4, kind: output, shape index: {0}]   ;;  %s2654_s5 = inlined_call_operand.vmem [shape: f32[2,16], index: 5, kind: output, shape index: {1}]   ;;  %s2655_s6 = inlined_call_operand.vmem [shape: f32[2,16,16], index: 6, kind: output, shape index: {2}]   ;;  %s2656_s7 = inlined_call_operand.vmem [shape: f32[2,16,16], index: 7, kind: output, shape index: {3}]   ;;  %s2657_s8 = inlined_call_operand.vmem [shape: f32[2,16,16], index: 8, kind: output, shape index: {4}]   ;;  %s2658_s9 = inlined_call_operand.vmem [shape: f32[2,16,16], index: 9, kind: output, shape index: {5}]  }
   0x1   :  { %2659 = sst [smem:[#allocation25_spill]] %s2649_s0 }
   0x2   :  { %s2119_s30 = smov 0   ;;  %s2121_s10 = smov 0  }
   0x3   :  { %s2123_s11 = smov 0  }
   0x4 LB: > { %s2135_s12 = sadd.s32 4294967295, %s2056_s11   ;;  %s2138_s13 = sadd.s32 1, %s2056_s11   ;;  %s2056_s11 = sphi %s2123_s11, %s2669_s11   ;;  %s2052_s10 = sphi %s2121_s10, %s2668_s10   ;;  %s2048_s30 = sphi %s2119_s30, %s2667_s30  }
   0x5   : > { %s20_s14 = sshrl.u32 %s2056_s11, 3  ;;  %s21_s15 = sshrl.u32 %s2138_s13, 3 }
   0x6   : > { %s22_s16 = ssub.s32 %s20_s14, %s21_s15  ;;  %s25_s17 = sadd.s32 1, %s2052_s10 }
   0x7   : > { %p23_p0 = scmp.eq.s32.totalorder %s22_s16, 0  ;;  %p35_p1 = scmp.ne.s32.totalorder %s2052_s10, %s2048_s30 }
   0x8   : > { %p36_p2 = scmp.eq.s32.totalorder %s2135_s12, 1  ;;  %p1814_p4 = scmp.ge.s32.totalorder %s2056_s11, 2 }
   0x9   : > { %s2147_s18 = scalar_select %p23_p0, %s2052_s10, %s25_s17  }
   0xa   : > { %p2149_p3 = por %p36_p2, %p35_p1  ;;  %86 = sbr.rel (%p1814_p4) target bundleno = 23 (0x17), region = 16 }
   0xb   : > { %s88_s20 = sand.u32 (!%p1814_p4), 1, %s2056_s11   ;;  %s1816_s21 = sshll.u32 (!%p1814_p4), %s2056_s11, 4 }
   0xc   : > { %s1815_s22 = sshll.u32 (!%p1814_p4), %s88_s20, 4  ;;  %s2661_s0 = sld [smem:[#allocation25_spill]] (!%p1814_p4) }
   0xd   : > { %s90_s26 = scalar_lea.vmem (!%p1814_p4), [#allocation0], %s1815_s22  ;;  %s117_s29 = scalar_lea.vmem (!%p1814_p4), %s2650_s1, %s1816_s21 }
   0xe   : > { %v130_v2 = vld [vmem:[%s117_s29] sm:$0xff] (!%p1814_p4)  ;;  %v132_v3 = vld [vmem:[%s117_s29 + $0x8] sm:$0xff] (!%p1814_p4)  ;;  %s142_s16 = scalar_lea.vmem (!%p1814_p4), %s2651_s2, %s1816_s21  ;;  %s115_s17 = scalar_lea.vmem (!%p1814_p4), [#allocation1], %s1815_s22 }
   0xf   : > { %131 = vst [vmem:[%s115_s17] sm:$0xff] (!%p1814_p4), %v130_v2  ;;  %133 = vst [vmem:[%s115_s17 + $0x8] sm:$0xff] (!%p1814_p4), %v132_v3  ;;  %v155_v4 = vld [vmem:[%s142_s16] sm:$0xff] (!%p1814_p4)  ;;  %v157_v5 = vld [vmem:[%s142_s16 + $0x8] sm:$0xff] (!%p1814_p4)  ;;  %s167_s24 = scalar_lea.vmem (!%p1814_p4), %s2652_s3, %s1816_s21 }
  0x10   : > { %v180_v6 = vld [vmem:[%s167_s24] sm:$0xff] (!%p1814_p4)  ;;  %v182_v7 = vld [vmem:[%s167_s24 + $0x8] sm:$0xff] (!%p1814_p4) }
  0x12   : > { %s92_s25 = scalar_lea.vmem %s2661_s0, %s1816_s21 }
  0x13   : > { %v105_v0 = vld [vmem:[%s92_s25] sm:$0xff]  ;;  %v107_v1 = vld [vmem:[%s92_s25 + $0x8] sm:$0xff]  ;;  %s140_s25 = scalar_lea.vmem [#allocation2], %s1815_s22 }
  0x14   : > { %106 = vst [vmem:[%s90_s26] sm:$0xff] %v105_v0  ;;  %108 = vst [vmem:[%s90_s26 + $0x8] sm:$0xff] %v107_v1  ;;  %s165_s26 = scalar_lea.vmem [#allocation3], %s1815_s22 }
  0x15   : > { %156 = vst [vmem:[%s140_s25] sm:$0xff] %v155_v4  ;;  %158 = vst [vmem:[%s140_s25 + $0x8] sm:$0xff] %v157_v5 }
  0x16   : > { %181 = vst [vmem:[%s165_s26] sm:$0xff] %v180_v6  ;;  %183 = vst [vmem:[%s165_s26 + $0x8] sm:$0xff] %v182_v7 }
  0x17 PF: > { %p1823_p5 = scmp.ge.s32.totalorder %s2056_s11, 1  ;;  %p188_p6 = scmp.lt.s32.totalorder %s2056_s11, 3 }
  0x19   : > { %p189_p7 = pnand %p1823_p5, %p188_p6 }
  0x1b   : > { %192 = sbr.rel (%p189_p7) target bundleno = 1056 (0x420), region = 96 }
  0x22   : > { %s195_s27 = sand.u32 1, %s2135_s12   ;;  %s229_s28 = sand.u32 1, %s2048_s30   ;;  %v297_v8 = vlaneseq  ;;  %v2066_v19 = vmov 0.0  }
  0x23   : > { %s2172_s21 = sshll.u32 %s195_s27, 4  ;;  %s2174_s22 = sshll.u32 %s229_s28, 1 }
  0x24   : > { %v2176_v9 = vshrl.u32 %v297_v8, 7  ;;  %s197_s29 = scalar_lea.vmem [#allocation0], %s2172_s21  ;;  %v2179_v12 = vand.u32 127, %v297_v8  ;;  %s201_s30 = scalar_lea.vmem [#allocation1], %s2172_s21 }
  0x25   : > { %v257_v10 = vld [vmem:[%s197_s29] sm:$0xff]  ;;  %v1834_v11 = vld [vmem:[%s197_s29 + $0x8] sm:$0xff]  ;;  %s205_s11 = scalar_lea.vmem [#allocation2], %s2172_s21  ;;  %s209_s14 = scalar_lea.vmem [#allocation3], %s2172_s21 }
  0x26   : > { %v302_v9 = vmov %v2176_v9  ;;  %v264_v13 = vld [vmem:[%s201_s30] sm:$0xff]  ;;  %v1836_v14 = vld [vmem:[%s201_s30 + $0x8] sm:$0xff]  ;;  %s2187_s15 = scalar_lea.vmem [#allocation8], %s2172_s21  ;;  %s2192_s16 = scalar_lea.vmem [#allocation9], %s2172_s21  ;;  %v299_v12 = vmov %v2179_v12  ;;  %vm1673_vm4 = vcmp.lt.s32.totalorder %v2179_v12, 16 }
  0x27   : > { %v271_v15 = vld [vmem:[%s205_s11] sm:$0xff]  ;;  %v322_v9 = vmov %v2176_v9  ;;  %v1838_v16 = vld [vmem:[%s205_s11 + $0x8] sm:$0xff]  ;;  %284 = vst [vmem:[%s2187_s15] sm:$0xff] %v2066_v19  ;;  %1842 = vst [vmem:[%s2187_s15 + $0x8] sm:$0xff] %v2066_v19  ;;  %s256_s17 = smov [#allocation12]  ;;  %s263_s20 = smov [#allocation13]  ;;  %v312_v20 = vadd.s32 8, %v302_v9  ;;  %v319_v12 = vmov %v2179_v12  ;;  %vm306_vm0 = vcmp.eq.s32.totalorder %v302_v9, %v299_v12 }
  0x28   : > { %v278_v17 = vld [vmem:[%s209_s14] sm:$0xff]  ;;  %v1840_v18 = vld [vmem:[%s209_s14 + $0x8] sm:$0xff]  ;;  %287 = vst [vmem:[%s2192_s16] sm:$0xff] %v2066_v19  ;;  %1843 = vst [vmem:[%s2192_s16 + $0x8] sm:$0xff] %v2066_v19  ;;  %s2197_s23 = scalar_lea.vmem [#allocation10], %s2172_s21  ;;  %s2202_s24 = scalar_lea.vmem [#allocation11], %s2172_s21  ;;  %v332_v21 = vadd.s32 8, %v322_v9  ;;  %vm326_vm2 = vcmp.eq.s32.totalorder %v322_v9, %v319_v12  ;;  %v1668_v9 = vmov %v2176_v9 }
  0x29   : > { %290 = vst [vmem:[%s2197_s23] sm:$0xff] %v2066_v19  ;;  %1844 = vst [vmem:[%s2197_s23 + $0x8] sm:$0xff] %v2066_v19  ;;  %s270_s25 = smov [#allocation14]  ;;  %s277_s26 = smov [#allocation15]  ;;  %vm313_vm1 = vcmp.eq.s32.totalorder %v312_v20, %v299_v12  ;;  %v1684_v38 = vadd.s32 8, %v1668_v9 }
  0x2a   : > { %293 = vst [vmem:[%s2202_s24] sm:$0xff] %v2066_v19  ;;  %1845 = vst [vmem:[%s2202_s24 + $0x8] sm:$0xff] %v2066_v19  ;;  %s296_s15 = smov %s2187_s15  ;;  %s316_s24 = smov %s2202_s24  ;;  %vm333_vm3 = vcmp.eq.s32.totalorder %v332_v21, %v319_v12  ;;  %v1665_v12 = vmov %v2179_v12 }
  0x2b   : > { %258 = vst [vmem:[%s256_s17] sm:$0xff] %v257_v10  ;;  %1835 = vst [vmem:[%s256_s17 + $0x8] sm:$0xff] %v1834_v11  ;;  %s1669_s21 = smov [#allocation12]  ;;  %s1695_s29 = smov [#allocation13]  ;;  %vm1678_vm5 = vcmp.eq.s32.totalorder %v1668_v9, %v1665_v12  ;;  %v1691_v12 = vmov %v2179_v12  ;;  %vm1685_vm6 = vcmp.eq.s32.totalorder %v1684_v38, %v1665_v12  ;;  %v1740_v9 = vmov %v2176_v9 }
  0x2c   : > { %265 = vst [vmem:[%s263_s20] sm:$0xff] %v264_v13  ;;  %1837 = vst [vmem:[%s263_s20 + $0x8] sm:$0xff] %v1836_v14  ;;  %s1718_s30 = smov [#allocation14]  ;;  %s1741_s11 = smov [#allocation15]  ;;  %v1694_v9 = vmov %v2176_v9  ;;  %v1714_v12 = vmov %v2179_v12  ;;  %v1758_v60 = vadd.s32 8, %v1740_v9 }
  0x2d   : > { %272 = vst [vmem:[%s270_s25] sm:$0xff] %v271_v15  ;;  %1839 = vst [vmem:[%s270_s25 + $0x8] sm:$0xff] %v1838_v16  ;;  %v1737_v12 = vmov %v2179_v12  ;;  %v1717_v9 = vmov %v2176_v9 }
  0x2e   : > { %279 = vst [vmem:[%s277_s26] sm:$0xff] %v278_v17  ;;  %1841 = vst [vmem:[%s277_s26 + $0x8] sm:$0xff] %v1840_v18  ;;  %v303_v22 = vld [vmem:[%s296_s15] sm:$0xff]  ;;  %v1846_v23 = vld [vmem:[%s296_s15 + $0x8] sm:$0xff]  ;;  %vm1750_vm7 = vcmp.eq.s32.totalorder %v1740_v9, %v1737_v12  ;;  %vm1759_vm8 = vcmp.eq.s32.totalorder %v1758_v60, %v1737_v12 }
  0x2f   : > { %v307_v24 = vsel %vm306_vm0, 1.0, %v303_v22  ;;  %v314_v25 = vsel %vm313_vm1, 1.0, %v1846_v23 }
  0x30   : > { %308 = vst [vmem:[%s296_s15] sm:$0xff] %v307_v24  ;;  %1847 = vst [vmem:[%s296_s15 + $0x8] sm:$0xff] %v314_v25 }
  0x31   : > { %v323_v26 = vld [vmem:[%s316_s24] sm:$0xff]  ;;  %v1848_v27 = vld [vmem:[%s316_s24 + $0x8] sm:$0xff] }
  0x32   : > { %v327_v28 = vsel %vm326_vm2, 1.0, %v323_v26  ;;  %v334_v29 = vsel %vm333_vm3, 1.0, %v1848_v27  ;;  %v1675_v30 = vld [vmem:[%s1669_s21] sm:$0xff]  ;;  %v1850_v31 = vld [vmem:[%s1669_s21 + $0x8] sm:$0xff] }
  0x33   : > { %328 = vst [vmem:[%s316_s24] sm:$0xff] %v327_v28  ;;  %1849 = vst [vmem:[%s316_s24 + $0x8] sm:$0xff] %v334_v29  ;;  %v1701_v32 = vld [vmem:[%s1695_s29] sm:$0xff]  ;;  %v1676_v33 = vsel %vm1673_vm4, %v1675_v30, 0.0  ;;  %v1682_v34 = vsel %vm1673_vm4, %v1850_v31, 0.0  ;;  %v1851_v36 = vld [vmem:[%s1695_s29 + $0x8] sm:$0xff] }
  0x34   : > { %v1702_v35 = vsel %vm1673_vm4, %v1701_v32, 0.0  ;;  %v1724_v37 = vld [vmem:[%s1718_s30] sm:$0xff]  ;;  %v1677_v39 = vmul.f32 %v1676_v33, %v1676_v33  ;;  %v1683_v40 = vmul.f32 %v1682_v34, %v1682_v34  ;;  %v1708_v42 = vsel %vm1673_vm4, %v1851_v36, 0.0  ;;  %v1852_v43 = vld [vmem:[%s1718_s30 + $0x8] sm:$0xff] }
  0x35   : > { %v1703_v41 = vmul.f32 %v1702_v35, %v1702_v35  ;;  %v1725_v44 = vsel %vm1673_vm4, %v1724_v37, 0.0  ;;  %v1709_v46 = vmul.f32 %v1708_v42, %v1708_v42  ;;  %v1747_v47 = vld [vmem:[%s1741_s11] sm:$0xff]  ;;  %v1731_v48 = vsel %vm1673_vm4, %v1852_v43, 0.0  ;;  %v1853_v52 = vld [vmem:[%s1741_s11 + $0x8] sm:$0xff] }
  0x36   : > { %v1688_v45 = vadd.f32 %v1683_v40, %v1677_v39  ;;  %v1679_v49 = vsel %vm1678_vm5, 0.0, %v1677_v39  ;;  %v1726_v51 = vmul.f32 %v1725_v44, %v1725_v44  ;;  %v1686_v53 = vsel %vm1685_vm6, 0.0, %v1683_v40 }
  0x37   : > { %v1748_v54 = vsel %vm1673_vm4, %v1747_v47, 0.0  ;;  %v1687_v55 = vadd.f32 %v1686_v53, %v1679_v49  ;;  %v1732_v57 = vmul.f32 %v1731_v48, %v1731_v48  ;;  %v1756_v58 = vsel %vm1673_vm4, %v1853_v52, 0.0 }
  0x38   : > { %v1705_v50 = vadd.f32 %v1703_v41, %v1688_v45  ;;  %v1749_v62 = vmul.f32 %v1748_v54, %v1748_v54  ;;  %v1757_v1 = vmul.f32 %v1756_v58, %v1756_v58 }
  0x39   : > { %v1704_v59 = vadd.f32 %v1703_v41, %v1687_v55 }
  0x3a   : > { %v1711_v56 = vadd.f32 %v1709_v46, %v1705_v50  ;;  %v1751_v4 = vsel %vm1750_vm7, 0.0, %v1749_v62  ;;  %v1760_v7 = vsel %vm1759_vm8, 0.0, %v1757_v1 }
  0x3b   : > { %v1710_v63 = vadd.f32 %v1709_v46, %v1704_v59 }
  0x3c   : > { %v1728_v61 = vadd.f32 %v1726_v51, %v1711_v56 }
  0x3d   : > { %v1727_v2 = vadd.f32 %v1726_v51, %v1710_v63 }
  0x3e   : > { %v1734_v0 = vadd.f32 %v1732_v57, %v1728_v61 }
  0x3f   : > { %v1733_v5 = vadd.f32 %v1732_v57, %v1727_v2 }
  0x40   : > { %v1753_v3 = vadd.f32 %v1749_v62, %v1734_v0 }
  0x41   : > { %v1752_v8 = vadd.f32 %v1751_v4, %v1733_v5 }
  0x42   : > { %v1762_v6 = vadd.f32 %v1757_v1, %v1753_v3 }
  0x43   : > { %v1761_v10 = vadd.f32 %v1760_v7, %v1752_v8 }
  0x44   : > { %1763 = vadd.xlane.f32.xlu0 %v1762_v6 }
  0x48   : > { %1771 = vadd.xlane.f32.xlu0 %v1761_v10 }
  0xd1   : > { %v1764_v11 = vpop.xlane.xlu0 %1763 }
  0xd2   : > { %v1765_v13 = vrot.slane %v1764_v11, 4 }
  0xd4   : > { %v1766_v14 = vadd.f32 %v1765_v13, %v1764_v11 }
  0xd5   : > { %v1772_v15 = vpop.xlane.xlu0 %1771 }
  0xd6   : > { %v1767_v16 = vrot.slane %v1766_v14, 2  ;;  %v1773_v17 = vrot.slane %v1772_v15, 4 }
  0xd8   : > { %v1774_v18 = vadd.f32 %v1773_v17, %v1772_v15  ;;  %v1768_v19 = vadd.f32 %v1767_v16, %v1766_v14 }
  0xda   : > { %v1775_v20 = vrot.slane %v1774_v18, 2  ;;  %v1769_v22 = vrot.slane %v1768_v19, 1 }
  0xdc   : > { %v1776_v21 = vadd.f32 %v1775_v20, %v1774_v18  ;;  %v1770_v25 = vadd.f32 %v1769_v22, %v1768_v19 }
  0xde   : > { %v1777_v23 = vrot.slane %v1776_v21, 1 }
  0xe0   : > { %v1778_v24 = vadd.f32 %v1777_v23, %v1776_v21 }
  0xe2   : > { %1967 = vpush %v1778_v24 }
  0xe3   : > { %1969 = vpush %v1770_v25 }
 0x113   : > { %s1968_s14 = spop %1967 }
 0x114   : > { %s1970_s17 = spop %1969 }
 0x115   : > { %s1781_s20 = smul.f32 1e-10, %s1970_s17 }
 0x117   : > { %p1782_p8 = scmp.le.f32.partialorder %s1968_s14, %s1781_s20 }
 0x118   : > { %s2238_s25 = smov (!%p1782_p8), 0  }
 0x119   : > { %1785 = sbr.rel (%p1782_p8) target bundleno = 1008 (0x3f0), region = 448 }
 0x120 LB: >> { %s2243_s26 = smov 0   ;;  %s2060_s25 = sphi %s2238_s25, %s2662_s25  }
 0x121 LB: >>> { %s472_s21 = smov [#allocation12]  ;;  %v476_v12 = vmov %v2179_v12  ;;  %v479_v9 = vmov %v2176_v9  ;;  %s498_s29 = smov [#allocation13]  ;;  %vm1005_vm8 = vcmp.eq.s32.totalorder %v2176_v9, 0  ;;  %s2064_s26 = sphi %s2243_s26, %s471_s26  }
 0x122   : >>> { %v502_v12 = vmov %v2179_v12  ;;  %v505_v9 = vmov %v2176_v9  ;;  %v480_v26 = vld [vmem:[%s472_s21] sm:$0xff]  ;;  %vm483_vm9 = vcmp.eq.s32.totalorder %v479_v9, %v476_v12  ;;  %v1854_v27 = vld [vmem:[%s472_s21 + $0x8] sm:$0xff]  ;;  %v488_v28 = vadd.s32 8, %v479_v9  ;;  %s524_s30 = smov [#allocation15]  ;;  %s473_s11 = smov [#allocation16] }
 0x123   : >>> { %vm509_vm10 = vcmp.eq.s32.totalorder %v505_v9, %v502_v12  ;;  %v514_v29 = vadd.s32 8, %v505_v9  ;;  %v484_v30 = vsel %vm483_vm9, %v480_v26, 0.0  ;;  %v506_v31 = vld [vmem:[%s498_s29] sm:$0xff]  ;;  %v1855_v32 = vld [vmem:[%s498_s29 + $0x8] sm:$0xff]  ;;  %v528_v12 = vmov %v2179_v12  ;;  %s499_s14 = smov [#allocation17]  ;;  %s525_s17 = smov [#allocation18] }
 0x124   : >>> { %v531_v9 = vmov %v2176_v9  ;;  %vm489_vm11 = vcmp.eq.s32.totalorder %v488_v28, %v476_v12  ;;  %v510_v33 = vsel %vm509_vm10, %v506_v31, 0.0  ;;  %v532_v34 = vld [vmem:[%s524_s30] sm:$0xff]  ;;  %v1856_v38 = vld [vmem:[%s524_s30 + $0x8] sm:$0xff]  ;;  %s554_s20 = smov [#allocation17]  ;;  %s552_s21 = smov [#allocation16]  ;;  %vm1029_vm9 = vcmp.eq.s32.totalorder %v2176_v9, 7 }
 0x125   : >>> { %vm515_vm12 = vcmp.eq.s32.totalorder %v514_v29, %v502_v12  ;;  %vm535_vm13 = vcmp.eq.s32.totalorder %v531_v9, %v528_v12  ;;  %v490_v35 = vsel %vm489_vm11, %v1854_v27, %v484_v30  ;;  %v540_v39 = vadd.s32 8, %v531_v9  ;;  %s556_s29 = smov [#allocation18]  ;;  %s591_s30 = smov [#allocation19] }
 0x126   : >>> { %v516_v36 = vsel %vm515_vm12, %v1855_v32, %v510_v33  ;;  %v536_v37 = vsel %vm535_vm13, %v532_v34, 0.0  ;;  %v491_v40 = vrot.slane %v490_v35, 4  ;;  %v621_v9 = vmov %v2176_v9  ;;  %s2266_s28 = smov [#allocation14]  ;;  %s2268_s27 = smov [#allocation15] }
 0x127   : >>> { %v517_v41 = vrot.slane %v516_v36, 4  ;;  %vm541_vm14 = vcmp.eq.s32.totalorder %v540_v39, %v528_v12  ;;  %v652_v9 = vmov %v2176_v9  ;;  %v622_v28 = vadd.s32 8, %v621_v9  ;;  %s2271_s15 = smov %s2187_s15  ;;  %s2274_s16 = smov %s2192_s16 }
 0x128   : >>> { %v492_v42 = vadd.f32 %v491_v40, %v490_v35  ;;  %v542_v44 = vsel %vm541_vm14, %v1856_v38, %v536_v37  ;;  %v603_v12 = vmov %v2179_v12  ;;  %v606_v9 = vmov %v2176_v9  ;;  %s2278_s23 = smov %s2197_s23  ;;  %s2281_s24 = smov %s2202_s24 }
 0x129   : >>> { %v518_v43 = vadd.f32 %v517_v41, %v516_v36  ;;  %v543_v45 = vrot.slane %v542_v44, 4  ;;  %v618_v12 = vmov %v2179_v12  ;;  %v653_v29 = vadd.s32 8, %v652_v9  ;;  %s2467_s0 = smov [#allocation15]  ;;  %s471_s26 = sadd.s32 1, %s2064_s26  }
 0x12a   : >>> { %v493_v46 = vrot.slane %v492_v42, 2  ;;  %v634_v12 = vmov %v2179_v12  ;;  %v637_v9 = vmov %v2176_v9  ;;  %vm608_vm3 = vcmp.eq.s32.totalorder %v606_v9, %v603_v12  ;;  %p468_p9 = scmp.ge.s32.totalorder %s471_s26, 31  }
 0x12b   : >>> { %v519_v47 = vrot.slane %v518_v43, 2  ;;  %v544_v48 = vadd.f32 %v543_v45, %v542_v44  ;;  %v649_v12 = vmov %v2179_v12  ;;  %vm623_vm5 = vcmp.eq.s32.totalorder %v622_v28, %v618_v12  ;;  %v671_v44 = vld [vmem:[%s2266_s28] sm:$0xff]  ;;  %s419_s26 = smov (%p468_p9), [#allocation15] }
 0x12c   : >>> { %v494_v49 = vadd.f32 %v493_v46, %v492_v42  ;;  %vm639_vm6 = vcmp.eq.s32.totalorder %v637_v9, %v634_v12  ;;  %vm654_vm7 = vcmp.eq.s32.totalorder %v653_v29, %v649_v12  ;;  %v672_v45 = vld [vmem:[%s2268_s27] sm:$0xff]  ;;  %v808_v9 = vmov %v2176_v9 }
 0x12d   : >>> { %v520_v50 = vadd.f32 %v519_v47, %v518_v43  ;;  %v545_v51 = vrot.slane %v544_v48, 2  ;;  %v1093_v46 = vld [vmem:[%s2271_s15] sm:$0xff]  ;;  %v786_v9 = vmov %v2176_v9  ;;  %v805_v12 = vmov %v2179_v12 }
 0x12e   : >>> { %v495_v52 = vrot.slane %v494_v49, 1  ;;  %v1094_v47 = vld [vmem:[%s2274_s16] sm:$0xff]  ;;  %v828_v9 = vmov %v2176_v9  ;;  %v783_v12 = vmov %v2179_v12  ;;  %vm812_vm10 = vcmp.eq.s32.totalorder %v808_v9, %v805_v12 }
 0x12f   : >>> { %v521_v53 = vrot.slane %v520_v50, 1  ;;  %v546_v54 = vadd.f32 %v545_v51, %v544_v48  ;;  %v849_v9 = vmov %v2176_v9  ;;  %v825_v12 = vmov %v2179_v12 }
 0x130   : >>> { %v496_v55 = vadd.f32 %v495_v52, %v494_v49  ;;  %v1095_v49 = vld [vmem:[%s2278_s23] sm:$0xff]  ;;  %v846_v12 = vmov %v2179_v12  ;;  %vm791_vm12 = vcmp.eq.s32.totalorder %v786_v9, %v783_v12  ;;  %vm832_vm14 = vcmp.eq.s32.totalorder %v828_v9, %v825_v12 }
 0x131   : >>> { %v522_v56 = vadd.f32 %v521_v53, %v520_v50  ;;  %v547_v57 = vrot.slane %v546_v54, 1  ;;  %v1096_v50 = vld [vmem:[%s2281_s24] sm:$0xff] }
 0x132   : >>> { %497 = vst [vmem:[%s473_s11] sm:$0x1] %v496_v55  ;;  %s593_s11 = smov [#allocation20] }
 0x133   : >>> { %523 = vst [vmem:[%s499_s14] sm:$0x1] %v522_v56  ;;  %v548_v58 = vadd.f32 %v547_v57, %v546_v54  ;;  %s550_s14 = smov [#allocation21] }
 0x134   : >>> { %s595_s14 = smov %s550_s14 }
 0x135   : >>> { %549 = vst [vmem:[%s525_s17] sm:$0x1] %v548_v58  ;;  %s551_s17 = smov [#allocation22] }
 0x136   : >>> { %s597_s17 = smov %s551_s17 }
 0x139   : >>> { %v553_v61 = vld [vmem:[%s552_s21] sm:$0xff]  ;;  %s614_s21 = smov [#allocation21] }
 0x13a   : >>> { %v555_v59 = vld [vmem:[%s554_s20] sm:$0xff]  ;;  %v576_v11 = vand.u32 2147483647, %v553_v61  ;;  %s599_s20 = smov [#allocation21] }
 0x13b   : >>> { %v559_v60 = vmul.f32 2.0, %v555_v59  ;;  %v577_v17 = vand.u32 2147483647, %v555_v59 }
 0x13c   : >>> { %v557_v62 = vld [vmem:[%s556_s29] sm:$0xff]  ;;  %s630_s29 = smov [#allocation22] }
 0x13d   : >>> { %2018 = vrcp.f32 %v559_v60  ;;  %v558_v63 = vsub.f32 %v557_v62, %v553_v61  ;;  %v578_v13 = vand.u32 2147483647, %v557_v62 }
 0x13f   : >>> { %v579_v16 = vmin.f32 %v576_v11, %v578_v13 }
 0x141   : >>> { %v580_v18 = vmul.f32 1.1920929e-08, %v579_v16 }
 0x143   : >>> { %vm581_vm2 = vcmp.le.f32.partialorder %v577_v17, %v580_v18 }
 0x147   : >>> { %v2019_v0 = vpop.eup %2018 }
 0x148   : >>> { %v561_v1 = vmul.f32 %v2019_v0, %v558_v63 }
 0x14a   : >>> { %v563_v2 = vmul.f32 %v561_v1, %v561_v1  ;;  %vm562_vm1 = vcmp.ge.f32.partialorder %v561_v1, 0.0 }
 0x14c   : >>> { %v564_v3 = vadd.f32 1.0, %v563_v2 }
 0x14e   : >>> { %2020 = vrsqrt.f32 %v564_v3  ;;  %vm567_vm15 = vcmp.eq.f32.partialorder %v564_v3, inf  ;;  %v570_v5 = vand.u32 2147483648, %v564_v3  ;;  %vm569_vm0 = vcmp.eq.f32.partialorder %v564_v3, 0.0 }
 0x158   : >>> { %v2021_v4 = vpop.eup %2020 }
 0x159   : >>> { %v566_v6 = vmul.f32 %v2021_v4, %v564_v3 }
 0x15b   : >>> { %v568_v7 = vsel %vm567_vm15, %v564_v3, %v566_v6 }
 0x15c   : >>> { %v571_v8 = vsel %vm569_vm0, %v570_v5, %v568_v7  ;;  %vm854_vm0 = vcmp.eq.s32.totalorder %v849_v9, %v846_v12 }
 0x15d   : >>> { %v572_v10 = vxor.u32 2147483648, %v571_v8 }
 0x15f   : >>> { %v573_v14 = vsel %vm562_vm1, %v571_v8, %v572_v10 }
 0x160   : >>> { %v574_v15 = vadd.f32 %v573_v14, %v561_v1 }
 0x162   : >>> { %2022 = vrcp.f32 %v574_v15 }
 0x16c   : >>> { %v2023_v19 = vpop.eup %2022 }
 0x16d   : >>> { %v582_v20 = vsel %vm581_vm2, 0.0, %v2023_v19  ;;  %vm876_vm2 = vcmp.eq.s32.totalorder %v2179_v12, 0 }
 0x16e   : >>> { %v583_v21 = vmul.f32 %v582_v20, %v582_v20  ;;  %v587_v22 = vmul.f32 %v582_v20, %v555_v59 }
 0x170   : >>> { %v584_v23 = vadd.f32 1.0, %v583_v21  ;;  %v588_v24 = vsub.f32 %v553_v61, %v587_v22  ;;  %v590_v25 = vadd.f32 %v587_v22, %v557_v62 }
 0x172   : >>> { %2024 = vrsqrt.f32 %v584_v23  ;;  %592 = vst [vmem:[%s591_s30] sm:$0xff] %v588_v24  ;;  %594 = vst [vmem:[%s593_s11] sm:$0xff] %v590_v25  ;;  %s645_s30 = smov [#allocation22]  ;;  %s612_s11 = smov [#allocation23] }
 0x17c   : >>> { %v2025_v26 = vpop.eup %2024 }
 0x17d   : >>> { %596 = vst [vmem:[%s595_s14] sm:$0xff] %v2025_v26  ;;  %v586_v27 = vmul.f32 %v2025_v26, %v582_v20  ;;  %s627_s14 = smov [#allocation23] }
 0x17f   : >>> { %598 = vst [vmem:[%s597_s17] sm:$0xff] %v586_v27  ;;  %s661_s17 = smov [#allocation23] }
 0x184   : >>> { %v600_v30 = vld [vmem:[%s599_s20] ss:$0 sm:$0xff]  ;;  %s643_s20 = smov [#allocation24] }
 0x185   : >>> { %v615_v31 = vld [vmem:[%s614_s21] ss:$0 sm:$0xff]  ;;  %v609_v32 = vsel %vm608_vm3, %v600_v30, 0.0  ;;  %s2262_s21 = smov [#allocation12]  ;;  %vm880_vm3 = vcmp.eq.s32.totalorder %v2179_v12, 1 }
 0x186   : >>> { %v624_v33 = vsel %vm623_vm5, %v615_v31, 0.0  ;;  %610 = vadd.xlane.f32.xlu0 %v609_v32  ;;  %v631_v34 = vld [vmem:[%s630_s29] ss:$0 sm:$0xff]  ;;  %s658_s29 = smov [#allocation24]  ;;  %vm893_vm5 = vcmp.eq.s32.totalorder %v2179_v12, 15 }
 0x187   : >>> { %625 = vadd.xlane.f32.xlu1 %v624_v33  ;;  %v646_v35 = vld [vmem:[%s645_s30] ss:$0 sm:$0xff]  ;;  %v640_v36 = vsel %vm639_vm6, %v631_v34, 0.0  ;;  %s2264_s30 = smov [#allocation13] }
 0x188   : >>> { %v655_v37 = vsel %vm654_vm7, %v646_v35, 0.0  ;;  %v669_v42 = vld [vmem:[%s2262_s21] sm:$0xff] }
 0x189   : >>> { %v670_v43 = vld [vmem:[%s2264_s30] sm:$0xff] }
 0x18a   : >>> { %641 = vadd.xlane.f32.xlu0 %v640_v36 }
 0x18b   : >>> { %656 = vadd.xlane.f32.xlu1 %v655_v37 }
 0x213   : >>> { %v611_v38 = vpop.xlane.xlu0 %610 }
 0x214   : >>> { %v626_v39 = vpop.xlane.xlu1 %625  ;;  %613 = vst [vmem:[%s612_s11] sm:$0xff] %v611_v38  ;;  %s1085_s11 = smov [#allocation23] }
 0x215   : >>> { %1857 = vst [vmem:[%s627_s14 + $0x8] sm:$0xff] %v626_v39  ;;  %s663_s14 = smov [#allocation24] }
 0x217   : >>> { %v642_v40 = vpop.xlane.xlu0 %641 }
 0x218   : >>> { %v657_v41 = vpop.xlane.xlu1 %656  ;;  %644 = vst [vmem:[%s643_s20] sm:$0xff] %v642_v40  ;;  %s1087_s20 = smov [#allocation24] }
 0x219   : >>> { %1858 = vst [vmem:[%s658_s29 + $0x8] sm:$0xff] %v657_v41  ;;  %s1113_s29 = smov [#allocation23] }
 0x21c   : >>> { %v662_v48 = vld [vmem:[%s661_s17] sm:$0xff]  ;;  %s689_s17 = smov [#allocation23]  ;;  %v1917_v17 = vld [vmem:[%s1113_s29 + $0x8] sm:$0xff]  ;;  %s2340_s29 = smov [#allocation12] }
 0x21d   : >>> { %v1086_v51 = vld [vmem:[%s1085_s11] sm:$0xff]  ;;  %v673_v52 = vmul.f32 %v669_v42, %v662_v48  ;;  %v676_v53 = vmul.f32 %v670_v43, %v662_v48  ;;  %v680_v54 = vmul.f32 %v671_v44, %v662_v48  ;;  %v683_v55 = vmul.f32 %v672_v45, %v662_v48  ;;  %s692_s11 = smov [#allocation24]  ;;  %v1859_v16 = vld [vmem:[%s689_s17 + $0x8] sm:$0xff]  ;;  %s725_s17 = smov [#allocation22] }
 0x21e   : >>> { %v1097_v56 = vmul.f32 %v1093_v46, %v1086_v51  ;;  %v1100_v57 = vmul.f32 %v1094_v47, %v1086_v51  ;;  %v1104_v58 = vmul.f32 %v1095_v49, %v1086_v51  ;;  %v1107_v59 = vmul.f32 %v1096_v50, %v1086_v51 }
 0x220   : >>> { %v664_v60 = vld [vmem:[%s663_s14] sm:$0xff]  ;;  %s2298_s14 = smov [#allocation12]  ;;  %v1860_v18 = vld [vmem:[%s692_s11 + $0x8] sm:$0xff]  ;;  %s2346_s11 = smov [#allocation13] }
 0x221   : >>> { %v1088_v61 = vld [vmem:[%s1087_s20] sm:$0xff]  ;;  %v674_v62 = vmul.f32 %v671_v44, %v664_v60  ;;  %v677_v63 = vmul.f32 %v672_v45, %v664_v60  ;;  %v679_v0 = vmul.f32 %v669_v42, %v664_v60  ;;  %v682_v1 = vmul.f32 %v670_v43, %v664_v60  ;;  %s2300_s20 = smov [#allocation14] }
 0x222   : >>> { %v1098_v2 = vmul.f32 %v1095_v49, %v1088_v61  ;;  %v1101_v3 = vmul.f32 %v1096_v50, %v1088_v61  ;;  %v1103_v4 = vmul.f32 %v1093_v46, %v1088_v61  ;;  %v1106_v5 = vmul.f32 %v1094_v47, %v1088_v61 }
 0x223   : >>> { %v675_v6 = vsub.f32 %v673_v52, %v674_v62  ;;  %v678_v7 = vsub.f32 %v676_v53, %v677_v63  ;;  %v681_v8 = vadd.f32 %v680_v54, %v679_v0  ;;  %v684_v10 = vadd.f32 %v683_v55, %v682_v1 }
 0x224   : >>> { %v1099_v11 = vsub.f32 %v1097_v56, %v1098_v2  ;;  %v1102_v13 = vsub.f32 %v1100_v57, %v1101_v3  ;;  %v1105_v14 = vadd.f32 %v1104_v58, %v1103_v4  ;;  %v1108_v15 = vadd.f32 %v1107_v59, %v1106_v5  ;;  %v2358_v56 = vld [vmem:[%s725_s17] ss:$0 sm:$0xff]  ;;  %s780_s17 = smov [#allocation19] }
 0x225   : >>> { %685 = vst [vmem:[%s2262_s21] sm:$0xff] %v675_v6  ;;  %687 = vst [vmem:[%s2266_s28] sm:$0xff] %v681_v8  ;;  %s1116_s21 = smov [#allocation24]  ;;  %s2302_s28 = smov [#allocation15] }
 0x226   : >>> { %688 = vst [vmem:[%s2268_s27] sm:$0xff] %v684_v10  ;;  %686 = vst [vmem:[%s2264_s30] sm:$0xff] %v678_v7  ;;  %v1918_v19 = vld [vmem:[%s1116_s21 + $0x8] sm:$0xff]  ;;  %s2316_s27 = smov [#allocation13]  ;;  %s723_s30 = smov [#allocation21] }
 0x227   : >>> { %1109 = vst [vmem:[%s2271_s15] sm:$0xff] %v1099_v11  ;;  %1110 = vst [vmem:[%s2274_s16] sm:$0xff] %v1102_v13  ;;  %s2305_s15 = smov %s2187_s15  ;;  %s2308_s16 = smov %s2192_s16  ;;  %v2356_v55 = vld [vmem:[%s723_s30] ss:$0 sm:$0xff] }
 0x228   : >>> { %1111 = vst [vmem:[%s2278_s23] sm:$0xff] %v1105_v14  ;;  %1112 = vst [vmem:[%s2281_s24] sm:$0xff] %v1108_v15  ;;  %s2311_s23 = smov %s2197_s23  ;;  %s2314_s24 = smov %s2202_s24 }
 0x229   : >>> { %s751_s21 = smov [#allocation12]  ;;  %s757_s30 = smov [#allocation15] }
 0x22c   : >>> { %v1861_v20 = vld [vmem:[%s2298_s14 + $0x8] sm:$0xff] }
 0x22d   : >>> { %v1863_v21 = vld [vmem:[%s2300_s20 + $0x8] sm:$0xff]  ;;  %v707_v23 = vmul.f32 %v1861_v20, %v1859_v16  ;;  %v713_v26 = vmul.f32 %v1861_v20, %v1860_v18 }
 0x22e   : >>> { %v1864_v22 = vld [vmem:[%s2302_s28 + $0x8] sm:$0xff]  ;;  %v708_v24 = vmul.f32 %v1863_v21, %v1860_v18  ;;  %v714_v30 = vmul.f32 %v1863_v21, %v1859_v16 }
 0x22f   : >>> { %v711_v25 = vmul.f32 %v1864_v22, %v1860_v18  ;;  %v1919_v27 = vld [vmem:[%s2305_s15 + $0x8] sm:$0xff]  ;;  %v717_v31 = vmul.f32 %v1864_v22, %v1859_v16 }
 0x230   : >>> { %v1920_v28 = vld [vmem:[%s2308_s16 + $0x8] sm:$0xff]  ;;  %v1131_v33 = vmul.f32 %v1919_v27, %v1917_v17  ;;  %v709_v36 = vsub.f32 %v707_v23, %v708_v24  ;;  %v1137_v39 = vmul.f32 %v1919_v27, %v1918_v19  ;;  %v715_v40 = vadd.f32 %v714_v30, %v713_v26 }
 0x231   : >>> { %v1921_v29 = vld [vmem:[%s2311_s23 + $0x8] sm:$0xff]  ;;  %v1134_v37 = vmul.f32 %v1920_v28, %v1917_v17  ;;  %v1140_v43 = vmul.f32 %v1920_v28, %v1918_v19 }
 0x232   : >>> { %v1922_v32 = vld [vmem:[%s2314_s24 + $0x8] sm:$0xff]  ;;  %v1132_v34 = vmul.f32 %v1921_v29, %v1918_v19  ;;  %v1138_v42 = vmul.f32 %v1921_v29, %v1917_v17  ;;  %1865 = vst [vmem:[%s2298_s14 + $0x8] sm:$0xff] %v709_v36  ;;  %1867 = vst [vmem:[%s2300_s20 + $0x8] sm:$0xff] %v715_v40  ;;  %s2349_s14 = smov [#allocation14]  ;;  %s2351_s20 = smov [#allocation15] }
 0x233   : >>> { %v1862_v35 = vld [vmem:[%s2316_s27 + $0x8] sm:$0xff]  ;;  %v1135_v38 = vmul.f32 %v1922_v32, %v1918_v19  ;;  %v1141_v45 = vmul.f32 %v1922_v32, %v1917_v17 }
 0x234   : >>> { %v1133_v41 = vsub.f32 %v1131_v33, %v1132_v34  ;;  %v710_v46 = vmul.f32 %v1862_v35, %v1859_v16  ;;  %v716_v47 = vmul.f32 %v1862_v35, %v1860_v18  ;;  %v1139_v48 = vadd.f32 %v1138_v42, %v1137_v39 }
 0x235   : >>> { %v1136_v44 = vsub.f32 %v1134_v37, %v1135_v38  ;;  %v1142_v49 = vadd.f32 %v1141_v45, %v1140_v43 }
 0x236   : >>> { %1923 = vst [vmem:[%s2305_s15 + $0x8] sm:$0xff] %v1133_v41  ;;  %v712_v50 = vsub.f32 %v710_v46, %v711_v25  ;;  %v718_v51 = vadd.f32 %v717_v31, %v716_v47  ;;  %s2331_s15 = smov %s2187_s15  ;;  %1925 = vst [vmem:[%s2311_s23 + $0x8] sm:$0xff] %v1139_v48  ;;  %s2335_s23 = smov %s2197_s23 }
 0x237   : >>> { %1924 = vst [vmem:[%s2308_s16 + $0x8] sm:$0xff] %v1136_v44  ;;  %1926 = vst [vmem:[%s2314_s24 + $0x8] sm:$0xff] %v1142_v49  ;;  %s2344_s16 = smov %s2192_s16  ;;  %s2362_s24 = smov %s2202_s24 }
 0x238   : >>> { %1866 = vst [vmem:[%s2316_s27 + $0x8] sm:$0xff] %v712_v50  ;;  %1868 = vst [vmem:[%s2302_s28 + $0x8] sm:$0xff] %v718_v51  ;;  %s753_s28 = smov [#allocation13]  ;;  %s755_s27 = smov [#allocation14]  ;;  %v818_v50 = vadd.s32 8, %v808_v9  ;;  %v798_v51 = vadd.s32 8, %v786_v9 }
 0x239   : >>> { %v731_v57 = vld [vmem:[%s2340_s29] sm:$0xff] }
 0x23a   : >>> { %v735_v17 = vmul.f32 %v731_v57, %v2356_v55  ;;  %v738_v18 = vmul.f32 %v731_v57, %v2358_v56  ;;  %v733_v22 = vld [vmem:[%s2349_s14] sm:$0xff]  ;;  %vm819_vm11 = vcmp.eq.s32.totalorder %v818_v50, %v805_v12  ;;  %vm799_vm13 = vcmp.eq.s32.totalorder %v798_v51, %v783_v12 }
 0x23b   : >>> { %v741_v26 = vmul.f32 %v733_v22, %v2356_v55  ;;  %v744_v28 = vmul.f32 %v733_v22, %v2358_v56 }
 0x23d   : >>> { %v1149_v52 = vld [vmem:[%s2331_s15] ss:$0 sm:$0xff]  ;;  %v1928_v54 = vld [vmem:[%s2331_s15 + $0x7] ss:$0 sm:$0xff]  ;;  %v1929_v59 = vld [vmem:[%s2331_s15 + $0x7] sm:$0xfe] }
 0x23e   : >>> { %v1927_v53 = vld [vmem:[%s2331_s15 - $0x1] sm:$0xfe]  ;;  %v1930_v60 = vld [vmem:[%s2331_s15 + $0xf] ss:$0 sm:$0xff]  ;;  %v1167_v62 = vsel %vm1005_vm8, %v1928_v54, %v1929_v59  ;;  %v1934_v1 = vld [vmem:[%s2335_s23 + $0x8] ss:$0 sm:$0xff] }
 0x23f   : >>> { %v1156_v58 = vsel %vm1005_vm8, %v1149_v52, %v1927_v53  ;;  %v1193_v61 = vld [vmem:[%s2344_s16] ss:$0 sm:$0xff]  ;;  %v1933_v0 = vld [vmem:[%s2335_s23 + $0x9] sm:$0x7f]  ;;  %1931 = vst [vmem:[%s2331_s15 + $0x8] sm:$0xff] %v1167_v62  ;;  %v838_v52 = vadd.s32 8, %v828_v9 }
 0x240   : >>> { %1159 = vst [vmem:[%s2331_s15] sm:$0xff] %v1156_v58  ;;  %v1171_v63 = vld [vmem:[%s2335_s23] ss:$0 sm:$0xff]  ;;  %v1180_v2 = vsel %vm1029_vm9, %v1930_v60, %v1933_v0  ;;  %v1936_v3 = vld [vmem:[%s2335_s23 + $0x1] sm:$0x7f]  ;;  %v1939_v8 = vld [vmem:[%s2344_s16 + $0x7] sm:$0xfe] }
 0x241   : >>> { %1932 = vst [vmem:[%s2331_s15 + $0x1] sm:$0x1] %v1171_v63  ;;  %v1937_v4 = vld [vmem:[%s2344_s16 - $0x1] sm:$0xfe]  ;;  %v1938_v5 = vld [vmem:[%s2344_s16 + $0x7] ss:$0 sm:$0xff]  ;;  %v1188_v6 = vsel %vm1029_vm9, %v1934_v1, %v1936_v3  ;;  %vm839_vm15 = vcmp.eq.s32.totalorder %v838_v52, %v825_v12 }
 0x242   : >>> { %1935 = vst [vmem:[%s2335_s23 + $0x8] sm:$0xff] %v1180_v2  ;;  %v1200_v7 = vsel %vm1005_vm8, %v1193_v61, %v1937_v4  ;;  %v1940_v10 = vld [vmem:[%s2344_s16 + $0xf] ss:$0 sm:$0xff]  ;;  %v1215_v11 = vld [vmem:[%s2362_s24] ss:$0 sm:$0xff]  ;;  %1190 = vst [vmem:[%s2335_s23] sm:$0xff] %v1188_v6  ;;  %v1211_v13 = vsel %vm1005_vm8, %v1938_v5, %v1939_v8  ;;  %v861_v53 = vadd.s32 8, %v849_v9  ;;  %v343_v9 = vmov (%p468_p9), %v2176_v9 }
 0x243   : >>> { %1203 = vst [vmem:[%s2344_s16] sm:$0xff] %v1200_v7  ;;  %v1943_v14 = vld [vmem:[%s2362_s24 + $0x9] sm:$0x7f]  ;;  %v1944_v15 = vld [vmem:[%s2362_s24 + $0x8] ss:$0 sm:$0xff]  ;;  %v1946_v16 = vld [vmem:[%s2362_s24 + $0x1] sm:$0x7f] }
 0x244   : >>> { %1941 = vst [vmem:[%s2344_s16 + $0x8] sm:$0xff] %v1211_v13  ;;  %1942 = vst [vmem:[%s2344_s16 + $0x1] sm:$0x1] %v1215_v11  ;;  %v1224_v19 = vsel %vm1029_vm9, %v1940_v10, %v1943_v14  ;;  %v1232_v20 = vsel %vm1029_vm9, %v1944_v15, %v1946_v16  ;;  %v732_v21 = vld [vmem:[%s2346_s11] sm:$0xff]  ;;  %vm862_vm1 = vcmp.eq.s32.totalorder %v861_v53, %v846_v12  ;;  %v340_v12 = vmov (%p468_p9), %v2179_v12 }
 0x245   : >>> { %v734_v23 = vld [vmem:[%s2351_s20] sm:$0xff]  ;;  %1945 = vst [vmem:[%s2362_s24 + $0x8] sm:$0xff] %v1224_v19  ;;  %1234 = vst [vmem:[%s2362_s24] sm:$0xff] %v1232_v20  ;;  %v736_v24 = vmul.f32 %v732_v21, %v2358_v56  ;;  %v739_v25 = vmul.f32 %v732_v21, %v2356_v55  ;;  %vm355_vm6 = vcmp.eq.s32.totalorder (%p468_p9), %v343_v9, %v340_v12  ;;  %v369_v12 = vmov (%p468_p9), %v2179_v12 }
 0x246   : >>> { %v742_v27 = vmul.f32 %v734_v23, %v2358_v56  ;;  %v745_v29 = vmul.f32 %v734_v23, %v2356_v55  ;;  %v787_v54 = vld [vmem:[%s780_s17] ss:$0 sm:$0xff]  ;;  %s2453_s17 = smov [#allocation12] }
 0x247   : >>> { %v737_v30 = vsub.f32 %v735_v17, %v736_v24  ;;  %v740_v31 = vadd.f32 %v739_v25, %v738_v18 }
 0x248   : >>> { %v743_v32 = vsub.f32 %v741_v26, %v742_v27  ;;  %v746_v33 = vadd.f32 %v745_v29, %v744_v28 }
 0x249   : >>> { %747 = vst [vmem:[%s2340_s29] sm:$0xff] %v737_v30  ;;  %748 = vst [vmem:[%s2346_s11] sm:$0xff] %v740_v31  ;;  %s843_s29 = smov [#allocation20]  ;;  %s802_s11 = smov [#allocation13] }
 0x24a   : >>> { %749 = vst [vmem:[%s2349_s14] sm:$0xff] %v743_v32  ;;  %750 = vst [vmem:[%s2351_s20] sm:$0xff] %v746_v33  ;;  %s2435_s14 = smov [#allocation12]  ;;  %s822_s20 = smov [#allocation14] }
 0x250   : >>> { %v1869_v34 = vld [vmem:[%s751_s21 + $0x8] sm:$0xff] }
 0x251   : >>> { %v1870_v35 = vld [vmem:[%s753_s28 + $0x8] sm:$0xff]  ;;  %v766_v38 = vmul.f32 %v1869_v34, %v2358_v56  ;;  %v763_v40 = vmul.f32 %v1869_v34, %v2356_v55 }
 0x252   : >>> { %v1871_v36 = vld [vmem:[%s755_s27 + $0x8] sm:$0xff]  ;;  %v764_v37 = vmul.f32 %v1870_v35, %v2358_v56  ;;  %v767_v39 = vmul.f32 %v1870_v35, %v2356_v55 }
 0x253   : >>> { %v1872_v41 = vld [vmem:[%s757_s30 + $0x8] sm:$0xff]  ;;  %v769_v42 = vmul.f32 %v1871_v36, %v2356_v55  ;;  %v772_v44 = vmul.f32 %v1871_v36, %v2358_v56 }
 0x254   : >>> { %v770_v43 = vmul.f32 %v1872_v41, %v2358_v56  ;;  %v773_v45 = vmul.f32 %v1872_v41, %v2356_v55  ;;  %v768_v46 = vadd.f32 %v767_v39, %v766_v38  ;;  %v765_v47 = vsub.f32 %v763_v40, %v764_v37  ;;  %v850_v55 = vld [vmem:[%s843_s29] ss:$0 sm:$0xff]  ;;  %s2456_s29 = smov [#allocation14] }
 0x256   : >>> { %v771_v48 = vsub.f32 %v769_v42, %v770_v43  ;;  %v774_v49 = vadd.f32 %v773_v45, %v772_v44  ;;  %1874 = vst [vmem:[%s753_s28 + $0x8] sm:$0xff] %v768_v46  ;;  %1873 = vst [vmem:[%s751_s21 + $0x8] sm:$0xff] %v765_v47  ;;  %s842_s21 = smov [#allocation15]  ;;  %s2447_s28 = smov [#allocation13] }
 0x258   : >>> { %1875 = vst [vmem:[%s755_s27 + $0x8] sm:$0xff] %v771_v48  ;;  %1876 = vst [vmem:[%s757_s30 + $0x8] sm:$0xff] %v774_v49  ;;  %s2449_s27 = smov [#allocation12]  ;;  %s2067_s30 = smov 1  }
 0x25d   : >>> { %v809_v56 = vld [vmem:[%s802_s11] sm:$0xff]  ;;  %v1879_v57 = vld [vmem:[%s802_s11 + $0x8] sm:$0xff] }
 0x25e   : >>> { %v788_v58 = vld [vmem:[%s2435_s14] sm:$0xff]  ;;  %v813_v59 = vsel %vm812_vm10, 0.0, %v809_v56  ;;  %v820_v60 = vsel %vm819_vm11, 0.0, %v1879_v57  ;;  %v1877_v62 = vld [vmem:[%s2435_s14 + $0x8] sm:$0xff] }
 0x25f   : >>> { %v792_v61 = vsel %vm791_vm12, %v787_v54, %v788_v58  ;;  %v829_v63 = vld [vmem:[%s822_s20] sm:$0xff]  ;;  %v1881_v0 = vld [vmem:[%s822_s20 + $0x8] sm:$0xff]  ;;  %814 = vst [vmem:[%s802_s11] sm:$0xff] %v813_v59  ;;  %1880 = vst [vmem:[%s802_s11 + $0x8] sm:$0xff] %v820_v60  ;;  %v800_v1 = vsel %vm799_vm13, %v787_v54, %v1877_v62  ;;  %s2068_s11 = smov 127  }
 0x260   : >>> { %793 = vst [vmem:[%s2435_s14] sm:$0xff] %v792_v61  ;;  %v833_v2 = vsel %vm832_vm14, 0.0, %v829_v63  ;;  %v840_v3 = vsel %vm839_vm15, 0.0, %v1881_v0  ;;  %v851_v4 = vld [vmem:[%s842_s21] sm:$0xff]  ;;  %v1883_v5 = vld [vmem:[%s842_s21 + $0x8] sm:$0xff]  ;;  %1878 = vst [vmem:[%s2435_s14 + $0x8] sm:$0xff] %v800_v1  ;;  %s2458_s14 = smov [#allocation15] }
 0x261   : >>> { %834 = vst [vmem:[%s822_s20] sm:$0xff] %v833_v2  ;;  %1882 = vst [vmem:[%s822_s20 + $0x8] sm:$0xff] %v840_v3  ;;  %v855_v6 = vsel %vm854_vm0, %v850_v55, %v851_v4  ;;  %v863_v7 = vsel %vm862_vm1, %v850_v55, %v1883_v5  ;;  %s2462_s20 = smov [#allocation13] }
 0x262   : >>> { %856 = vst [vmem:[%s842_s21] sm:$0xff] %v855_v6  ;;  %1884 = vst [vmem:[%s842_s21 + $0x8] sm:$0xff] %v863_v7  ;;  %s2465_s21 = smov [#allocation14] }
 0x266   : >>> { %v867_v8 = vld [vmem:[%s2447_s28] sm:$0xff]  ;;  %v1885_v15 = vld [vmem:[%s2462_s20 + $0x8] sm:$0xff] }
 0x267   : >>> { %868 = vrot.lane.b32.xlu1 %v867_v8, %s2067_s30  ;;  %v871_v10 = vld [vmem:[%s2449_s27] sm:$0xff]  ;;  %v1887_v11 = vld [vmem:[%s2453_s17 + $0x8] sm:$0xff] }
 0x268   : >>> { %872 = vrot.lane.b32.xlu0 %v871_v10, %s2067_s30  ;;  %v937_v13 = vld [vmem:[%s2456_s29] sm:$0xff]  ;;  %v1893_v16 = vld [vmem:[%s2465_s21 + $0x8] sm:$0xff] }
 0x269   : >>> { %v933_v14 = vld [vmem:[%s2458_s14] sm:$0xff]  ;;  %v1891_v17 = vld [vmem:[%s2467_s0 + $0x8] sm:$0xff] }
 0x26b   : >>> { %904 = vrot.lane.b32.xlu1 %v1887_v11, %s2067_s30 }
 0x26c   : >>> { %889 = vrot.lane.b32.xlu0 %v867_v8, %s2068_s11 }
 0x26f   : >>> { %938 = vrot.lane.b32.xlu1 %v937_v13, %s2067_s30 }
 0x270   : >>> { %934 = vrot.lane.b32.xlu0 %v933_v14, %s2067_s30 }
 0x273   : >>> { %900 = vrot.lane.b32.xlu1 %v1885_v15, %s2067_s30 }
 0x274   : >>> { %921 = vrot.lane.b32.xlu0 %v1885_v15, %s2068_s11 }
 0x277   : >>> { %970 = vrot.lane.b32.xlu1 %v1893_v16, %s2067_s30 }
 0x278   : >>> { %966 = vrot.lane.b32.xlu0 %v1891_v17, %s2067_s30  ;;  %s2514_s30 = smov [#allocation14] }
 0x27b   : >>> { %955 = vrot.lane.b32.xlu1 %v933_v14, %s2068_s11 }
 0x27f   : >>> { %987 = vrot.lane.b32.xlu1 %v1891_v17, %s2068_s11  ;;  %s373_s11 = smov (%p468_p9), [#allocation13] }
 0x2d9   : >>> { %v869_v18 = vpop.permute.xlu1 %868 }
 0x2da   : >>> { %v873_v19 = vpop.permute.xlu0 %872 }
 0x2db   : >>> { %v877_v20 = vsel %vm876_vm2, %v871_v10, %v873_v19 }
 0x2dc   : >>> { %v881_v21 = vsel %vm880_vm3, %v869_v18, %v877_v20 }
 0x2dd   : >>> { %v887_v22 = vsel %vm1673_vm4, %v881_v21, 0.0  ;;  %v905_v23 = vpop.permute.xlu1 %904 }
 0x2de   : >>> { %v890_v24 = vpop.permute.xlu0 %889  ;;  %927 = vst [vmem:[%s2449_s27] sm:$0xff] %v887_v22  ;;  %v909_v31 = vsel %vm876_vm2, %v1887_v11, %v905_v23  ;;  %s2509_s27 = smov [#allocation13] }
 0x2df   : >>> { %v894_v25 = vsel %vm893_vm5, %v871_v10, %v890_v24 }
 0x2e0   : >>> { %928 = vst [vmem:[%s2447_s28] sm:$0xff] %v894_v25  ;;  %s2505_s28 = smov [#allocation12] }
 0x2e1   : >>> { %v939_v26 = vpop.permute.xlu1 %938 }
 0x2e2   : >>> { %v943_v27 = vsel %vm876_vm2, %v937_v13, %v939_v26  ;;  %v935_v28 = vpop.permute.xlu0 %934 }
 0x2e3   : >>> { %v947_v29 = vsel %vm880_vm3, %v935_v28, %v943_v27 }
 0x2e4   : >>> { %v953_v30 = vsel %vm1673_vm4, %v947_v29, 0.0 }
 0x2e5   : >>> { %v901_v32 = vpop.permute.xlu1 %900  ;;  %993 = vst [vmem:[%s2456_s29] sm:$0xff] %v953_v30  ;;  %s344_s29 = smov (%p468_p9), [#allocation12] }
 0x2e6   : >>> { %v913_v33 = vsel %vm880_vm3, %v901_v32, %v909_v31  ;;  %v922_v34 = vpop.permute.xlu0 %921 }
 0x2e7   : >>> { %v919_v35 = vsel %vm1673_vm4, %v913_v33, 0.0  ;;  %v926_v36 = vsel %vm893_vm5, %v1887_v11, %v922_v34 }
 0x2e8   : >>> { %1889 = vst [vmem:[%s2453_s17 + $0x8] sm:$0xff] %v919_v35  ;;  %1890 = vst [vmem:[%s2462_s20 + $0x8] sm:$0xff] %v926_v36  ;;  %s1042_s17 = smov [#allocation15] }
 0x2e9   : >>> { %v971_v37 = vpop.permute.xlu1 %970 }
 0x2ea   : >>> { %v975_v38 = vsel %vm876_vm2, %v1893_v16, %v971_v37  ;;  %v967_v39 = vpop.permute.xlu0 %966 }
 0x2eb   : >>> { %v979_v40 = vsel %vm880_vm3, %v967_v39, %v975_v38 }
 0x2ec   : >>> { %v985_v41 = vsel %vm1673_vm4, %v979_v40, 0.0 }
 0x2ed   : >>> { %v956_v42 = vpop.permute.xlu1 %955  ;;  %1895 = vst [vmem:[%s2465_s21 + $0x8] sm:$0xff] %v985_v41 }
 0x2ee   : >>> { %v960_v43 = vsel %vm893_vm5, %v937_v13, %v956_v42  ;;  %v362_v13 = vadd.s32 (%p468_p9), 8, %v343_v9  ;;  %v372_v9 = vmov (%p468_p9), %v2176_v9 }
 0x2ef   : >>> { %v999_v44 = vld [vmem:[%s2505_s28] ss:$0 sm:$0xff]  ;;  %v1898_v46 = vld [vmem:[%s2505_s28 + $0x7] ss:$0 sm:$0xff]  ;;  %994 = vst [vmem:[%s2458_s14] sm:$0xff] %v960_v43  ;;  %v1899_v48 = vld [vmem:[%s2505_s28 + $0x7] sm:$0xfe]  ;;  %v418_v9 = vmov (%p468_p9), %v2176_v9 }
 0x2f0   : >>> { %v1897_v45 = vld [vmem:[%s2505_s28 - $0x1] sm:$0xfe]  ;;  %v1017_v51 = vsel %vm1005_vm8, %v1898_v46, %v1899_v48  ;;  %v1908_v53 = vld [vmem:[%s2509_s27 + $0x7] ss:$0 sm:$0xff]  ;;  %v1909_v54 = vld [vmem:[%s2509_s27 + $0x7] sm:$0xfe]  ;;  %vm363_vm7 = vcmp.eq.s32.totalorder (%p468_p9), %v362_v13, %v340_v12  ;;  %v392_v12 = vmov (%p468_p9), %v2179_v12  ;;  %v395_v9 = vmov (%p468_p9), %v2176_v9 }
 0x2f1   : >>> { %v1006_v47 = vsel %vm1005_vm8, %v999_v44, %v1897_v45  ;;  %v1043_v49 = vld [vmem:[%s2509_s27] ss:$0 sm:$0xff]  ;;  %v1910_v55 = vld [vmem:[%s2509_s27 + $0xf] ss:$0 sm:$0xff]  ;;  %v988_v56 = vpop.permute.xlu1 %987  ;;  %v1061_v57 = vsel %vm1005_vm8, %v1908_v53, %v1909_v54  ;;  %s396_s14 = smov (%p468_p9), [#allocation14]  ;;  %v415_v12 = vmov (%p468_p9), %v2179_v12  ;;  %v439_v40 = vadd.s32 (%p468_p9), 8, %v418_v9 }
 0x2f2   : >>> { %v1907_v50 = vld [vmem:[%s2509_s27 - $0x1] sm:$0xfe]  ;;  %1009 = vst [vmem:[%s2505_s28] sm:$0xff] %v1006_v47  ;;  %v992_v58 = vsel %vm893_vm5, %v1893_v16, %v988_v56  ;;  %v1900_v59 = vld [vmem:[%s2505_s28 + $0xf] ss:$0 sm:$0xff]  ;;  %1911 = vst [vmem:[%s2509_s27 + $0x8] sm:$0xff] %v1061_v57 }
 0x2f3   : >>> { %v1050_v52 = vsel %vm1005_vm8, %v1043_v49, %v1907_v50  ;;  %1896 = vst [vmem:[%s2467_s0 + $0x8] sm:$0xff] %v992_v58  ;;  %1901 = vst [vmem:[%s2505_s28 + $0x8] sm:$0xff] %v1017_v51  ;;  %s1235_s0 = sadd.s32 (%p468_p9), 1, %s2060_s25   ;;  %vm430_vm8 = vcmp.eq.s32.totalorder (%p468_p9), %v418_v9, %v415_v12 }
 0x2f4   : >>> { %1053 = vst [vmem:[%s2509_s27] sm:$0xff] %v1050_v52  ;;  %v1021_v60 = vld [vmem:[%s2514_s30] ss:$0 sm:$0xff]  ;;  %v1903_v61 = vld [vmem:[%s2514_s30 + $0x9] sm:$0x7f]  ;;  %v1904_v62 = vld [vmem:[%s2514_s30 + $0x8] ss:$0 sm:$0xff]  ;;  %s2662_s25 = smov (%p468_p9), %s1235_s0 }
 0x2f5   : >>> { %1902 = vst [vmem:[%s2505_s28 + $0x1] sm:$0x1] %v1021_v60  ;;  %v1030_v63 = vsel %vm1029_vm9, %v1900_v59, %v1903_v61  ;;  %v1906_v0 = vld [vmem:[%s2514_s30 + $0x1] sm:$0x7f]  ;;  %p464_p10 = scmp.ge.s32.totalorder (%p468_p9), %s1235_s0, 15 }
 0x2f6   : >>> { %1905 = vst [vmem:[%s2514_s30 + $0x8] sm:$0xff] %v1030_v63  ;;  %v1038_v1 = vsel %vm1029_vm9, %v1904_v62, %v1906_v0 }
 0x2f7   : >>> { %1040 = vst [vmem:[%s2514_s30] sm:$0xff] %v1038_v1 }
 0x2f9   : >> { %470 = sbr.rel (!%p468_p9) target bundleno = 289 (0x121), region = 443 }
 0x2fa   : >>> { %v1065_v2 = vld [vmem:[%s1042_s17] ss:$0 sm:$0xff]  ;;  %v1913_v3 = vld [vmem:[%s1042_s17 + $0x9] sm:$0x7f]  ;;  %v1914_v4 = vld [vmem:[%s1042_s17 + $0x8] ss:$0 sm:$0xff] }
 0x2fb   : >>> { %1912 = vst [vmem:[%s2509_s27 + $0x1] sm:$0x1] %v1065_v2  ;;  %v1074_v5 = vsel %vm1029_vm9, %v1910_v55, %v1913_v3  ;;  %v1916_v6 = vld [vmem:[%s1042_s17 + $0x1] sm:$0x7f] }
 0x2fc   : >>> { %1915 = vst [vmem:[%s1042_s17 + $0x8] sm:$0xff] %v1074_v5  ;;  %v1082_v7 = vsel %vm1029_vm9, %v1914_v4, %v1916_v6  ;;  %v350_v8 = vld [vmem:[%s344_s29] sm:$0xff] (%p468_p9)  ;;  %v1947_v10 = vld [vmem:[%s344_s29 + $0x8] sm:$0xff] (%p468_p9)  ;;  %vm440_vm9 = vcmp.eq.s32.totalorder (%p468_p9), %v439_v40, %v415_v12 }
 0x2fd   : >>> { %1084 = vst [vmem:[%s1042_s17] sm:$0xff] %v1082_v7  ;;  %v351_v14 = vsel (%p468_p9), %vm1673_vm4, %v350_v8, 0.0  ;;  %v359_v15 = vsel (%p468_p9), %vm1673_vm4, %v1947_v10, 0.0 }
 0x2fe   : >> { %v402_v18 = vld [vmem:[%s396_s14] sm:$0xff] (%p468_p9)  ;;  %v352_v19 = vmul.f32 (%p468_p9), %v351_v14, %v351_v14  ;;  %v360_v20 = vmul.f32 (%p468_p9), %v359_v15, %v359_v15  ;;  %v1949_v23 = vld [vmem:[%s396_s14 + $0x8] sm:$0xff] (%p468_p9) }
 0x2ff   : >> { %v403_v24 = vsel (%p468_p9), %vm1673_vm4, %v402_v18, 0.0  ;;  %v409_v28 = vsel (%p468_p9), %vm1673_vm4, %v1949_v23, 0.0 }
 0x300   : >> { %v366_v25 = vadd.f32 %v360_v20, %v352_v19  ;;  %v356_v29 = vsel %vm355_vm6, 0.0, %v352_v19  ;;  %v404_v31 = vmul.f32 %v403_v24, %v403_v24  ;;  %v364_v33 = vsel %vm363_vm7, 0.0, %v360_v20 }
 0x301   : >> { %v365_v35 = vadd.f32 %v364_v33, %v356_v29  ;;  %v410_v37 = vmul.f32 %v409_v28, %v409_v28 }
 0x302   : >> { %v379_v11 = vld [vmem:[%s373_s11] sm:$0xff]  ;;  %v1948_v17 = vld [vmem:[%s373_s11 + $0x8] sm:$0xff] }
 0x303   : >> { %v380_v16 = vsel %vm1673_vm4, %v379_v11, 0.0  ;;  %v386_v22 = vsel %vm1673_vm4, %v1948_v17, 0.0 }
 0x304   : >> { %v381_v21 = vmul.f32 %v380_v16, %v380_v16  ;;  %v387_v26 = vmul.f32 %v386_v22, %v386_v22  ;;  %v425_v27 = vld [vmem:[%s419_s26] sm:$0xff]  ;;  %v1950_v32 = vld [vmem:[%s419_s26 + $0x8] sm:$0xff] }
 0x305   : >> { %v426_v34 = vsel %vm1673_vm4, %v425_v27, 0.0  ;;  %v436_v38 = vsel %vm1673_vm4, %v1950_v32, 0.0 }
 0x306   : >> { %v383_v30 = vadd.f32 %v381_v21, %v366_v25  ;;  %v382_v39 = vadd.f32 %v381_v21, %v365_v35  ;;  %v427_v42 = vmul.f32 %v426_v34, %v426_v34  ;;  %v437_v45 = vmul.f32 %v436_v38, %v436_v38 }
 0x308   : >> { %v389_v36 = vadd.f32 %v387_v26, %v383_v30  ;;  %v388_v43 = vadd.f32 %v387_v26, %v382_v39  ;;  %v431_v48 = vsel %vm430_vm8, 0.0, %v427_v42  ;;  %v441_v51 = vsel %vm440_vm9, 0.0, %v437_v45 }
 0x30a   : >> { %v406_v41 = vadd.f32 %v404_v31, %v389_v36  ;;  %v405_v46 = vadd.f32 %v404_v31, %v388_v43 }
 0x30c   : >> { %v412_v44 = vadd.f32 %v410_v37, %v406_v41  ;;  %v411_v49 = vadd.f32 %v410_v37, %v405_v46 }
 0x30e   : >> { %v433_v47 = vadd.f32 %v427_v42, %v412_v44  ;;  %v432_v52 = vadd.f32 %v431_v48, %v411_v49 }
 0x310   : >> { %v443_v50 = vadd.f32 %v437_v45, %v433_v47  ;;  %v442_v53 = vadd.f32 %v441_v51, %v432_v52 }
 0x312   : >> { %444 = vadd.xlane.f32.xlu0 %v443_v50 }
 0x316   : >> { %452 = vadd.xlane.f32.xlu0 %v442_v53 }
 0x39f   : >> { %v445_v54 = vpop.xlane.xlu0 %444 }
 0x3a0   : >> { %v446_v55 = vrot.slane %v445_v54, 4 }
 0x3a2   : >> { %v447_v56 = vadd.f32 %v446_v55, %v445_v54 }
 0x3a3   : >> { %v453_v57 = vpop.xlane.xlu0 %452 }
 0x3a4   : >> { %v448_v58 = vrot.slane %v447_v56, 2  ;;  %v454_v59 = vrot.slane %v453_v57, 4 }
 0x3a6   : >> { %v455_v60 = vadd.f32 %v454_v59, %v453_v57  ;;  %v449_v61 = vadd.f32 %v448_v58, %v447_v56 }
 0x3a8   : >> { %v456_v62 = vrot.slane %v455_v60, 2  ;;  %v450_v0 = vrot.slane %v449_v61, 1 }
 0x3aa   : >> { %v457_v63 = vadd.f32 %v456_v62, %v455_v60  ;;  %v451_v3 = vadd.f32 %v450_v0, %v449_v61 }
 0x3ac   : >> { %v458_v1 = vrot.slane %v457_v63, 1 }
 0x3ae   : >> { %v459_v2 = vadd.f32 %v458_v1, %v457_v63 }
 0x3b0   : >> { %1971 = vpush %v459_v2 }
 0x3b1   : >> { %1973 = vpush %v451_v3 }
 0x3e1   : >> { %s1972_s20 = spop %1971 }
 0x3e2   : >> { %s1974_s21 = spop %1973 }
 0x3e3   : >> { %s462_s28 = smul.f32 1e-10, %s1974_s21 }
 0x3e5   : >> { %p463_p11 = scmp.le.f32.partialorder %s1972_s20, %s462_s28 }
 0x3e7   : >> { %p465_p12 = por %p464_p10, %p463_p11 }
 0x3e9   : > { %1237 = sbr.rel (!%p465_p12) target bundleno = 288 (0x120), region = 454 }
 0x3f0 PF: > { %s1242_s27 = smov [#allocation12]  ;;  %v1246_v12 = vmov %v2179_v12  ;;  %v1249_v9 = vmov %v2176_v9  ;;  %s1268_s25 = smov [#allocation15] }
 0x3f1   : > { %v1272_v12 = vmov %v2179_v12  ;;  %v1275_v9 = vmov %v2176_v9  ;;  %v1250_v4 = vld [vmem:[%s1242_s27] sm:$0xff]  ;;  %vm1253_vm10 = vcmp.eq.s32.totalorder %v1249_v9, %v1246_v12  ;;  %v1951_v5 = vld [vmem:[%s1242_s27 + $0x8] sm:$0xff]  ;;  %v1258_v6 = vadd.s32 8, %v1249_v9  ;;  %s1238_s30 = sand.u32 7, %s2135_s12   ;;  %s2663_s29 = scalar_lea.vmem [#allocation5], %s2174_s22 }
 0x3f2   : > { %vm1279_vm11 = vcmp.eq.s32.totalorder %v1275_v9, %v1272_v12  ;;  %v1284_v7 = vadd.s32 8, %v1275_v9  ;;  %v1254_v8 = vsel %vm1253_vm10, %v1250_v4, 0.0  ;;  %v1276_v10 = vld [vmem:[%s1268_s25] sm:$0xff]  ;;  %v1952_v11 = vld [vmem:[%s1268_s25 + $0x8] sm:$0xff]  ;;  %s1239_s17 = scalar_lea.vmem [#allocation4], %s1238_s30  ;;  %s1241_s0 = scalar_lea.vmem [#allocation6], %s1238_s30 }
 0x3f3   : > { %vm1259_vm12 = vcmp.eq.s32.totalorder %v1258_v6, %v1246_v12  ;;  %v1280_v14 = vsel %vm1279_vm11, %v1276_v10, 0.0  ;;  %s1243_s17 = smov %s1239_s17  ;;  %s1269_s0 = smov %s1241_s0 }
 0x3f4   : > { %vm1285_vm4 = vcmp.eq.s32.totalorder %v1284_v7, %v1272_v12  ;;  %v1260_v13 = vsel %vm1259_vm12, %v1951_v5, %v1254_v8  ;;  %s2664_s11 = scalar_lea.vmem [#allocation7], %s2174_s22  ;;  %s1333_s14 = sshrl.u32 (%p2149_p3), %s2135_s12, 3 }
 0x3f5   : > { %v1261_v15 = vrot.slane %v1260_v13, 4  ;;  %v1286_v16 = vsel %vm1285_vm4, %v1952_v11, %v1280_v14  ;;  %s2665_s26 = scalar_lea.vmem (%p2149_p3), [#allocation5], %s2174_s22  ;;  %s1959_s20 = sshll.u32 (%p2149_p3), %s1333_s14, 1 }
 0x3f6   : > { %v1287_v17 = vrot.slane %v1286_v16, 4  ;;  %s1335_s27 = scalar_lea.vmem (%p2149_p3), %s2653_s4, %s1959_s20 }
 0x3f7   : > { %v1262_v18 = vadd.f32 %v1261_v15, %v1260_v13 }
 0x3f8   : > { %v1288_v19 = vadd.f32 %v1287_v17, %v1286_v16 }
 0x3f9   : > { %v1263_v20 = vrot.slane %v1262_v18, 2 }
 0x3fa   : > { %v1289_v21 = vrot.slane %v1288_v19, 2 }
 0x3fb   : > { %v1264_v22 = vadd.f32 %v1263_v20, %v1262_v18 }
 0x3fc   : > { %v1290_v9 = vadd.f32 %v1289_v21, %v1288_v19 }
 0x3fd   : > { %v1265_v23 = vrot.slane %v1264_v22, 1 }
 0x3fe   : > { %v1291_v24 = vrot.slane %v1290_v9, 1 }
 0x3ff   : > { %v1266_v25 = vadd.f32 %v1265_v23, %v1264_v22 }
 0x400   : > { %v1292_v12 = vadd.f32 %v1291_v24, %v1290_v9 }
 0x401   : > { %1267 = vst [vmem:[%s1243_s17] sm:$0x1] %v1266_v25 }
 0x402   : > { %1293 = vst [vmem:[%s1269_s0] sm:$0x1] %v1292_v12 }
 0x404   : > { %1332 = sbr.rel (!%p2149_p3) target bundleno = 1042 (0x412), region = 114 }
 0x408   : > { %v1297_v26 = vld [vmem:[#allocation4] sm:$0x3] }
 0x409   : > { %1299 = vst [vmem:[%s2663_s29] sm:$0x3] %v1297_v26  ;;  %v1303_v27 = vld [vmem:[#allocation6] sm:$0x3] }
 0x40a   : > { %1305 = vst [vmem:[%s2664_s11] sm:$0x3] %v1303_v27 }
 0x410   : > { %v1351_v28 = vld [vmem:[%s2665_s26] sm:$0x3] }
 0x411   : > { %1352 = vst [vmem:[%s1335_s27] sm:$0x3] %v1351_v28 }
 0x412 PF: > { %1369 = sbr.rel (!%p2149_p3) target bundleno = 1050 (0x41a), region = 148  ;;  %s1370_s25 = sshrl.u32 (%p2149_p3), %s2135_s12, 3 }
 0x413   : > { %s2666_s30 = scalar_lea.vmem (%p2149_p3), [#allocation7], %s2174_s22  ;;  %s1960_s17 = sshll.u32 (%p2149_p3), %s1370_s25, 1 }
 0x414   : > { %s1372_s11 = scalar_lea.vmem (%p2149_p3), %s2654_s5, %s1960_s17 }
 0x418   : > { %v1388_v29 = vld [vmem:[%s2666_s30] sm:$0x3] (%p2149_p3) }
 0x419   : > { %1389 = vst [vmem:[%s1372_s11] sm:$0x3] %v1388_v29 }
 0x41a PF: > { %s1961_s19 = sshll.u32 %s2135_s12, 4  ;;  %v1418_v30 = vld [vmem:[%s2187_s15] sm:$0xff]  ;;  %v1420_v31 = vld [vmem:[%s2187_s15 + $0x8] sm:$0xff] }
 0x41b   : > { %v1439_v32 = vld [vmem:[%s2192_s16] sm:$0xff]  ;;  %s1405_s26 = scalar_lea.vmem %s2655_s6, %s1961_s19  ;;  %s1426_s28 = scalar_lea.vmem %s2656_s7, %s1961_s19  ;;  %v1441_v33 = vld [vmem:[%s2192_s16 + $0x8] sm:$0xff] }
 0x41c   : > { %v1460_v34 = vld [vmem:[%s2197_s23] sm:$0xff]  ;;  %v1462_v35 = vld [vmem:[%s2197_s23 + $0x8] sm:$0xff]  ;;  %1419 = vst [vmem:[%s1405_s26] sm:$0xff] %v1418_v30  ;;  %1421 = vst [vmem:[%s1405_s26 + $0x8] sm:$0xff] %v1420_v31  ;;  %s1447_s15 = scalar_lea.vmem %s2657_s8, %s1961_s19  ;;  %s1468_s17 = scalar_lea.vmem %s2658_s9, %s1961_s19 }
 0x41d   : > { %1440 = vst [vmem:[%s1426_s28] sm:$0xff] %v1439_v32  ;;  %1442 = vst [vmem:[%s1426_s28 + $0x8] sm:$0xff] %v1441_v33  ;;  %v1481_v36 = vld [vmem:[%s2202_s24] sm:$0xff]  ;;  %v1483_v37 = vld [vmem:[%s2202_s24 + $0x8] sm:$0xff] }
 0x41e   : > { %1461 = vst [vmem:[%s1447_s15] sm:$0xff] %v1460_v34  ;;  %1463 = vst [vmem:[%s1447_s15 + $0x8] sm:$0xff] %v1462_v35 }
 0x41f   : > { %1482 = vst [vmem:[%s1468_s17] sm:$0xff] %v1481_v36  ;;  %1484 = vst [vmem:[%s1468_s17 + $0x8] sm:$0xff] %v1483_v37 }
 0x420 PF: > { %p13_p13 = scmp.ge.s32.totalorder %s2138_s13, 4   ;;  %s2667_s30 = smov %s2052_s10 }
 0x421   : > { %s2668_s10 = smov %s2147_s18  ;;  %s2669_s11 = smov %s2138_s13 }
 0x422   :  { %15 = sbr.rel (!%p13_p13) target bundleno = 4 (0x4), region = 465 }

// kernel: wct_forward.10
= control target key start
LH: loop header
LB: loop body
LE: loop exit
PB: predicated region body
PF: predicated region fallthrough
CT: control target
= control target key end

     0   :  { %s673_s15 = smov 0   ;;  %s675_s16 = smov 0   ;;  %s759_s0 = inlined_call_operand.vmem [shape: bf16[32,32], index: 0, kind: input, shape index: {}]   ;;  %s760_s1 = inlined_call_operand.vmem [shape: f32[32,1], index: 1, kind: input, shape index: {}]   ;;  %s761_s2 = inlined_call_operand.vmem [shape: bf16[2,32,512], index: 2, kind: input, shape index: {}]   ;;  %s762_s3 = inlined_call_operand.vmem [shape: f32[1,512], index: 3, kind: input, shape index: {}]   ;;  %s763_s4 = inlined_call_operand.vmem [shape: bf16[32,512], index: 4, kind: output, shape index: {}]  }
   0x1   :  { %s677_s17 = smov 0  }
   0x2 LB: > { %s689_s18 = sadd.s32 4294967295, %s645_s17   ;;  %s692_s19 = sadd.s32 1, %s645_s17   ;;  %s645_s17 = sphi %s677_s17, %s767_s17   ;;  %s641_s16 = sphi %s675_s16, %s766_s16   ;;  %s637_s15 = sphi %s673_s15, %s765_s15  }
   0x3   : > { %s60_s20 = ssub.s32 %s645_s17, %s692_s19  ;;  %s63_s21 = sadd.s32 1, %s641_s16 }
   0x4   : > { %p61_p0 = scmp.eq.s32.totalorder %s60_s20, 0  ;;  %p70_p1 = scmp.ne.s32.totalorder %s641_s16, %s637_s15 }
   0x5   : > { %p71_p2 = scmp.eq.s32.totalorder %s645_s17, 0  ;;  %p126_p3 = scmp.eq.s32.totalorder %s689_s18, 1 }
   0x6   : > { %s702_s22 = scalar_select %p61_p0, %s641_s16, %s63_s21  }
   0x7   : > { %p72_p4 = por %p71_p2, %p70_p1  ;;  %p704_p5 = por %p126_p3, %p70_p1 }
   0x8   : > { %p553_p6 = scmp.ge.s32.totalorder %s645_s17, 2 }
   0xa   : > { %154 = sbr.rel (%p553_p6) target bundleno = 24 (0x18), region = 24 }
  0x11   : > { %157 = sbr.rel (!%p72_p4) target bundleno = 24 (0x18), region = 28  ;;  %s159_s24 = sand.u32 (%p72_p4), 1, %s641_s16  }
  0x12   : > { %s578_s25 = sshll.u32 (%p72_p4), %s645_s17, 3  ;;  %s554_s26 = sshll.u32 (%p72_p4), %s159_s24, 5 }
  0x13   : > { %s164_s29 = scalar_lea.vmem (%p72_p4), %s761_s2, %s578_s25  ;;  %s161_s30 = scalar_lea.vmem (%p72_p4), [#allocation2], %s554_s26 }
  0x14   : > { %v198_v0 = vld [vmem:[%s164_s29] sm:$0xff] (%p72_p4)  ;;  %v200_v1 = vld [vmem:[%s164_s29 + $0x10] sm:$0xff] (%p72_p4) }
  0x15   : > { %v202_v2 = vld [vmem:[%s164_s29 + $0x20] sm:$0xff] (%p72_p4)  ;;  %199 = vst [vmem:[%s161_s30] sm:$0xff] (%p72_p4), %v198_v0  ;;  %201 = vst [vmem:[%s161_s30 + $0x8] sm:$0xff] (%p72_p4), %v200_v1  ;;  %v204_v3 = vld [vmem:[%s164_s29 + $0x30] sm:$0xff] (%p72_p4) }
  0x16   : > { %203 = vst [vmem:[%s161_s30 + $0x10] sm:$0xff] (%p72_p4), %v202_v2  ;;  %205 = vst [vmem:[%s161_s30 + $0x18] sm:$0xff] (%p72_p4), %v204_v3 }
  0x18 PF: > { %p557_p7 = scmp.ge.s32.totalorder %s645_s17, 1  ;;  %p218_p8 = scmp.lt.s32.totalorder %s645_s17, 3 }
  0x1a   : > { %p219_p9 = pnand %p557_p7, %p218_p8 }
  0x1b   : > { %s225_s5 = sand.u32 (!%p219_p9), 1, %s637_s15   ;;  %v647_v4 = vmov (!%p219_p9), 0   ;;  %v271_v5 = vld [vmem:[%s760_s1 + $0x10] sm:$0xff] (!%p219_p9)  ;;  %v269_v6 = vld [vmem:[%s760_s1] sm:$0xff] (!%p219_p9)  ;;  %v272_v10 = vld [vmem:[%s760_s1 + $0x18] sm:$0xff] (!%p219_p9)  ;;  %vm323_vm0 = vcmask (!%p219_p9), 261120   ;;  %v385_v15 = vlaneseq (!%p219_p9) }
  0x1c   : > { %222 = sbr.rel (%p219_p9) target bundleno = 269 (0x10d), region = 70  ;;  %s717_s6 = sshll.u32 (!%p219_p9), %s225_s5, 5  ;;  %362 = vmatprep.mubr.bf16.mxu0 (!%p219_p9), %v647_v4  ;;  %372 = vmatprep.mubr.bf16.mxu1 (!%p219_p9), %v647_v4  ;;  %v270_v12 = vld [vmem:[%s760_s1 + $0x8] sm:$0xff] (!%p219_p9)  ;;  %v621_v13 = vld [vmem:[%s759_s0] sm:$0xff] (!%p219_p9)  }
  0x1d   : > { %614 = vset.pattern.permute.xlu1 (!%p219_p9), %v647_v4  ;;  %613 = vset.pattern.permute.xlu0 (!%p219_p9), %v647_v4  ;;  %s227_s11 = scalar_lea.vmem (!%p219_p9), [#allocation2], %s717_s6  ;;  %v622_v14 = vld [vmem:[%s759_s0 + $0x8] sm:$0xff] (!%p219_p9)   ;;  %s560_s25 = sshll.u32 (!%p219_p9), %s689_s18, 1  ;;  %v386_v16 = vshrl.u32 (!%p219_p9), %v385_v15, 7 }
  0x1e   : > { %v615_v7 = vld [vmem:[%s227_s11 + $0x4] ss:$8 sps:$4 sm:$0xff] (!%p219_p9)   ;;  %285 = vperm.xlu1 (!%p219_p9), %614, %v271_v5   ;;  %275 = vperm.xlu0 (!%p219_p9), %613, %v269_v6   ;;  %v617_v8 = vld [vmem:[%s227_s11] ss:$8 sps:$4 sm:$0xff] (!%p219_p9)   ;;  %v618_v9 = vld [vmem:[%s227_s11 + $0x14] ss:$8 sps:$4 sm:$0xff] (!%p219_p9)  }
  0x1f   : > { %330 = vmatprep.subr.bf16.mxu0 (!%p219_p9), %v615_v7  ;;  %584 = vmatprep.subr.bf16.mxu1 (!%p219_p9), %v615_v7  ;;  %v620_v11 = vld [vmem:[%s227_s11 + $0x10] ss:$8 sps:$4 sm:$0xff] (!%p219_p9)   ;;  %p255_p10 = scmp.lt.s32.totalorder (!%p219_p9), %s560_s25, 3  ;;  %v387_v19 = vsub.s32 (!%p219_p9), 0, %v386_v16  ;;  %v391_v21 = vsub.s32 (!%p219_p9), 1, %v386_v16  ;;  %s252_s29 = scalar_lea.vmem (!%p219_p9), [#allocation3], %s717_s6 }
  0x20   : > { %331 = vmatpush1.bf16.msra.mxu0 (!%p219_p9), %v617_v8  ;;  %586 = vmatpush1.bf16.msra.mxu1 (!%p219_p9), %v617_v8 }
  0x21   : > { %332 = vmatprep.subr.bf16.mxu0 (!%p219_p9), %v618_v9  ;;  %585 = vmatprep.subr.bf16.mxu1 (!%p219_p9), %v618_v9 }
  0x22   : > { %290 = vperm.xlu1 (!%p219_p9), %614, %v272_v10   ;;  %280 = vperm.xlu0 (!%p219_p9), %613, %v270_v12  }
  0x23   : > { %s769_s25 = smov (!%p255_p10, %s560_s25), 3  ;;  %s583_s30 = sshll.u32 (%p704_p5), %s689_s18, 3 }
  0x24   : > { %333 = vmatpush1.bf16.msra.mxu0 %v620_v11  ;;  %587 = vmatpush1.bf16.msra.mxu1 %v620_v11  ;;  %s257_s28 = scalar_lea.vmem %s762_s3, %s769_s25  ;;  %s440_s8 = scalar_lea.vmem (%p704_p5), %s763_s4, %s583_s30 }
  0x25   : > { %v383_v20 = vld [vmem:[%s257_s28] sm:$0x3] }
  0x26   : > { %v388_v24 = vrot.slane %v383_v20, %v387_v19  ;;  %v392_v27 = vrot.slane %v383_v20, %v391_v21 }
  0x27   : > { %567 = vmatmul.mubr.msk.bf16.vlgmr.msra.gmra.mrb[0].mxu0 %vm323_vm0, %v621_v13  ;;  %568 = vmatmul.mubr.msk.bf16.vlgmr.msra.gmra.mrb[0].mxu1 %vm323_vm0, %v622_v14 }
  0x9d   : > { %v286_v17 = vpop.permute.xlu1 %285  ;;  %v276_v18 = vpop.permute.xlu0 %275 }
  0xa1   : > { %v291_v22 = vpop.permute.xlu1 %290  ;;  %v281_v23 = vpop.permute.xlu0 %280 }
  0xfa   : > { %v364_v25 = vpop.f32.mrb[0].mxu0  ;;  %v374_v26 = vpop.f32.mrb[0].mxu1 }
  0xfb   : > { %v365_v28 = vadd.f32 %v364_v25, %v276_v18  ;;  %v375_v29 = vadd.f32 %v374_v26, %v286_v17  ;;  %v366_v30 = vpop.f32.mrb[1].mxu0  ;;  %v376_v31 = vpop.f32.mrb[1].mxu1 }
  0xfc   : > { %v367_v32 = vadd.f32 %v366_v30, %v276_v18  ;;  %v377_v33 = vadd.f32 %v376_v31, %v286_v17  ;;  %v368_v34 = vpop.f32.mrb[2].mxu0  ;;  %v378_v35 = vpop.f32.mrb[2].mxu1 }
  0xfd   : > { %v395_v36 = vmul.f32 %v388_v24, %v365_v28  ;;  %v399_v37 = vmul.f32 %v388_v24, %v375_v29  ;;  %v369_v38 = vadd.f32 %v368_v34, %v281_v23  ;;  %v379_v39 = vadd.f32 %v378_v35, %v291_v22  ;;  %v370_v40 = vpop.f32.mrb[3].mxu0  ;;  %v380_v41 = vpop.f32.mrb[3].mxu1 }
  0xfe   : > { %v396_v42 = vmul.f32 %v392_v27, %v367_v32  ;;  %v400_v43 = vmul.f32 %v392_v27, %v377_v33  ;;  %v371_v44 = vadd.f32 %v370_v40, %v281_v23  ;;  %v381_v45 = vadd.f32 %v380_v41, %v291_v22  ;;  %437 = sbr.rel (!%p704_p5) target bundleno = 269 (0x10d), region = 78 }
  0xff   : > { %v397_v46 = vmul.f32 %v388_v24, %v369_v38  ;;  %v401_v47 = vmul.f32 %v388_v24, %v379_v39 }
 0x100   : > { %v579_v48 = vpack.c.bf16 %v396_v42, %v395_v36  ;;  %v581_v49 = vpack.c.bf16 %v400_v43, %v399_v37  ;;  %v398_v50 = vmul.f32 %v392_v27, %v371_v44  ;;  %v402_v51 = vmul.f32 %v392_v27, %v381_v45 }
 0x102   : > { %427 = vst [vmem:[%s252_s29] sm:$0xff] %v579_v48  ;;  %429 = vst [vmem:[%s252_s29 + $0x10] sm:$0xff] %v581_v49  ;;  %v580_v52 = vpack.c.bf16 %v398_v50, %v397_v46  ;;  %v582_v53 = vpack.c.bf16 %v402_v51, %v401_v47 }
 0x104   : > { %428 = vst [vmem:[%s252_s29 + $0x8] sm:$0xff] %v580_v52  ;;  %430 = vst [vmem:[%s252_s29 + $0x18] sm:$0xff] %v582_v53 }
 0x109   : > { %v474_v54 = vld [vmem:[%s252_s29] sm:$0xff]  ;;  %v478_v56 = vld [vmem:[%s252_s29 + $0x10] sm:$0xff] }
 0x10a   : > { %475 = vst [vmem:[%s440_s8] sm:$0xff] %v474_v54  ;;  %479 = vst [vmem:[%s440_s8 + $0x20] sm:$0xff] %v478_v56 }
 0x10b   : > { %v476_v55 = vld [vmem:[%s252_s29 + $0x8] sm:$0xff]  ;;  %v480_v57 = vld [vmem:[%s252_s29 + $0x18] sm:$0xff] }
 0x10c   : > { %477 = vst [vmem:[%s440_s8 + $0x10] sm:$0xff] %v476_v55  ;;  %481 = vst [vmem:[%s440_s8 + $0x30] sm:$0xff] %v480_v57 }
 0x10d PF: > { %p11_p11 = scmp.ge.s32.totalorder %s692_s19, 4   ;;  %s765_s15 = smov %s641_s16 }
 0x10e   : > { %s766_s16 = smov %s702_s22  ;;  %s767_s17 = smov %s692_s19 }
 0x10f   :  { %13 = sbr.rel (!%p11_p11) target bundleno = 2 (0x2), region = 150 }

// kernel: wct_forward.8
= control target key start
LH: loop header
LB: loop body
LE: loop exit
PB: predicated region body
PF: predicated region fallthrough
CT: control target
= control target key end

     0   :  { %s2575_s0 = inlined_call_operand.vmem [shape: bf16[9,32,8], index: 0, kind: input, shape index: {}]   ;;  %s2576_s1 = inlined_call_operand.vmem [shape: f32[32,1], index: 1, kind: input, shape index: {}]   ;;  %s2577_s2 = inlined_call_operand.vmem [shape: bf16[2,8,512], index: 2, kind: input, shape index: {}, may-alias: {2,3,4}]   ;;  %s2578_s3 = inlined_call_operand.vmem [shape: bf16[2,8,512], index: 3, kind: input, shape index: {}, may-alias: {2,3,4}]   ;;  %s2579_s4 = inlined_call_operand.vmem [shape: bf16[2,8,512], index: 4, kind: input, shape index: {}, may-alias: {2,3,4}]   ;;  %s2580_s5 = inlined_call_operand.vmem [shape: f32[1,512], index: 5, kind: input, shape index: {}]   ;;  %s2581_s6 = inlined_call_operand.vmem [shape: bf16[2,32,512], index: 6, kind: output, shape index: {0}]   ;;  %s2582_s7 = inlined_call_operand.vmem [shape: f32[2,32,32], index: 7, kind: output, shape index: {1}]   ;;  %s2583_s8 = inlined_call_operand.vmem [shape: f32[2,32,1], index: 8, kind: output, shape index: {2}]  }
   0x1   :  { %2593 = sst [smem:[#allocation13_spill]] %s2581_s6 }
   0x2   :  { %s2254_s27 = smov 0   ;;  %s2256_s28 = smov 0  }
   0x3   :  { %s2258_s29 = smov 0   ;;  %s2260_s30 = smov 0  }
   0x4   :  { %s2262_s9 = smov 0   ;;  %s2264_s10 = smov 0  }
   0x5   :  { %s2266_s11 = smov 0  }
   0x6 LB: > { %2594 = sst [smem:[#allocation3_spill]] %s2176_s28  ;;  %s28_s12 = sadd.s32 1, %s2188_s9  ;;  %s2196_s11 = sphi %s2266_s11, %s19_s11   ;;  %s2192_s10 = sphi %s2264_s10, %s2617_s10   ;;  %s2188_s9 = sphi %s2262_s9, %s2616_s9   ;;  %s2184_s30 = sphi %s2260_s30, %s2615_s30   ;;  %s2180_s29 = sphi %s2258_s29, %s2614_s29   ;;  %s2176_s28 = sphi %s2256_s28, %s2613_s28   ;;  %s2172_s27 = sphi %s2254_s27, %s2612_s27  }
   0x7   : > { %2595 = sst [smem:[#allocation4_spill]] %s2184_s30  ;;  %p29_p0 = scmp.ge.s32.totalorder %s28_s12, 2 }
   0x8   : > { %2596 = sst [smem:[#allocation5_spill]] %s2188_s9  ;;  %s31_s13 = sadd.s32 1, %s2192_s10 }
   0x9   : > { %2597 = sst [smem:[#allocation6_spill]] %s2192_s10  ;;  %s1838_s14 = sadd.s32 4294967295, %s2196_s11  }
   0xa   : > { %2598 = sst [smem:[#allocation7_spill]] %s2196_s11  ;;  %p218_p1 = scmp.ne.s32.totalorder %s2176_s28, %s2172_s27 }
   0xb   : > { %s2619_s12 = smov (%p29_p0, %s28_s12), 0  ;;  %s2621_s13 = smov (!%p29_p0, %s31_s13), %s2192_s10 }
   0xc   : > { %2599 = sst [smem:[#allocation8_spill]] %s2619_s12  ;;  %s204_s15 = ssub.s32 %s2188_s9, %s2619_s12 }
   0xd   : > { %p219_p2 = scmp.eq.s32.totalorder %s1838_s14, 3  ;;  %p33_p3 = scmp.ge.s32.totalorder %s2621_s13, 2 }
   0xe   : > { %p1848_p4 = scmp.ge.s32.totalorder %s2196_s11, 1  ;;  %p360_p6 = scmp.lt.s32.totalorder %s2196_s11, 5 }
   0xf   : > { %p2300_p5 = por %p219_p2, %p218_p1  ;;  %s2623_s13 = smov (%p33_p3, %s2621_s13), 0 }
  0x10   : > { %2602 = sst [smem:[#allocation10_spill]] %s2623_s13  ;;  %p361_p7 = pnand %p1848_p4, %p360_p6 }
  0x11   : > { %s2600_s16 = scalar_select %p2300_p5, 1, 0 }
  0x12   : > { %s203_s17 = ssub.s32 %s2192_s10, %s2623_s13  ;;  %s208_s19 = sadd.s32 1, %s2176_s28 }
  0x13   : > { %2601 = sst [smem:[#allocation9_spill]] %s2600_s16  ;;  %s205_s18 = sor.u32 %s204_s15, %s203_s17 }
  0x14   : > { %p206_p8 = scmp.eq.s32.totalorder %s205_s18, 0  ;;  %364 = sbr.rel (%p361_p7) target bundleno = 832 (0x340), region = 44 }
  0x16   : > { %s2311_s20 = scalar_select %p206_p8, %s2176_s28, %s208_s19  }
  0x18   : > { %2603 = sst [smem:[#allocation11_spill]] %s2311_s20 }
  0x1b   : > { %s418_s21 = sand.u32 1, %s2172_s27   ;;  %s2315_s22 = sshll.u32 %s2180_s29, 1 }
  0x1c   : > { %2604 = sst [smem:[#allocation12_spill]] %s2315_s22  ;;  %s1849_s23 = sshll.u32 %s418_s21, 5 }
  0x1d   : > { %s1851_s24 = sadd.s32 4294967295, %s2315_s22  ;;  %p439_p10 = scmp.lt.s32.totalorder %s2184_s30, 1 }
  0x1e   : > { %p437_p9 = scmp.gt.s32.totalorder %s1851_s24, 0  ;;  %p1852_p11 = scmp.lt.s32.totalorder %s1851_s24, 3 }
  0x1f   : > { %s440_s25 = scalar_select %p439_p10, %s2184_s30, 1 }
  0x20   : > { %s2625_s24 = smov (!%p437_p9, %s1851_s24), 0  ;;  %p454_p12 = scmp.lt.s32.totalorder %s2315_s22, 3 }
  0x21   : > { %s2627_s24 = smov (!%p1852_p11, %s2625_s24), 3  ;;  %s1857_s26 = sshll.u32 %s440_s25, 2 }
  0x22   : > { %s444_s14 = sadd.s32 %s2627_s24, %s1857_s26  ;;  %s1972_s15 = sadd.s32 2, %s2315_s22 }
  0x23   : > { %s2322_s17 = sshll.u32 %s444_s14, 2  ;;  %p463_p13 = scmp.lt.s32.totalorder %s1972_s15, 3 }
  0x24   : > { %s1973_s21 = sshll.u32 %s440_s25, 5  ;;  %s2352_s24 = scalar_lea.vmem [#allocation2], %s1849_s23 }
  0x25   : > { %s2329_s13 = scalar_select %p454_p12, %s2315_s22, 3 }
  0x26   : > { %s2629_s15 = smov (!%p463_p13, %s1972_s15), 3  ;;  %s2339_s11 = scalar_lea.vmem %s2582_s7, %s1973_s21 }
  0x27   : > { %s457_s12 = sadd.s32 %s1857_s26, %s2329_s13  ;;  %s2347_s22 = scalar_lea.vmem %s2583_s8, %s1973_s21 }
  0x28   : > { %s1861_s20 = sshll.u32 %s457_s12, 2  ;;  %s2631_s15 = smov (!%p463_p13, %s2629_s15), 3 }
  0x29   : > { %s459_s25 = scalar_lea.vmem %s2578_s3, %s1861_s20  ;;  %s470_s30 = sadd.s32 %s1857_s26, %s2631_s15 }
  0x2a   : > { %s1867_s16 = sshll.u32 %s470_s30, 2  ;;  %p1873_p0 = scmp.ne.s32.totalorder %s2180_s29, 0 }
  0x2b   : > { %s472_s12 = scalar_lea.vmem %s2579_s4, %s1867_s16  ;;  %vm498_vm0 = vcmask (!%p1873_p0), 261120   ;;  %vm503_vm1 = vcmask (!%p1873_p0), 7168   ;;  %v2198_v0 = vmov (!%p1873_p0), 0.0  }
  0x2c   : > { %497 = sbr.rel (%p1873_p0) target bundleno = 51 (0x33), region = 48  ;;  %499 = vst.msk [vmem:[%s2339_s11] sm:$0xff] (!%p1873_p0), %vm498_vm0, %v2198_v0  ;;  %500 = vst.msk [vmem:[%s2339_s11 + $0x8] sm:$0xff] (!%p1873_p0), %vm498_vm0, %v2198_v0 }
  0x2d   : > { %501 = vst.msk [vmem:[%s2339_s11 + $0x10] sm:$0xff] (!%p1873_p0), %vm498_vm0, %v2198_v0  ;;  %502 = vst.msk [vmem:[%s2339_s11 + $0x18] sm:$0xff] (!%p1873_p0), %vm498_vm0, %v2198_v0 }
  0x2e   : > { %504 = vst.msk [vmem:[%s2347_s22] sm:$0xff] (!%p1873_p0), %vm503_vm1, %v2198_v0  ;;  %505 = vst.msk [vmem:[%s2347_s22 + $0x8] sm:$0xff] (!%p1873_p0), %vm503_vm1, %v2198_v0 }
  0x2f   : > { %506 = vst.msk [vmem:[%s2347_s22 + $0x10] sm:$0xff] (!%p1873_p0), %vm503_vm1, %v2198_v0  ;;  %507 = vst.msk [vmem:[%s2347_s22 + $0x18] sm:$0xff] (!%p1873_p0), %vm503_vm1, %v2198_v0 }
  0x33 PF: > { %v509_v1 = vld [vmem:[%s459_s25] sm:$0xff]  ;;  %s2605_s29 = scalar_lea.vmem %s2577_s2, %s2322_s17  ;;  %s2199_s30 = smov 19   ;;  %v2200_v8 = vmov 0   ;;  %vm525_vm2 = vcmask 154624   ;;  %v1390_v15 = vld [vmem:[%s2576_s1 + $0x8] sm:$0xff]  ;;  %v1391_v16 = vld [vmem:[%s2576_s1 + $0x10] sm:$0xff] }
  0x34   : > { %v2122_v2 = vld [vmem:[%s2605_s29] ss:$0 sps:$4 sm:$0xff]   ;;  %v1876_v3 = vcombine.high %v509_v1, %v509_v1  ;;  %v1875_v4 = vcombine.low %v509_v1, %v509_v1  ;;  %972 = vmatprep.mubr.bf16.mxu0 %v2200_v8  ;;  %615 = vmatprep.mubr.bf16.mxu1 %v2200_v8  ;;  %s2201_s16 = smov 109   ;;  %s2202_s20 = smov 127   ;;  %v1392_v17 = vld [vmem:[%s2576_s1 + $0x18] sm:$0xff]  ;;  %vm925_vm3 = vcmask 891904  }
  0x35   : > { %514 = vrot.lane.b32.xlu0 %v2122_v2, %s2199_s30  ;;  %v2123_v5 = vld [vmem:[%s472_s12] ss:$0 sps:$4 sm:$0xff]   ;;  %2119 = vset.pattern.permute.xlu1 %v2200_v8  ;;  %s2203_s23 = smov 108   ;;  %s2204_s26 = smov 92   ;;  %vm576_vm4 = vcmask 1043456   ;;  %vm566_vm5 = vcmask 1039360  }
  0x36   : > { %523 = vrot.lane.b32.xlu1 %v1876_v3, %s2199_s30  ;;  %2118 = vset.pattern.permute.xlu0 %v2200_v8  ;;  %s2205_s15 = smov 126   ;;  %s2206_s17 = smov 91   ;;  %v1389_v14 = vld [vmem:[%s2576_s1] sm:$0xff]  ;;  %vm569_vm6 = vcmask 64512   ;;  %v2125_v31 = vld [vmem:[%s2575_s0 + $0x10] sm:$0xff]   ;;  %vm1022_vm7 = vcmask 883712  }
  0x37   : > { %s2207_s19 = smov 110   ;;  %s2208_s21 = smov 90   ;;  %v2124_v25 = vld [vmem:[%s2575_s0 + $0x40] sm:$0xff]   ;;  %v2126_v35 = vld [vmem:[%s2575_s0 + $0x48] sm:$0xff]   ;;  %vm1119_vm8 = vcmask 752640   ;;  %v2127_v41 = vld [vmem:[%s2575_s0 + $0x18] sm:$0xff]  }
  0x38   : > { %v2128_v45 = vld [vmem:[%s2575_s0 + $0x50] sm:$0xff]   ;;  %vm731_vm9 = vcmask 1031168   ;;  %v2129_v50 = vld [vmem:[%s2575_s0] sm:$0xff]   ;;  %vm1216_vm10 = vcmask 744448   ;;  %v2130_v56 = vld [vmem:[%s2575_s0 + $0x58] sm:$0xff]   ;;  %vm828_vm11 = vcmask 900096   ;;  %s2606_s28 = scalar_lea.vmem %s2580_s5, %s2329_s13 }
  0x39   : > { %521 = vrot.lane.b32.xlu0 %v1875_v4, %s2199_s30  ;;  %v2131_v60 = vld [vmem:[%s2575_s0 + $0x8] sm:$0xff]   ;;  %v2132_v63 = vld [vmem:[%s2575_s0 + $0x60] sm:$0xff]   ;;  %vm1313_vm12 = vcmask 736256   ;;  %vm1567_vm13 = vcmask 7168   ;;  %vm1542_vm14 = vcmask 261120   ;;  %s2609_s29 = sld [smem:[#allocation12_spill]] (%p2300_p5) }
  0x3a   : > { %530 = vrot.lane.b32.xlu1 %v2123_v5, %s2199_s30  ;;  %v2133_v5 = vld [vmem:[%s2575_s0 + $0x20] sm:$0xff]  }
  0xa7   : > { %v515_v6 = vpop.permute.xlu0 %514 }
  0xa8   : > { %v524_v7 = vpop.permute.xlu1 %523 }
  0xab   : > { %v522_v9 = vpop.permute.xlu0 %521 }
  0xac   : > { %v2372_v10 = vsel %vm525_vm2, %v522_v9, %v524_v7  ;;  %v2374_v11 = vsel %vm525_vm2, %v515_v6, %v522_v9  ;;  %v531_v12 = vpop.permute.xlu1 %530 }
  0xad   : > { %919 = vrot.lane.b32.xlu0 %v2374_v11, %s2201_s16  ;;  %921 = vrot.lane.b32.xlu1 %v2372_v10, %s2201_s16  ;;  %v538_v13 = vsel %vm525_vm2, %v524_v7, %v531_v12  ;;  %v652_v34 = vsel %vm576_vm4, %v2374_v11, 0  ;;  %v2134_v12 = vld [vmem:[%s2575_s0 + $0x68] sm:$0xff]  }
  0xb1   : > { %923 = vrot.lane.b32.xlu0 %v538_v13, %s2201_s16  ;;  %560 = vrot.lane.b32.xlu1 %v2374_v11, %s2202_s20 }
  0xb5   : > { %562 = vrot.lane.b32.xlu0 %v2372_v10, %s2202_s20  ;;  %564 = vrot.lane.b32.xlu1 %v538_v13, %s2202_s20 }
  0xb9   : > { %1016 = vrot.lane.b32.xlu0 %v2374_v11, %s2203_s23  ;;  %1018 = vrot.lane.b32.xlu1 %v2372_v10, %s2203_s23 }
  0xbd   : > { %1020 = vrot.lane.b32.xlu0 %v538_v13, %s2203_s23  ;;  %1113 = vrot.lane.b32.xlu1 %v2374_v11, %s2204_s26 }
  0xc1   : > { %1115 = vrot.lane.b32.xlu0 %v2372_v10, %s2204_s26  ;;  %1117 = vrot.lane.b32.xlu1 %v538_v13, %s2204_s26 }
  0xc5   : > { %725 = vrot.lane.b32.xlu0 %v2374_v11, %s2205_s15  ;;  %727 = vrot.lane.b32.xlu1 %v2372_v10, %s2205_s15 }
  0xc9   : > { %729 = vrot.lane.b32.xlu0 %v538_v13, %s2205_s15  ;;  %1210 = vrot.lane.b32.xlu1 %v2374_v11, %s2206_s17  ;;  %s2610_s15 = sld [smem:[#allocation13_spill]] (%p2300_p5) }
  0xcd   : > { %1212 = vrot.lane.b32.xlu0 %v2372_v10, %s2206_s17  ;;  %1214 = vrot.lane.b32.xlu1 %v538_v13, %s2206_s17 }
  0xd1   : > { %822 = vrot.lane.b32.xlu0 %v2374_v11, %s2207_s19  ;;  %824 = vrot.lane.b32.xlu1 %v2372_v10, %s2207_s19 }
  0xd5   : > { %826 = vrot.lane.b32.xlu0 %v538_v13, %s2207_s19  ;;  %1307 = vrot.lane.b32.xlu1 %v2374_v11, %s2208_s21 }
  0xd9   : > { %1309 = vrot.lane.b32.xlu0 %v2372_v10, %s2208_s21  ;;  %1311 = vrot.lane.b32.xlu1 %v538_v13, %s2208_s21  ;;  %v2135_v13 = vld [vmem:[%s2575_s0 + $0x28] sm:$0xff]  }
  0xdd   : > { %1395 = vperm.xlu0 %2118, %v1389_v14   ;;  %1400 = vperm.xlu1 %2119, %v1390_v15   ;;  %v2136_v14 = vld [vmem:[%s2575_s0 + $0x70] sm:$0xff]  }
  0xe1   : > { %1405 = vperm.xlu1 %2119, %v1391_v16   ;;  %1410 = vperm.xlu0 %2118, %v1392_v17   ;;  %v2137_v17 = vld [vmem:[%s2575_s0 + $0x30] sm:$0xff]  }
 0x11f   : > { %v920_v18 = vpop.permute.xlu0 %919  ;;  %v922_v19 = vpop.permute.xlu1 %921 }
 0x120   : > { %v926_v20 = vsel %vm925_vm3, %v920_v18, %v922_v19  ;;  %v2138_v18 = vld [vmem:[%s2575_s0 + $0x78] sm:$0xff]  }
 0x121   : > { %v935_v24 = vsel %vm576_vm4, %v926_v20, 0  ;;  %v2140_v20 = vld [vmem:[%s2575_s0 + $0x80] sm:$0xff]  }
 0x123   : > { %v924_v21 = vpop.permute.xlu0 %923  ;;  %v561_v22 = vpop.permute.xlu1 %560 }
 0x124   : > { %v927_v23 = vsel %vm925_vm3, %v922_v19, %v924_v21  ;;  %v2139_v19 = vld [vmem:[%s2575_s0 + $0x38] sm:$0xff]   ;;  %v2141_v21 = vld [vmem:[%s2575_s0 + $0x88] sm:$0xff]  }
 0x125   : > { %1916 = vmatprep.subr.msk.bf16.mxu0 %vm576_vm4, %v927_v23 }
 0x126   : > { %941 = vmatpush1.bf16.msra.mxu0 %v935_v24 }
 0x127   : > { %v563_v26 = vpop.permute.xlu0 %562  ;;  %v565_v27 = vpop.permute.xlu1 %564 }
 0x128   : > { %v568_v28 = vsel %vm566_vm5, %v563_v26, %v565_v27  ;;  %v567_v29 = vsel %vm566_vm5, %v561_v22, %v563_v26  ;;  %v1431_v26 = vlaneseq }
 0x129   : > { %1884 = vmatprep.subr.msk.bf16.mxu1 %vm576_vm4, %v568_v28  ;;  %1917 = vmatmul.mubr.msk.bf16.vlgmr.msra.gmra.mrb[0].mxu0 %vm569_vm6, %v2124_v25  ;;  %v578_v30 = vsel %vm576_vm4, %v567_v29, 0 }
 0x12a   : > { %584 = vmatpush1.bf16.msra.mxu1 %v578_v30  ;;  %982 = vmatprep.mubr.bf16.mxu0 %v2200_v8  ;;  %v1432_v27 = vshrl.u32 %v1431_v26, 7 }
 0x12b   : > { %v1017_v32 = vpop.permute.xlu0 %1016  ;;  %1889 = vmatprep.subr.msk.bf16.mxu1 %vm576_vm4, %v2372_v10  ;;  %v1019_v33 = vpop.permute.xlu1 %1018 }
 0x12c   : > { %v1023_v36 = vsel %vm1022_vm7, %v1017_v32, %v1019_v33  ;;  %v1433_v32 = vsub.s32 0, %v1432_v27 }
 0x12d   : > { %1885 = vmatmul.mubr.msk.bf16.vlgmr.msra.gmra.mrb[0].mxu1 %vm569_vm6, %v2125_v31  ;;  %v1032_v40 = vsel %vm576_vm4, %v1023_v36, 0 }
 0x12e   : > { %658 = vmatpush1.bf16.msra.mxu1 %v652_v34  ;;  %625 = vmatprep.mubr.bf16.mxu1 %v2200_v8  ;;  %v1437_v34 = vsub.s32 1, %v1432_v27 }
 0x12f   : > { %v1021_v37 = vpop.permute.xlu0 %1020  ;;  %v1114_v38 = vpop.permute.xlu1 %1113 }
 0x130   : > { %v1024_v39 = vsel %vm1022_vm7, %v1019_v33, %v1021_v37 }
 0x131   : > { %1918 = vmatmul.mubr.msk.bf16.gmra.mrb[4].mxu0 %vm569_vm6, %v2126_v35  ;;  %1925 = vmatprep.subr.msk.bf16.mxu0 %vm576_vm4, %v1024_v39 }
 0x132   : > { %1038 = vmatpush1.bf16.msra.mxu0 %v1032_v40  ;;  %1069 = vmatprep.mubr.bf16.mxu0 %v2200_v8 }
 0x133   : > { %v1116_v42 = vpop.permute.xlu0 %1115  ;;  %v1118_v43 = vpop.permute.xlu1 %1117 }
 0x134   : > { %v1121_v44 = vsel %vm1119_vm8, %v1116_v42, %v1118_v43  ;;  %v1120_v46 = vsel %vm1119_vm8, %v1114_v38, %v1116_v42 }
 0x135   : > { %1886 = vmatmul.mubr.msk.bf16.gmra.mrb[4].mxu1 %vm569_vm6, %v2127_v41  ;;  %1934 = vmatprep.subr.msk.bf16.mxu0 %vm576_vm4, %v1121_v44  ;;  %v1129_v49 = vsel %vm576_vm4, %v1120_v46, 0 }
 0x136   : > { %689 = vmatprep.mubr.bf16.mxu1 %v2200_v8 }
 0x137   : > { %v726_v47 = vpop.permute.xlu0 %725  ;;  %v728_v48 = vpop.permute.xlu1 %727 }
 0x138   : > { %v732_v51 = vsel %vm731_vm9, %v726_v47, %v728_v48 }
 0x139   : > { %1926 = vmatmul.mubr.msk.bf16.vlgmr.msra.gmra.mrb[0].mxu0 %vm569_vm6, %v2128_v45  ;;  %v741_v55 = vsel %vm576_vm4, %v732_v51, 0 }
 0x13a   : > { %1135 = vmatpush1.bf16.msra.mxu0 %v1129_v49  ;;  %1079 = vmatprep.mubr.bf16.mxu0 %v2200_v8 }
 0x13b   : > { %v730_v52 = vpop.permute.xlu0 %729  ;;  %v1211_v53 = vpop.permute.xlu1 %1210 }
 0x13c   : > { %v733_v54 = vsel %vm731_vm9, %v728_v48, %v730_v52 }
 0x13d   : > { %1890 = vmatmul.mubr.msk.bf16.vlgmr.msra.gmra.mrb[0].mxu1 %vm569_vm6, %v2129_v50  ;;  %1898 = vmatprep.subr.msk.bf16.mxu1 %vm576_vm4, %v733_v54 }
 0x13e   : > { %747 = vmatpush1.bf16.msra.mxu1 %v741_v55  ;;  %699 = vmatprep.mubr.bf16.mxu1 %v2200_v8 }
 0x13f   : > { %v1213_v57 = vpop.permute.xlu0 %1212  ;;  %v1215_v58 = vpop.permute.xlu1 %1214 }
 0x140   : > { %v1218_v59 = vsel %vm1216_vm10, %v1213_v57, %v1215_v58  ;;  %v1217_v0 = vsel %vm1216_vm10, %v1211_v53, %v1213_v57 }
 0x141   : > { %1927 = vmatmul.mubr.msk.bf16.gmra.mrb[4].mxu0 %vm569_vm6, %v2130_v56  ;;  %1943 = vmatprep.subr.msk.bf16.mxu0 %vm576_vm4, %v1218_v59  ;;  %v1226_v4 = vsel %vm576_vm4, %v1217_v0, 0 }
 0x142   : > { %1166 = vmatprep.mubr.bf16.mxu0 %v2200_v8 }
 0x143   : > { %v823_v61 = vpop.permute.xlu0 %822  ;;  %v825_v62 = vpop.permute.xlu1 %824 }
 0x144   : > { %v829_v6 = vsel %vm828_vm11, %v823_v61, %v825_v62 }
 0x145   : > { %1891 = vmatmul.mubr.msk.bf16.gmra.mrb[4].mxu1 %vm569_vm6, %v2131_v60  ;;  %v838_v11 = vsel %vm576_vm4, %v829_v6, 0 }
 0x146   : > { %778 = vmatprep.mubr.bf16.mxu1 %v2200_v8 }
 0x147   : > { %v827_v1 = vpop.permute.xlu0 %826  ;;  %v1308_v2 = vpop.permute.xlu1 %1307 }
 0x148   : > { %v830_v3 = vsel %vm828_vm11, %v825_v62, %v827_v1 }
 0x149   : > { %1907 = vmatprep.subr.msk.bf16.mxu1 %vm576_vm4, %v830_v3  ;;  %1935 = vmatmul.mubr.msk.bf16.vlgmr.msra.gmra.mrb[0].mxu0 %vm569_vm6, %v2132_v63 }
 0x14a   : > { %1232 = vmatpush1.bf16.msra.mxu0 %v1226_v4  ;;  %1176 = vmatprep.mubr.bf16.mxu0 %v2200_v8 }
 0x14b   : > { %v1310_v7 = vpop.permute.xlu0 %1309  ;;  %v1312_v9 = vpop.permute.xlu1 %1311 }
 0x14c   : > { %v1315_v10 = vsel %vm1313_vm12, %v1310_v7, %v1312_v9  ;;  %v1314_v15 = vsel %vm1313_vm12, %v1308_v2, %v1310_v7 }
 0x14d   : > { %1899 = vmatmul.mubr.msk.bf16.vlgmr.msra.gmra.mrb[0].mxu1 %vm569_vm6, %v2133_v5  ;;  %1952 = vmatprep.subr.msk.bf16.mxu0 %vm576_vm4, %v1315_v10  ;;  %v1323_v16 = vsel %vm576_vm4, %v1314_v15, 0 }
 0x14e   : > { %844 = vmatpush1.bf16.msra.mxu1 %v838_v11  ;;  %788 = vmatprep.mubr.bf16.mxu1 %v2200_v8 }
 0x151   : > { %1936 = vmatmul.mubr.msk.bf16.gmra.mrb[4].mxu0 %vm569_vm6, %v2134_v12 }
 0x152   : > { %1263 = vmatprep.mubr.bf16.mxu0 %v2200_v8 }
 0x155   : > { %1900 = vmatmul.mubr.msk.bf16.gmra.mrb[4].mxu1 %vm569_vm6, %v2135_v13 }
 0x156   : > { %875 = vmatprep.mubr.bf16.mxu1 %v2200_v8 }
 0x159   : > { %1944 = vmatmul.mubr.msk.bf16.vlgmr.msra.gmra.mrb[0].mxu0 %vm569_vm6, %v2136_v14 }
 0x15a   : > { %1329 = vmatpush1.bf16.msra.mxu0 %v1323_v16  ;;  %1273 = vmatprep.mubr.bf16.mxu0 %v2200_v8 }
 0x15c   : > { %v1396_v35 = vpop.permute.xlu0 %1395  ;;  %v1401_v47 = vpop.permute.xlu1 %1400 }
 0x15d   : > { %1908 = vmatmul.mubr.msk.bf16.vlgmr.msra.gmra.mrb[0].mxu1 %vm569_vm6, %v2137_v17 }
 0x15e   : > { %885 = vmatprep.mubr.bf16.mxu1 %v2200_v8 }
 0x160   : > { %v1406_v0 = vpop.permute.xlu1 %1405  ;;  %v1411_v10 = vpop.permute.xlu0 %1410 }
 0x161   : > { %1945 = vmatmul.mubr.msk.bf16.gmra.mrb[4].mxu0 %vm569_vm6, %v2138_v18 }
 0x162   : > { %1360 = vmatprep.mubr.bf16.mxu0 %v2200_v8 }
 0x165   : > { %1909 = vmatmul.mubr.msk.bf16.gmra.mrb[4].mxu1 %vm569_vm6, %v2139_v19 }
 0x169   : > { %1953 = vmatmul.mubr.msk.bf16.vlgmr.msra.gmra.mrb[0].mxu0 %vm569_vm6, %v2140_v20 }
 0x16a   : > { %1370 = vmatprep.mubr.bf16.mxu0 %v2200_v8  ;;  %v1429_v8 = vld [vmem:[%s2606_s28] sm:$0x3] }
 0x16b   : > { %v1434_v40 = vrot.slane %v1429_v8, %v1433_v32  ;;  %v1438_v44 = vrot.slane %v1429_v8, %v1437_v34  ;;  %v1548_v32 = vld [vmem:[%s2347_s22 + $0x8] sm:$0xff]  ;;  %v1549_v34 = vld [vmem:[%s2347_s22 + $0x10] sm:$0xff] }
 0x171   : > { %1954 = vmatmul.mubr.msk.bf16.gmra.mrb[4].mxu0 %vm569_vm6, %v2141_v21 }
 0x230   : > { %v877_v22 = vpop.f32.mrb[0].mxu1 }
 0x231   : > { %v879_v23 = vpop.f32.mrb[1].mxu1 }
 0x232   : > { %v881_v24 = vpop.f32.mrb[2].mxu1 }
 0x233   : > { %v883_v25 = vpop.f32.mrb[3].mxu1 }
 0x238   : > { %v887_v28 = vpop.f32.mrb[4].mxu1 }
 0x239   : > { %v889_v29 = vpop.f32.mrb[5].mxu1 }
 0x23a   : > { %v891_v30 = vpop.f32.mrb[6].mxu1 }
 0x23b   : > { %v893_v31 = vpop.f32.mrb[7].mxu1 }
 0x23c   : > { %v1362_v33 = vpop.f32.mrb[0].mxu0 }
 0x23d   : > { %v1987_v36 = vadd.f32 %v1362_v33, %v877_v22  ;;  %v1364_v37 = vpop.f32.mrb[1].mxu0 }
 0x23e   : > { %v1988_v38 = vadd.f32 %v1364_v37, %v879_v23  ;;  %v1366_v39 = vpop.f32.mrb[2].mxu0 }
 0x23f   : > { %v1413_v41 = vadd.f32 %v1987_v36, %v1396_v35  ;;  %v1989_v42 = vadd.f32 %v1366_v39, %v881_v24  ;;  %v1368_v43 = vpop.f32.mrb[3].mxu0  ;;  %v1550_v36 = vld [vmem:[%s2347_s22 + $0x18] sm:$0xff] }
 0x240   : > { %v1414_v45 = vadd.f32 %v1988_v38, %v1396_v35  ;;  %v1990_v46 = vadd.f32 %v1368_v43, %v883_v25 }
 0x241   : > { %v1421_v48 = vmax.f32 %v1413_v41, 0.0  ;;  %v1415_v49 = vadd.f32 %v1989_v42, %v1401_v47 }
 0x242   : > { %v1422_v50 = vmax.f32 %v1414_v45, 0.0  ;;  %v1416_v51 = vadd.f32 %v1990_v46, %v1401_v47 }
 0x243   : > { %v1441_v52 = vmul.f32 %v1434_v40, %v1421_v48  ;;  %v1423_v53 = vmax.f32 %v1415_v49, 0.0  ;;  %v1451_v48 = vld [vmem:[%s2339_s11 + $0x10] sm:$0xff] }
 0x244   : > { %v1442_v54 = vmul.f32 %v1438_v44, %v1422_v50  ;;  %v1424_v55 = vmax.f32 %v1416_v51, 0.0  ;;  %v1372_v56 = vpop.f32.mrb[4].mxu0 }
 0x245   : > { %v1443_v57 = vmul.f32 %v1434_v40, %v1423_v53  ;;  %v1991_v58 = vadd.f32 %v1372_v56, %v887_v28  ;;  %v1374_v59 = vpop.f32.mrb[5].mxu0 }
 0x246   : > { %v1975_v60 = vpack.c.bf16 %v1442_v54, %v1441_v52  ;;  %v1444_v61 = vmul.f32 %v1438_v44, %v1424_v55  ;;  %v1992_v62 = vadd.f32 %v1374_v59, %v889_v29  ;;  %v1376_v63 = vpop.f32.mrb[6].mxu0  ;;  %1517 = vmatprep.mubr.f32.mxu1 %v1442_v54  ;;  %v1551_v1 = vadd.f32 %v1442_v54, %v1441_v52  ;;  %v1547_v29 = vld [vmem:[%s2347_s22] sm:$0xff] }
 0x247   : > { %v1993_v2 = vadd.f32 %v1376_v63, %v891_v30  ;;  %v1417_v3 = vadd.f32 %v1991_v58, %v1406_v0  ;;  %v1378_v4 = vpop.f32.mrb[7].mxu0  ;;  %v1981_v5 = vpack.c.bf16 %v1443_v57, %v1441_v52 }
 0x248   : > { %1596 = vst [vmem:[%s2352_s24] sm:$0xff] %v1975_v60  ;;  %v1976_v6 = vpack.c.bf16 %v1444_v61, %v1443_v57  ;;  %v1418_v7 = vadd.f32 %v1992_v62, %v1406_v0  ;;  %v1994_v9 = vadd.f32 %v1378_v4, %v893_v31  ;;  %1552 = vadd.xlane.f32.xlu1 %v1551_v1 }
 0x249   : > { %v1979_v11 = vpack.c.bf16 %v1444_v61, %v1442_v54  ;;  %v1425_v12 = vmax.f32 %v1417_v3, 0.0  ;;  %v1419_v13 = vadd.f32 %v1993_v2, %v1411_v10  ;;  %v1554_v14 = vadd.f32 %v1444_v61, %v1443_v57 }
 0x24a   : > { %1597 = vst [vmem:[%s2352_s24 + $0x8] sm:$0xff] %v1976_v6  ;;  %v1426_v15 = vmax.f32 %v1418_v7, 0.0  ;;  %v1420_v16 = vadd.f32 %v1994_v9, %v1411_v10 }
 0x24b   : > { %1980 = vmatprep.subr.bf16.mxu1 %v1979_v11  ;;  %v1445_v17 = vmul.f32 %v1434_v40, %v1425_v12  ;;  %v1427_v18 = vmax.f32 %v1419_v13, 0.0  ;;  %1555 = vadd.xlane.f32.xlu0 %v1554_v14 }
 0x24c   : > { %1982 = vmatpush1.bf16.xpose.msra.mxu1 %v1981_v5  ;;  %v1446_v19 = vmul.f32 %v1438_v44, %v1426_v15  ;;  %v1428_v20 = vmax.f32 %v1420_v16, 0.0 }
 0x24d   : > { %v1447_v21 = vmul.f32 %v1434_v40, %v1427_v18  ;;  %v1449_v40 = vld [vmem:[%s2339_s11] sm:$0xff] }
 0x24e   : > { %v1977_v22 = vpack.c.bf16 %v1446_v19, %v1445_v17  ;;  %v1448_v23 = vmul.f32 %v1438_v44, %v1428_v20  ;;  %v1557_v24 = vadd.f32 %v1446_v19, %v1445_v17  ;;  %v1450_v44 = vld [vmem:[%s2339_s11 + $0x8] sm:$0xff] }
 0x24f   : > { %v1985_v25 = vpack.c.bf16 %v1447_v21, %v1445_v17  ;;  %v1655_v56 = vld [vmem:[%s2352_s24] sm:$0xff] (%p2300_p5) }
 0x250   : > { %1598 = vst [vmem:[%s2352_s24 + $0x10] sm:$0xff] %v1977_v22  ;;  %v1978_v26 = vpack.c.bf16 %v1448_v23, %v1447_v21  ;;  %1558 = vadd.xlane.f32.xlu0 %v1557_v24  ;;  %v1560_v27 = vadd.f32 %v1448_v23, %v1447_v21  ;;  %v1983_v28 = vpack.c.bf16 %v1448_v23, %v1446_v19 }
 0x252   : > { %1599 = vst [vmem:[%s2352_s24 + $0x18] sm:$0xff] %v1978_v26  ;;  %1561 = vadd.xlane.f32.xlu1 %v1560_v27  ;;  %1984 = vmatprep.subr.bf16.mxu1 %v1983_v28 }
 0x254   : > { %1986 = vmatpush1.bf16.xpose.msra.mxu1 %v1985_v25 }
 0x257   : > { %v1659_v58 = vld [vmem:[%s2352_s24 + $0x10] sm:$0xff] (%p2300_p5) }
 0x259   : > { %v1661_v59 = vld [vmem:[%s2352_s24 + $0x18] sm:$0xff] (%p2300_p5) }
 0x25b   : > { %1518 = vmatmul.mubr.f32.vlgmr.msra.gmra.mrb[8].mxu1 %v1441_v52  ;;  %v1452_v52 = vld [vmem:[%s2339_s11 + $0x18] sm:$0xff] }
 0x25c   : > { %1522 = vmatprep.mubr.f32.mxu1 %v1444_v61 }
 0x25f   : > { %1523 = vmatmul.mubr.f32.gmra.mrb[10].mxu1 %v1443_v57  ;;  %v1657_v57 = vld [vmem:[%s2352_s24 + $0x8] sm:$0xff] (%p2300_p5) }
 0x260   : > { %1527 = vmatprep.mubr.f32.mxu1 %v1446_v19 }
 0x263   : > { %1528 = vmatmul.mubr.f32.gmra.mrb[12].mxu1 %v1445_v17 }
 0x264   : > { %1532 = vmatprep.mubr.f32.mxu1 %v1448_v23 }
 0x267   : > { %1533 = vmatmul.mubr.f32.gmra.mrb[14].mxu1 %v1447_v21 }
 0x2d5   : > { %v1553_v30 = vpop.xlane.xlu1 %1552 }
 0x2d6   : > { %v1563_v31 = vadd.f32 %v1553_v30, %v1547_v29 }
 0x2d8   : > { %1568 = vst.msk [vmem:[%s2347_s22] sm:$0xff] %vm1567_vm13, %v1563_v31  ;;  %v1556_v33 = vpop.xlane.xlu0 %1555 }
 0x2d9   : > { %v1564_v8 = vadd.f32 %v1556_v33, %v1548_v32 }
 0x2db   : > { %1569 = vst.msk [vmem:[%s2347_s22 + $0x8] sm:$0xff] %vm1567_vm13, %v1564_v8 }
 0x2dd   : > { %v1559_v35 = vpop.xlane.xlu0 %1558 }
 0x2de   : > { %v1565_v37 = vadd.f32 %v1559_v35, %v1549_v34 }
 0x2df   : > { %v1562_v38 = vpop.xlane.xlu1 %1561 }
 0x2e0   : > { %1570 = vst.msk [vmem:[%s2347_s22 + $0x10] sm:$0xff] %vm1567_vm13, %v1565_v37  ;;  %v1566_v39 = vadd.f32 %v1562_v38, %v1550_v36 }
 0x2e2   : > { %1571 = vst.msk [vmem:[%s2347_s22 + $0x18] sm:$0xff] %vm1567_vm13, %v1566_v39  ;;  %s2608_s22 = sld [smem:[#allocation4_spill]] (%p2300_p5) }
 0x2e8   : > { %s1961_s30 = sshll.u32 (%p2300_p5), %s2608_s22, 4 }
 0x2e9   : > { %s1619_s16 = sadd.s32 (%p2300_p5), %s1961_s30, %s2609_s29 }
 0x2ea   : > { %s1962_s20 = sshll.u32 (%p2300_p5), %s1619_s16, 2 }
 0x32e   : > { %v1519_v41 = vpop.f32.mrb[8].mxu1 }
 0x32f   : > { %v1538_v42 = vadd.f32 %v1519_v41, %v1449_v40  ;;  %v1521_v43 = vpop.f32.mrb[9].mxu1 }
 0x331   : > { %1543 = vst.msk [vmem:[%s2339_s11] sm:$0xff] %vm1542_vm14, %v1538_v42 }
 0x332   : > { %v1524_v45 = vpop.f32.mrb[10].mxu1 }
 0x333   : > { %v1539_v46 = vadd.f32 %v1524_v45, %v1450_v44  ;;  %v1526_v47 = vpop.f32.mrb[11].mxu1 }
 0x335   : > { %1544 = vst.msk [vmem:[%s2339_s11 + $0x8] sm:$0xff] %vm1542_vm14, %v1539_v46 }
 0x336   : > { %v1529_v49 = vpop.f32.mrb[12].mxu1 }
 0x337   : > { %v1540_v50 = vadd.f32 %v1529_v49, %v1451_v48  ;;  %v1531_v51 = vpop.f32.mrb[13].mxu1  ;;  %1616 = sbr.rel (!%p2300_p5) target bundleno = 832 (0x340), region = 52 }
 0x339   : > { %1545 = vst.msk [vmem:[%s2339_s11 + $0x10] sm:$0xff] %vm1542_vm14, %v1540_v50 }
 0x33a   : > { %v1534_v53 = vpop.f32.mrb[14].mxu1 }
 0x33b   : > { %v1541_v54 = vadd.f32 %v1534_v53, %v1452_v52  ;;  %v1536_v55 = vpop.f32.mrb[15].mxu1 }
 0x33d   : > { %1546 = vst.msk [vmem:[%s2339_s11 + $0x18] sm:$0xff] %vm1542_vm14, %v1541_v54  ;;  %s1621_s11 = scalar_lea.vmem (%p2300_p5), %s2610_s15, %s1962_s20 }
 0x33e   : > { %1656 = vst [vmem:[%s1621_s11] sm:$0xff] %v1655_v56  ;;  %1658 = vst [vmem:[%s1621_s11 + $0x10] sm:$0xff] %v1657_v57 }
 0x33f   : > { %1660 = vst [vmem:[%s1621_s11 + $0x20] sm:$0xff] %v1659_v58  ;;  %1662 = vst [vmem:[%s1621_s11 + $0x30] sm:$0xff] %v1661_v59 }
 0x340 PF: > { %s2611_s17 = sld [smem:[#allocation7_spill]]  ;;  %s2612_s27 = sld [smem:[#allocation3_spill]] }
 0x341   : > { %s2613_s28 = sld [smem:[#allocation11_spill]]  ;;  %s2614_s29 = sld [smem:[#allocation5_spill]] }
 0x342   : > { %s2615_s30 = sld [smem:[#allocation6_spill]]  ;;  %s2616_s9 = sld [smem:[#allocation8_spill]] }
 0x343   : > { %s2617_s10 = sld [smem:[#allocation10_spill]] }
 0x346   : > { %s19_s11 = sadd.s32 1, %s2611_s17  }
 0x347   : > { %p16_p1 = scmp.ge.s32.totalorder %s19_s11, 6  }
 0x349   :  { %18 = sbr.rel (!%p16_p1) target bundleno = 6 (0x6), region = 157 }

// kernel: wct_forward.9
= control target key start
LH: loop header
LB: loop body
LE: loop exit
PB: predicated region body
PF: predicated region fallthrough
CT: control target
= control target key end

     0   :  { %vm40_vm0 = vcmask 261120   ;;  %v371_v33 = vlaneseq  ;;  %v584_v39 = vmov 0.0   ;;  %vm441_vm6 = vcmask 7168   ;;  %s736_s0 = inlined_call_operand.vmem [shape: f32[32,32], index: 0, kind: input, shape index: {}]   ;;  %s737_s1 = inlined_call_operand.vmem [shape: f32[1,32], index: 1, kind: input, shape index: {}]   ;;  %s738_s2 = inlined_call_operand.vmem [shape: f32[32,32], index: 2, kind: input, shape index: {}]   ;;  %s739_s3 = inlined_call_operand.vmem [shape: f32[1,32], index: 3, kind: input, shape index: {}]   ;;  %s740_s4 = inlined_call_operand.vmem [shape: f32[1,32], index: 4, kind: input, shape index: {}]   ;;  %s741_s6 = inlined_call_operand.vmem [shape: f32[32,32], index: 6, kind: output, shape index: {0}]   ;;  %s742_s5 = inlined_call_operand.vmem [shape: f32[32,1], index: 5, kind: input, shape index: {}]   ;;  %s743_s7 = inlined_call_operand.vmem [shape: f32[32,1], index: 7, kind: output, shape index: {1}]  }
   0x1   :  { %v25_v0 = vld [vmem:[%s736_s0] sm:$0xff]  ;;  %v26_v1 = vld [vmem:[%s736_s0 + $0x8] sm:$0xff]  ;;  %vm636_vm1 = vmpackc.low %vm40_vm0, %vm40_vm0 }
   0x2   :  { %v454_v2 = vld [vmem:[%s737_s1] ss:$0 sm:$0xff]  ;;  %v547_v3 = vpack.c.bf16 %v26_v1, %v25_v0  ;;  %v151_v6 = vld [vmem:[%s738_s2 + $0x8] sm:$0xff]  ;;  %v27_v10 = vld [vmem:[%s736_s0 + $0x10] sm:$0xff]  ;;  %v372_v34 = vshrl.u32 %v371_v33, 7  ;;  %v377_v36 = vand.u32 127, %v371_v33 }
   0x3   :  { %v150_v5 = vld [vmem:[%s738_s2] sm:$0xff]  ;;  %v36_v7 = vmul.f32 %v454_v2, %v25_v0  ;;  %v28_v11 = vld [vmem:[%s736_s0 + $0x18] sm:$0xff]  ;;  %v152_v13 = vld [vmem:[%s738_s2 + $0x10] sm:$0xff]  ;;  %v37_v17 = vmul.f32 %v454_v2, %v26_v1  ;;  %v38_v19 = vmul.f32 %v454_v2, %v27_v10 }
   0x4   :  { %v463_v8 = vld [vmem:[%s739_s3] ss:$0 sm:$0xff]  ;;  %v559_v9 = vpack.c.bf16 %v151_v6, %v150_v5  ;;  %549 = vmatprep.subr.msk.bf16.mxu0 %vm636_vm1, %v547_v3  ;;  %v553_v12 = vpack.c.bf16 %v28_v11, %v27_v10  ;;  %v153_v14 = vld [vmem:[%s738_s2 + $0x18] sm:$0xff]  ;;  %v39_v21 = vmul.f32 %v454_v2, %v28_v11  ;;  %v373_v35 = vadd.s32 8, %v372_v34 }
   0x5   :  { %513 = vmatprep.mubr.msk.f32.mxu0 %vm40_vm0, %v36_v7  ;;  %552 = vmatpush3.bf16.xpose.msk.msra.mxu0 %vm636_vm1, %v547_v3  ;;  %v565_v15 = vpack.c.bf16 %v153_v14, %v152_v13  ;;  %v161_v16 = vmul.f32 %v463_v8, %v150_v5  ;;  %v162_v18 = vmul.f32 %v463_v8, %v151_v6  ;;  %v375_v37 = vadd.s32 24, %v372_v34  ;;  %v480_v45 = vld [vmem:[%s740_s4] ss:$0 sm:$0xff]  ;;  %v431_v5 = vld [vmem:[%s742_s5 + $0x10] sm:$0xff]  ;;  %v432_v11 = vld [vmem:[%s742_s5 + $0x18] sm:$0xff] }
   0x6   :  { %561 = vmatprep.subr.msk.bf16.mxu1 %vm636_vm1, %v559_v9  ;;  %555 = vmatprep.subr.msk.bf16.mxu0 %vm636_vm1, %v553_v12  ;;  %v163_v20 = vmul.f32 %v463_v8, %v152_v13  ;;  %v164_v22 = vmul.f32 %v463_v8, %v153_v14  ;;  %v374_v38 = vadd.s32 16, %v372_v34  ;;  %vm379_vm2 = vcmp.eq.s32.totalorder %v373_v35, %v377_v36  ;;  %v429_v6 = vld [vmem:[%s742_s5] sm:$0xff] }
   0x7   :  { %564 = vmatpush3.bf16.xpose.msk.msra.mxu1 %vm636_vm1, %v559_v9  ;;  %527 = vmatprep.mubr.msk.f32.mxu1 %vm40_vm0, %v161_v16  ;;  %vm381_vm3 = vcmp.eq.s32.totalorder %v375_v37, %v377_v36  ;;  %vm378_vm4 = vcmp.eq.s32.totalorder %v372_v34, %v377_v36  ;;  %v477_v40 = vsel %vm379_vm2, 1.0, %v584_v39 }
   0x8   :  { %567 = vmatprep.subr.msk.bf16.mxu1 %vm636_vm1, %v565_v15  ;;  %vm380_vm5 = vcmp.eq.s32.totalorder %v374_v38, %v377_v36  ;;  %v479_v41 = vsel %vm381_vm3, 1.0, %v584_v39  ;;  %v476_v42 = vsel %vm378_vm4, 1.0, %v584_v39  ;;  %v395_v44 = vmul.f32 0.4, %v477_v40 }
   0x9   :  { %v478_v43 = vsel %vm380_vm5, 1.0, %v584_v39  ;;  %v397_v46 = vmul.f32 0.4, %v479_v41  ;;  %v394_v49 = vmul.f32 0.4, %v476_v42 }
   0xa   :  { %v396_v50 = vmul.f32 0.4, %v478_v43 }
   0xd   :  { %558 = vmatpush3.bf16.xpose.msk.msra.mxu0 %vm636_vm1, %v553_v12  ;;  %v430_v12 = vld [vmem:[%s742_s5 + $0x8] sm:$0xff] }
   0xf   :  { %570 = vmatpush3.bf16.xpose.msk.msra.mxu1 %vm636_vm1, %v565_v15 }
  0x14   :  { %514 = vmatmul.mubr.msk.f32.vlgmr.msra.gmra.mrb[0].mxu0 %vm40_vm0, %v37_v17 }
  0x15   :  { %516 = vmatprep.mubr.msk.f32.mxu0 %vm40_vm0, %v38_v19 }
  0x16   :  { %528 = vmatmul.mubr.msk.f32.vlgmr.msra.gmra.mrb[0].mxu1 %vm40_vm0, %v162_v18 }
  0x17   :  { %530 = vmatprep.mubr.msk.f32.mxu1 %vm40_vm0, %v163_v20 }
  0x18   :  { %517 = vmatmul.mubr.msk.f32.gmra.mrb[2].mxu0 %vm40_vm0, %v39_v21 }
  0x1a   :  { %531 = vmatmul.mubr.msk.f32.gmra.mrb[2].mxu1 %vm40_vm0, %v164_v22 }
  0xe7   :  { %v515_v23 = vpop.f32.mrb[0].mxu0 }
  0xe8   :  { %v131_v24 = vpop.f32.mrb[1].mxu0 }
  0xe9   :  { %v529_v25 = vpop.f32.mrb[0].mxu1  ;;  %v571_v26 = vpack.c.bf16 %v515_v23, %v131_v24 }
  0xea   :  { %v255_v27 = vpop.f32.mrb[1].mxu1 }
  0xeb   :  { %541 = vmatprep.mubr.msk.f32.mxu0 %vm40_vm0, %v255_v27  ;;  %v518_v28 = vpop.f32.mrb[2].mxu0  ;;  %572 = vmatprep.subr.bf16.mxu0 %v571_v26 }
  0xec   :  { %579 = vmatprep.subr.bf16.mxu1 %v571_v26  ;;  %v141_v29 = vpop.f32.mrb[3].mxu0  ;;  %574 = vmatpush3.bf16.msra.mxu0 %v571_v26 }
  0xed   :  { %581 = vmatpush3.bf16.msra.mxu1 %v571_v26  ;;  %v532_v30 = vpop.f32.mrb[2].mxu1  ;;  %v575_v31 = vpack.c.bf16 %v518_v28, %v141_v29 }
  0xee   :  { %v265_v32 = vpop.f32.mrb[3].mxu1 }
  0xef   :  { %544 = vmatprep.mubr.msk.f32.mxu1 %vm40_vm0, %v265_v32  ;;  %576 = vmatprep.subr.bf16.mxu0 %v575_v31 }
  0xf0   :  { %580 = vmatprep.subr.bf16.mxu1 %v575_v31  ;;  %578 = vmatpush3.bf16.msra.mxu0 %v575_v31 }
  0xf1   :  { %582 = vmatpush3.bf16.msra.mxu1 %v575_v31 }
  0xf3   :  { %542 = vmatmul.mubr.msk.f32.vlgmr.msra.gmra.mrb[4].mxu0 %vm40_vm0, %v529_v25 }
  0xf4   :  { %545 = vmatmul.mubr.msk.f32.vlgmr.msra.gmra.mrb[4].mxu1 %vm40_vm0, %v532_v30 }
 0x1c6   :  { %v543_v47 = vpop.f32.mrb[4].mxu0 }
 0x1c7   :  { %v546_v48 = vpop.f32.mrb[4].mxu1  ;;  %v391_v51 = vmul.f32 0.6, %v543_v47  ;;  %v352_v53 = vpop.f32.mrb[5].mxu0  ;;  %v414_v60 = vmul.f32 %v543_v47, %v480_v45 }
 0x1c8   :  { %v393_v52 = vmul.f32 0.6, %v546_v48  ;;  %v362_v54 = vpop.f32.mrb[5].mxu1  ;;  %v390_v55 = vmul.f32 0.6, %v352_v53  ;;  %v413_v56 = vmul.f32 %v480_v45, %v352_v53  ;;  %v416_v62 = vmul.f32 %v546_v48, %v480_v45 }
 0x1c9   :  { %v392_v57 = vmul.f32 0.6, %v362_v54  ;;  %v415_v58 = vmul.f32 %v480_v45, %v362_v54  ;;  %v399_v59 = vadd.f32 %v395_v44, %v391_v51  ;;  %v420_v4 = vsel %vm40_vm0, %v414_v60, 0.0 }
 0x1ca   :  { %v401_v61 = vadd.f32 %v397_v46, %v393_v52  ;;  %v398_v63 = vadd.f32 %v394_v49, %v390_v55  ;;  %v417_v2 = vsel %vm40_vm0, %v413_v56, 0.0  ;;  %v426_v3 = vsel %vm40_vm0, %v416_v62, 0.0 }
 0x1cb   :  { %v400_v0 = vadd.f32 %v396_v50, %v392_v57  ;;  %v423_v1 = vsel %vm40_vm0, %v415_v58, 0.0  ;;  %403 = vst.msk [vmem:[%s741_s6 + $0x8] sm:$0xff] %vm40_vm0, %v399_v59  ;;  %418 = vadd.xlane.f32.xlu0 %v417_v2 }
 0x1cc   :  { %405 = vst.msk [vmem:[%s741_s6 + $0x18] sm:$0xff] %vm40_vm0, %v401_v61  ;;  %424 = vadd.xlane.f32.xlu1 %v423_v1  ;;  %402 = vst.msk [vmem:[%s741_s6] sm:$0xff] %vm40_vm0, %v398_v63 }
 0x1cd   :  { %404 = vst.msk [vmem:[%s741_s6 + $0x10] sm:$0xff] %vm40_vm0, %v400_v0 }
 0x1cf   :  { %421 = vadd.xlane.f32.xlu0 %v420_v4 }
 0x1d0   :  { %427 = vadd.xlane.f32.xlu1 %v426_v3 }
 0x258   :  { %v419_v8 = vpop.xlane.xlu0 %418 }
 0x259   :  { %v425_v7 = vpop.xlane.xlu1 %424  ;;  %v433_v10 = vsub.f32 %v429_v6, %v419_v8 }
 0x25a   :  { %v435_v9 = vsub.f32 %v431_v5, %v425_v7 }
 0x25b   :  { %v437_v14 = vmul.f32 0.6, %v433_v10 }
 0x25c   :  { %v439_v13 = vmul.f32 0.6, %v435_v9  ;;  %v422_v16 = vpop.xlane.xlu0 %421 }
 0x25d   :  { %v428_v15 = vpop.xlane.xlu1 %427  ;;  %442 = vst.msk [vmem:[%s743_s7] sm:$0xff] %vm441_vm6, %v437_v14  ;;  %v434_v18 = vsub.f32 %v430_v12, %v422_v16 }
 0x25e   :  { %444 = vst.msk [vmem:[%s743_s7 + $0x10] sm:$0xff] %vm441_vm6, %v439_v13  ;;  %v436_v17 = vsub.f32 %v432_v11, %v428_v15 }
 0x25f   :  { %v438_v20 = vmul.f32 0.6, %v434_v18 }
 0x260   :  { %v440_v19 = vmul.f32 0.6, %v436_v17 }
 0x261   :  { %443 = vst.msk [vmem:[%s743_s7 + $0x8] sm:$0xff] %vm441_vm6, %v438_v20 }
 0x262   :  { %445 = vst.msk [vmem:[%s743_s7 + $0x18] sm:$0xff] %vm441_vm6, %v440_v19 }

// kernel: wct_forward.11
= control target key start
LH: loop header
LB: loop body
LE: loop exit
PB: predicated region body
PF: predicated region fallthrough
CT: control target
= control target key end

     0   :  { %s1661_s18 = smov 0   ;;  %s1663_s19 = smov 0   ;;  %s1949_s0 = inlined_call_operand.vmem [shape: bf16[9,16,32], index: 0, kind: input, shape index: {}]   ;;  %s1950_s1 = inlined_call_operand.vmem [shape: f32[16,1], index: 1, kind: input, shape index: {}]   ;;  %s1951_s2 = inlined_call_operand.vmem [shape: bf16[32,512], index: 2, kind: input, shape index: {}, may-alias: {2,3,4}]   ;;  %s1952_s3 = inlined_call_operand.vmem [shape: bf16[32,512], index: 3, kind: input, shape index: {}, may-alias: {2,3,4}]   ;;  %s1953_s4 = inlined_call_operand.vmem [shape: bf16[32,512], index: 4, kind: input, shape index: {}, may-alias: {2,3,4}]   ;;  %s1954_s5 = inlined_call_operand.vmem [shape: f32[16,512], index: 5, kind: output, shape index: {}]  }
   0x1   :  { %s1665_s20 = smov 0   ;;  %s1667_s21 = smov 0  }
   0x2   :  { %s1669_s22 = smov 0   ;;  %s1671_s23 = smov 0  }
   0x3   :  { %s1673_s24 = smov 0  }
   0x4 LB: > { %s1697_s25 = sadd.s32 1, %s1619_s24   ;;  %s1364_s26 = sshll.u32 %s1619_s24, 1  ;;  %s1619_s24 = sphi %s1673_s24, %s1969_s24   ;;  %s1615_s23 = sphi %s1671_s23, %s1968_s23   ;;  %s1611_s22 = sphi %s1669_s22, %s1967_s22   ;;  %s1607_s21 = sphi %s1667_s21, %s1966_s21   ;;  %s1603_s20 = sphi %s1665_s20, %s1965_s20   ;;  %s1599_s19 = sphi %s1663_s19, %s1964_s19   ;;  %s1595_s18 = sphi %s1661_s18, %s1963_s18  }
   0x5   : > { %s72_s27 = sadd.s32 1, %s1615_s23  ;;  %s1365_s28 = sadd.s32 4294967295, %s1364_s26 }
   0x6   : > { %s1435_s29 = sadd.s32 2, %s1364_s26  ;;  %p63_p0 = scmp.gt.s32.totalorder %s1365_s28, 0 }
   0x7   : > { %s1367_s30 = sadd.s32 4294967295, %s1435_s29  ;;  %p79_p2 = scmp.ne.s32.totalorder %s1615_s23, %s1611_s22 }
   0x8   : > { %p67_p1 = scmp.gt.s32.totalorder %s1367_s30, 0  ;;  %s1971_s28 = smov (!%p63_p0, %s1365_s28), 0 }
   0x9   : > { %p80_p3 = scmp.eq.s32.totalorder %s1619_s24, 0  ;;  %s95_s6 = ssub.s32 %s1619_s24, %s1697_s25 }
   0xa   : > { %s1973_s30 = smov (!%p67_p1, %s1367_s30), 0  ;;  %p96_p4 = scmp.eq.s32.totalorder %s95_s6, 0 }
   0xb   : > { %s69_s7 = ssub.s32 %s1971_s28, %s1973_s30  ;;  %p1711_p6 = por %p80_p3, %p79_p2 }
   0xc   : > { %p70_p5 = scmp.eq.s32.totalorder %s69_s7, 0  ;;  %s98_s9 = sadd.s32 1, %s1607_s21 }
   0xd   : > { %p105_p7 = scmp.ne.s32.totalorder %s1607_s21, %s1603_s20  ;;  %p123_p9 = scmp.lt.s32.totalorder %s1435_s29, 3 }
   0xe   : > { %s1719_s10 = scalar_select %p70_p5, %s1615_s23, %s72_s27  }
   0xf   : > { %s1722_s11 = scalar_select %p96_p4, %s1607_s21, %s98_s9  }
  0x10   : > { %1957 = sst [smem:[#allocation6_spill]] %s1719_s10  ;;  %p1729_p8 = por %p105_p7, %p80_p3 }
  0x11   : > { %s1955_s13 = sadd.s32 4294967295, %s1619_s24   ;;  %s1439_s14 = sadd.s32 2, %s1435_s29 }
  0x12   : > { %s1975_s29 = smov (!%p123_p9, %s1435_s29), 3  ;;  %p127_p10 = scmp.lt.s32.totalorder %s1439_s14, 3 }
  0x13   : > { %p139_p11 = scmp.ne.s32.totalorder %s1599_s19, %s1595_s18  ;;  %p169_p12 = scmp.eq.s32.totalorder %s1955_s13, 1 }
  0x14   : > { %s1977_s14 = smov (!%p127_p10, %s1439_s14), 3  ;;  %s132_s26 = sadd.s32 1, %s1599_s19 }
  0x15   : > { %p1742_p13 = por %p139_p11, %p80_p3  ;;  %p1749_p0 = por %p169_p12, %p105_p7 }
  0x16   : > { %s129_s17 = ssub.s32 %s1975_s29, %s1977_s14  ;;  %p1371_p2 = scmp.ge.s32.totalorder %s1619_s24, 2 }
  0x17   : > { %p130_p1 = scmp.eq.s32.totalorder %s129_s17, 0 }
  0x18   : > { %197 = sbr.rel (%p1371_p2) target bundleno = 52 (0x34), region = 24 }
  0x19   : > { %s1756_s27 = scalar_select %p130_p1, %s1599_s19, %s132_s26  }
  0x1f   : > { %200 = sbr.rel (!%p1711_p6) target bundleno = 38 (0x26), region = 28  ;;  %s202_s30 = sand.u32 (%p1711_p6), 1, %s1615_s23  }
  0x20   : > { %s1375_s6 = sshll.u32 (%p1711_p6), %s1971_s28, 2  ;;  %s1372_s7 = sshll.u32 (%p1711_p6), %s202_s30, 4 }
  0x21   : > { %s210_s10 = scalar_lea.vmem (%p1711_p6), %s1951_s2, %s1375_s6  ;;  %s204_s14 = scalar_lea.vmem (%p1711_p6), [#allocation2], %s1372_s7 }
  0x22   : > { %v226_v0 = vld [vmem:[%s210_s10] sm:$0xf] (%p1711_p6)  ;;  %v228_v1 = vld [vmem:[%s210_s10 + $0x10] sm:$0xf] (%p1711_p6) }
  0x23   : > { %227 = vst [vmem:[%s204_s14] sm:$0xf] (%p1711_p6), %v226_v0  ;;  %229 = vst [vmem:[%s204_s14 + $0x4] sm:$0xf] (%p1711_p6), %v228_v1  ;;  %v230_v2 = vld [vmem:[%s210_s10 + $0x20] sm:$0xf] (%p1711_p6) }
  0x24   : > { %v232_v3 = vld [vmem:[%s210_s10 + $0x30] sm:$0xf] (%p1711_p6)  ;;  %231 = vst [vmem:[%s204_s14 + $0x8] sm:$0xf] (%p1711_p6), %v230_v2 }
  0x25   : > { %233 = vst [vmem:[%s204_s14 + $0xc] sm:$0xf] (%p1711_p6), %v232_v3 }
  0x26 PF: > { %264 = sbr.rel (!%p1729_p8) target bundleno = 45 (0x2d), region = 69  ;;  %s266_s28 = sand.u32 (%p1729_p8), 1, %s1607_s21  }
  0x27   : > { %s1440_s8 = sshll.u32 (%p1729_p8), %s1619_s24, 3  ;;  %s1376_s17 = sshll.u32 (%p1729_p8), %s266_s28, 5 }
  0x28   : > { %s271_s30 = scalar_lea.vmem (%p1729_p8), %s1952_s3, %s1440_s8  ;;  %s268_s6 = scalar_lea.vmem (%p1729_p8), [#allocation3], %s1376_s17 }
  0x29   : > { %v305_v4 = vld [vmem:[%s271_s30] sm:$0xff] (%p1729_p8)  ;;  %v307_v5 = vld [vmem:[%s271_s30 + $0x10] sm:$0xff] (%p1729_p8) }
  0x2a   : > { %v309_v6 = vld [vmem:[%s271_s30 + $0x20] sm:$0xff] (%p1729_p8)  ;;  %306 = vst [vmem:[%s268_s6] sm:$0xff] (%p1729_p8), %v305_v4  ;;  %308 = vst [vmem:[%s268_s6 + $0x8] sm:$0xff] (%p1729_p8), %v307_v5  ;;  %v311_v7 = vld [vmem:[%s271_s30 + $0x30] sm:$0xff] (%p1729_p8) }
  0x2b   : > { %310 = vst [vmem:[%s268_s6 + $0x10] sm:$0xff] (%p1729_p8), %v309_v6  ;;  %312 = vst [vmem:[%s268_s6 + $0x18] sm:$0xff] (%p1729_p8), %v311_v7 }
  0x2d PF: > { %318 = sbr.rel (!%p1742_p13) target bundleno = 52 (0x34), region = 107  ;;  %s320_s10 = sand.u32 (%p1742_p13), 1, %s1599_s19  }
  0x2e   : > { %s1381_s12 = sshll.u32 (%p1742_p13), %s1975_s29, 2  ;;  %s1379_s7 = sshll.u32 (%p1742_p13), %s320_s10, 4 }
  0x2f   : > { %s328_s28 = scalar_lea.vmem (%p1742_p13), %s1953_s4, %s1381_s12  ;;  %s322_s8 = scalar_lea.vmem (%p1742_p13), [#allocation4], %s1379_s7 }
  0x30   : > { %v344_v8 = vld [vmem:[%s328_s28] sm:$0xf] (%p1742_p13)  ;;  %v346_v9 = vld [vmem:[%s328_s28 + $0x10] sm:$0xf] (%p1742_p13) }
  0x31   : > { %345 = vst [vmem:[%s322_s8] sm:$0xf] (%p1742_p13), %v344_v8  ;;  %347 = vst [vmem:[%s322_s8 + $0x4] sm:$0xf] (%p1742_p13), %v346_v9  ;;  %v348_v10 = vld [vmem:[%s328_s28 + $0x20] sm:$0xf] (%p1742_p13) }
  0x32   : > { %v350_v11 = vld [vmem:[%s328_s28 + $0x30] sm:$0xf] (%p1742_p13)  ;;  %349 = vst [vmem:[%s322_s8 + $0x8] sm:$0xf] (%p1742_p13), %v348_v10 }
  0x33   : > { %351 = vst [vmem:[%s322_s8 + $0xc] sm:$0xf] (%p1742_p13), %v350_v11 }
  0x34 PF: > { %p1382_p3 = scmp.ge.s32.totalorder %s1619_s24, 1  ;;  %p381_p4 = scmp.lt.s32.totalorder %s1619_s24, 3 }
  0x36   : > { %p382_p5 = pnand %p1382_p3, %p381_p4 }
  0x37   : > { %s402_s29 = sand.u32 (!%p382_p5), 1, %s1595_s18   ;;  %s395_s17 = sand.u32 (!%p382_p5), 1, %s1603_s20   ;;  %vm497_vm0 = vcmask (!%p382_p5), 154624   ;;  %v1623_v34 = vmov (!%p382_p5), 0   ;;  %v1217_v35 = vld [vmem:[%s1950_s1] sm:$0xff] (!%p382_p5)  ;;  %v1218_v36 = vld [vmem:[%s1950_s1 + $0x8] sm:$0xff] (!%p382_p5) }
  0x38   : > { %385 = sbr.rel (%p382_p5) target bundleno = 619 (0x26b), region = 148  ;;  %s1385_s15 = sshll.u32 (!%p382_p5), %s402_s29, 4  ;;  %886 = vmatprep.mubr.bf16.mxu0 (!%p382_p5), %v1623_v34  ;;  %602 = vmatprep.mubr.bf16.mxu1 (!%p382_p5), %v1623_v34  ;;  %vm842_vm1 = vcmask (!%p382_p5), 891904   ;;  %vm557_vm2 = vcmask (!%p382_p5), 1039360   ;;  %v1556_v47 = vld [vmem:[%s1949_s0 + $0x20] sm:$0xff] (!%p382_p5)   ;;  %vm566_vm3 = vcmask (!%p382_p5), 261120  }
  0x39   : > { %s1784_s13 = sshll.u32 (!%p382_p5), %s395_s17, 5  ;;  %s404_s26 = scalar_lea.vmem (!%p382_p5), [#allocation4], %s1385_s15  ;;  %1544 = vset.pattern.permute.xlu0 (!%p382_p5), %v1623_v34  ;;  %1545 = vset.pattern.permute.xlu1 (!%p382_p5), %v1623_v34  ;;  %vm921_vm4 = vcmask (!%p382_p5), 883712   ;;  %v1557_v4 = vld [vmem:[%s1949_s0 + $0x8] sm:$0xff] (!%p382_p5)   ;;  %vm1000_vm5 = vcmask (!%p382_p5), 752640   ;;  %vm684_vm6 = vcmask (!%p382_p5), 1031168  }
  0x3a   : > { %v1546_v12 = vld [vmem:[%s404_s26] sm:$0xff] (!%p382_p5)   ;;  %s397_s30 = scalar_lea.vmem (!%p382_p5), [#allocation3], %s1784_s13  ;;  %s388_s6 = sand.u32 (!%p382_p5), 1, %s1611_s22   ;;  %v1554_v19 = vld [vmem:[%s404_s26 + $0x8] sm:$0xff] (!%p382_p5)   ;;  %vm1079_vm7 = vcmask (!%p382_p5), 744448   ;;  %vm763_vm8 = vcmask (!%p382_p5), 900096  }
  0x3b   : > { %v1547_v13 = vld [vmem:[%s397_s30] ss:$8 sps:$4 sm:$0xff] (!%p382_p5)   ;;  %s1621_s10 = smov (!%p382_p5), 19   ;;  %s1383_s12 = sshll.u32 (!%p382_p5), %s388_s6, 4  ;;  %v1549_v14 = vld [vmem:[%s397_s30 + $0x4] ss:$8 sps:$4 sm:$0xff] (!%p382_p5)  }
  0x3c   : > { %512 = vrot.lane.b32.xlu1 (!%p382_p5), %v1546_v12, %s1621_s10  ;;  %489 = vrot.lane.b32.xlu0 (!%p382_p5), %v1547_v13, %s1621_s10  ;;  %s390_s7 = scalar_lea.vmem (!%p382_p5), [#allocation2], %s1383_s12  ;;  %v1553_v16 = vld [vmem:[%s397_s30 + $0x14] ss:$8 sps:$4 sm:$0xff] (!%p382_p5)   ;;  %v1551_v17 = vld [vmem:[%s397_s30 + $0x10] ss:$8 sps:$4 sm:$0xff] (!%p382_p5)   ;;  %s1622_s18 = smov (!%p382_p5), 109  }
  0x3d   : > { %v1550_v15 = vld [vmem:[%s390_s7] sm:$0xff] (!%p382_p5)   ;;  %v1555_v18 = vld [vmem:[%s390_s7 + $0x8] sm:$0xff] (!%p382_p5)   ;;  %s1624_s20 = smov (!%p382_p5), 127   ;;  %s1625_s22 = smov (!%p382_p5), 108   ;;  %vm1158_vm9 = vcmask (!%p382_p5), 736256  }
  0x3e   : > { %s1626_s9 = smov (!%p382_p5), 92   ;;  %s1627_s14 = smov (!%p382_p5), 126   ;;  %v1558_v5 = vld [vmem:[%s1949_s0 + $0x28] sm:$0xff] (!%p382_p5)  }
  0x3f   : > { %s1628_s28 = smov 91   ;;  %s1629_s8 = smov 110  }
  0x40   : > { %469 = vrot.lane.b32.xlu1 %v1550_v15, %s1621_s10  ;;  %491 = vrot.lane.b32.xlu0 %v1549_v14, %s1621_s10  ;;  %s1630_s29 = smov 90   ;;  %s435_s12 = scalar_lea.vmem [#allocation5], %s1784_s13 }
  0x41   : > { %s1961_s7 = sadd.s32 (%p1749_p0), 4294967295, %s1619_s24  }
  0x44   : > { %495 = vrot.lane.b32.xlu1 %v1553_v16, %s1621_s10  ;;  %493 = vrot.lane.b32.xlu0 %v1551_v17, %s1621_s10  ;;  %v1559_v16 = vld [vmem:[%s1949_s0] sm:$0xff]   ;;  %v1560_v17 = vld [vmem:[%s1949_s0 + $0x30] sm:$0xff]  }
  0x48   : > { %471 = vrot.lane.b32.xlu1 %v1555_v18, %s1621_s10  ;;  %514 = vrot.lane.b32.xlu0 %v1554_v19, %s1621_s10 }
  0xae   : > { %v513_v20 = vpop.permute.xlu1 %512  ;;  %v490_v21 = vpop.permute.xlu0 %489 }
  0xb2   : > { %v470_v22 = vpop.permute.xlu1 %469  ;;  %v492_v23 = vpop.permute.xlu0 %491 }
  0xb3   : > { %v1789_v24 = vsel %vm497_vm0, %v490_v21, %v492_v23  ;;  %v527_v25 = vsel %vm497_vm0, %v492_v23, %v513_v20  ;;  %v1794_v28 = vsel %vm497_vm0, %v470_v22, %v490_v21 }
  0xb4   : > { %832 = vrot.lane.b32.xlu0 %v1789_v24, %s1622_s18  ;;  %834 = vrot.lane.b32.xlu1 %v527_v25, %s1622_s18 }
  0xb6   : > { %v496_v26 = vpop.permute.xlu1 %495  ;;  %v494_v27 = vpop.permute.xlu0 %493 }
  0xb7   : > { %v1797_v29 = vsel %vm497_vm0, %v494_v27, %v496_v26 }
  0xb8   : > { %830 = vrot.lane.b32.xlu0 %v1794_v28, %s1622_s18  ;;  %838 = vrot.lane.b32.xlu1 %v1797_v29, %s1622_s18 }
  0xba   : > { %v472_v30 = vpop.permute.xlu1 %471  ;;  %v515_v31 = vpop.permute.xlu0 %514 }
  0xbb   : > { %v1802_v32 = vsel %vm497_vm0, %v472_v30, %v494_v27  ;;  %v530_v33 = vsel %vm497_vm0, %v496_v26, %v515_v31 }
  0xbc   : > { %840 = vrot.lane.b32.xlu0 %v530_v33, %s1622_s18  ;;  %836 = vrot.lane.b32.xlu1 %v1802_v32, %s1622_s18  ;;  %s1443_s18 = sshll.u32 (%p1749_p0), %s1961_s7, 4 }
  0xc0   : > { %547 = vrot.lane.b32.xlu0 %v1789_v24, %s1624_s20  ;;  %549 = vrot.lane.b32.xlu1 %v527_v25, %s1624_s20 }
  0xc4   : > { %911 = vrot.lane.b32.xlu0 %v1789_v24, %s1625_s22  ;;  %913 = vrot.lane.b32.xlu1 %v527_v25, %s1625_s22 }
  0xc8   : > { %545 = vrot.lane.b32.xlu0 %v1794_v28, %s1624_s20  ;;  %909 = vrot.lane.b32.xlu1 %v1794_v28, %s1625_s22 }
  0xcc   : > { %553 = vrot.lane.b32.xlu0 %v1797_v29, %s1624_s20  ;;  %555 = vrot.lane.b32.xlu1 %v530_v33, %s1624_s20 }
  0xd0   : > { %917 = vrot.lane.b32.xlu0 %v1797_v29, %s1625_s22  ;;  %919 = vrot.lane.b32.xlu1 %v530_v33, %s1625_s22 }
  0xd4   : > { %551 = vrot.lane.b32.xlu0 %v1802_v32, %s1624_s20  ;;  %915 = vrot.lane.b32.xlu1 %v1802_v32, %s1625_s22 }
  0xd8   : > { %990 = vrot.lane.b32.xlu0 %v1789_v24, %s1626_s9  ;;  %992 = vrot.lane.b32.xlu1 %v527_v25, %s1626_s9 }
  0xdc   : > { %988 = vrot.lane.b32.xlu0 %v1794_v28, %s1626_s9  ;;  %996 = vrot.lane.b32.xlu1 %v1797_v29, %s1626_s9 }
  0xe0   : > { %998 = vrot.lane.b32.xlu0 %v530_v33, %s1626_s9  ;;  %994 = vrot.lane.b32.xlu1 %v1802_v32, %s1626_s9  ;;  %s1246_s9 = scalar_lea.vmem (%p1749_p0), %s1954_s5, %s1443_s18 }
  0xe4   : > { %674 = vrot.lane.b32.xlu0 %v1789_v24, %s1627_s14  ;;  %676 = vrot.lane.b32.xlu1 %v527_v25, %s1627_s14 }
  0xe8   : > { %1069 = vrot.lane.b32.xlu0 %v1789_v24, %s1628_s28  ;;  %1071 = vrot.lane.b32.xlu1 %v527_v25, %s1628_s28 }
  0xec   : > { %672 = vrot.lane.b32.xlu0 %v1794_v28, %s1627_s14  ;;  %1067 = vrot.lane.b32.xlu1 %v1794_v28, %s1628_s28 }
  0xf0   : > { %680 = vrot.lane.b32.xlu0 %v1797_v29, %s1627_s14  ;;  %682 = vrot.lane.b32.xlu1 %v530_v33, %s1627_s14 }
  0xf4   : > { %1075 = vrot.lane.b32.xlu0 %v1797_v29, %s1628_s28  ;;  %1077 = vrot.lane.b32.xlu1 %v530_v33, %s1628_s28 }
  0xf8   : > { %678 = vrot.lane.b32.xlu0 %v1802_v32, %s1627_s14  ;;  %1073 = vrot.lane.b32.xlu1 %v1802_v32, %s1628_s28 }
  0xfc   : > { %753 = vrot.lane.b32.xlu0 %v1789_v24, %s1629_s8  ;;  %755 = vrot.lane.b32.xlu1 %v527_v25, %s1629_s8 }
 0x100   : > { %1148 = vrot.lane.b32.xlu0 %v1789_v24, %s1630_s29  ;;  %1150 = vrot.lane.b32.xlu1 %v527_v25, %s1630_s29 }
 0x104   : > { %751 = vrot.lane.b32.xlu0 %v1794_v28, %s1629_s8  ;;  %1146 = vrot.lane.b32.xlu1 %v1794_v28, %s1630_s29 }
 0x108   : > { %759 = vrot.lane.b32.xlu0 %v1797_v29, %s1629_s8  ;;  %761 = vrot.lane.b32.xlu1 %v530_v33, %s1629_s8 }
 0x10c   : > { %1154 = vrot.lane.b32.xlu0 %v1797_v29, %s1630_s29  ;;  %1156 = vrot.lane.b32.xlu1 %v530_v33, %s1630_s29 }
 0x110   : > { %757 = vrot.lane.b32.xlu0 %v1802_v32, %s1629_s8  ;;  %1152 = vrot.lane.b32.xlu1 %v1802_v32, %s1630_s29 }
 0x114   : > { %1221 = vperm.xlu0 %1544, %v1217_v35   ;;  %1226 = vperm.xlu1 %1545, %v1218_v36  }
 0x126   : > { %v833_v37 = vpop.permute.xlu0 %832  ;;  %v835_v38 = vpop.permute.xlu1 %834 }
 0x127   : > { %v844_v39 = vsel %vm842_vm1, %v833_v37, %v835_v38 }
 0x128   : > { %854 = vmatprep.subr.bf16.mxu0 %v844_v39  ;;  %v1561_v39 = vld [vmem:[%s1949_s0 + $0x10] sm:$0xff]  }
 0x12a   : > { %v831_v40 = vpop.permute.xlu0 %830  ;;  %v839_v41 = vpop.permute.xlu1 %838 }
 0x12b   : > { %v843_v42 = vsel %vm842_vm1, %v831_v40, %v833_v37  ;;  %v1562_v40 = vld [vmem:[%s1949_s0 + $0x38] sm:$0xff]  }
 0x12c   : > { %855 = vmatpush1.bf16.msra.mxu0 %v843_v42 }
 0x12e   : > { %v841_v43 = vpop.permute.xlu0 %840  ;;  %v837_v44 = vpop.permute.xlu1 %836 }
 0x12f   : > { %v846_v45 = vsel %vm842_vm1, %v839_v41, %v841_v43  ;;  %v845_v46 = vsel %vm842_vm1, %v837_v44, %v839_v41 }
 0x130   : > { %856 = vmatprep.subr.bf16.mxu0 %v846_v45 }
 0x131   : > { %857 = vmatpush1.bf16.msra.mxu0 %v845_v46 }
 0x132   : > { %v548_v48 = vpop.permute.xlu0 %547  ;;  %v550_v49 = vpop.permute.xlu1 %549 }
 0x133   : > { %v559_v50 = vsel %vm557_vm2, %v548_v48, %v550_v49 }
 0x134   : > { %570 = vmatprep.subr.bf16.mxu1 %v559_v50  ;;  %1412 = vmatmul.mubr.msk.bf16.vlgmr.msra.gmra.mrb[0].mxu0 %vm566_vm3, %v1556_v47 }
 0x135   : > { %965 = vmatprep.mubr.bf16.mxu0 %v1623_v34 }
 0x136   : > { %v912_v51 = vpop.permute.xlu0 %911  ;;  %v914_v52 = vpop.permute.xlu1 %913 }
 0x137   : > { %v923_v53 = vsel %vm921_vm4, %v912_v51, %v914_v52 }
 0x138   : > { %933 = vmatprep.subr.bf16.mxu0 %v923_v53 }
 0x13a   : > { %v546_v54 = vpop.permute.xlu0 %545  ;;  %v910_v55 = vpop.permute.xlu1 %909 }
 0x13b   : > { %v922_v56 = vsel %vm921_vm4, %v910_v55, %v912_v51  ;;  %v558_v57 = vsel %vm557_vm2, %v546_v54, %v548_v48 }
 0x13c   : > { %571 = vmatpush1.bf16.msra.mxu1 %v558_v57  ;;  %934 = vmatpush1.bf16.msra.mxu0 %v922_v56 }
 0x13e   : > { %v554_v58 = vpop.permute.xlu0 %553  ;;  %v556_v59 = vpop.permute.xlu1 %555 }
 0x13f   : > { %v561_v60 = vsel %vm557_vm2, %v554_v58, %v556_v59 }
 0x140   : > { %572 = vmatprep.subr.bf16.mxu1 %v561_v60  ;;  %v1563_v60 = vld [vmem:[%s1949_s0 + $0x18] sm:$0xff]  }
 0x142   : > { %v918_v61 = vpop.permute.xlu0 %917  ;;  %v920_v62 = vpop.permute.xlu1 %919 }
 0x143   : > { %v925_v63 = vsel %vm921_vm4, %v918_v61, %v920_v62 }
 0x144   : > { %935 = vmatprep.subr.bf16.mxu0 %v925_v63 }
 0x146   : > { %v552_v0 = vpop.permute.xlu0 %551  ;;  %v916_v1 = vpop.permute.xlu1 %915 }
 0x147   : > { %v924_v2 = vsel %vm921_vm4, %v916_v1, %v918_v61  ;;  %v560_v3 = vsel %vm557_vm2, %v552_v0, %v554_v58  ;;  %v1564_v61 = vld [vmem:[%s1949_s0 + $0x40] sm:$0xff]  }
 0x148   : > { %573 = vmatpush1.bf16.msra.mxu1 %v560_v3  ;;  %936 = vmatpush1.bf16.msra.mxu0 %v924_v2 }
 0x149   : > { %621 = vmatprep.subr.bf16.mxu1 %v1789_v24 }
 0x14a   : > { %v991_v6 = vpop.permute.xlu0 %990  ;;  %v993_v7 = vpop.permute.xlu1 %992 }
 0x14b   : > { %1398 = vmatmul.mubr.msk.bf16.vlgmr.msra.gmra.mrb[0].mxu1 %vm566_vm3, %v1557_v4  ;;  %v1002_v8 = vsel %vm1000_vm5, %v991_v6, %v993_v7  ;;  %1416 = vmatmul.mubr.msk.bf16.vlgmr.msra.gmra.mrb[0].mxu0 %vm566_vm3, %v1558_v5 }
 0x14c   : > { %622 = vmatpush1.bf16.msra.mxu1 %v1794_v28  ;;  %1012 = vmatprep.subr.bf16.mxu0 %v1002_v8 }
 0x14d   : > { %623 = vmatprep.subr.bf16.mxu1 %v1797_v29  ;;  %653 = vmatprep.mubr.bf16.mxu1 %v1623_v34 }
 0x14e   : > { %v989_v9 = vpop.permute.xlu0 %988  ;;  %v997_v10 = vpop.permute.xlu1 %996  ;;  %1044 = vmatprep.mubr.bf16.mxu0 %v1623_v34 }
 0x14f   : > { %v1001_v11 = vsel %vm1000_vm5, %v989_v9, %v991_v6 }
 0x150   : > { %624 = vmatpush1.bf16.msra.mxu1 %v1802_v32  ;;  %1013 = vmatpush1.bf16.msra.mxu0 %v1001_v11 }
 0x152   : > { %v999_v12 = vpop.permute.xlu0 %998  ;;  %v995_v13 = vpop.permute.xlu1 %994 }
 0x153   : > { %v1003_v14 = vsel %vm1000_vm5, %v995_v13, %v997_v10  ;;  %v1004_v15 = vsel %vm1000_vm5, %v997_v10, %v999_v12 }
 0x154   : > { %1014 = vmatprep.subr.bf16.mxu0 %v1004_v15 }
 0x155   : > { %1015 = vmatpush1.bf16.msra.mxu0 %v1003_v14 }
 0x156   : > { %v675_v18 = vpop.permute.xlu0 %674  ;;  %v677_v19 = vpop.permute.xlu1 %676 }
 0x157   : > { %v686_v20 = vsel %vm684_vm6, %v675_v18, %v677_v19  ;;  %1400 = vmatmul.mubr.msk.bf16.vlgmr.msra.gmra.mrb[0].mxu1 %vm566_vm3, %v1559_v16 }
 0x158   : > { %696 = vmatprep.subr.bf16.mxu1 %v686_v20  ;;  %1420 = vmatmul.mubr.msk.bf16.vlgmr.msra.gmra.mrb[0].mxu0 %vm566_vm3, %v1560_v17 }
 0x159   : > { %728 = vmatprep.mubr.bf16.mxu1 %v1623_v34  ;;  %1123 = vmatprep.mubr.bf16.mxu0 %v1623_v34 }
 0x15a   : > { %v1070_v21 = vpop.permute.xlu0 %1069  ;;  %v1072_v22 = vpop.permute.xlu1 %1071 }
 0x15b   : > { %v1081_v23 = vsel %vm1079_vm7, %v1070_v21, %v1072_v22 }
 0x15c   : > { %1091 = vmatprep.subr.bf16.mxu0 %v1081_v23 }
 0x15e   : > { %v673_v24 = vpop.permute.xlu0 %672  ;;  %v1068_v25 = vpop.permute.xlu1 %1067 }
 0x15f   : > { %v685_v26 = vsel %vm684_vm6, %v673_v24, %v675_v18  ;;  %v1080_v27 = vsel %vm1079_vm7, %v1068_v25, %v1070_v21 }
 0x160   : > { %697 = vmatpush1.bf16.msra.mxu1 %v685_v26  ;;  %1092 = vmatpush1.bf16.msra.mxu0 %v1080_v27 }
 0x162   : > { %v681_v28 = vpop.permute.xlu0 %680  ;;  %v683_v29 = vpop.permute.xlu1 %682 }
 0x163   : > { %v688_v30 = vsel %vm684_vm6, %v681_v28, %v683_v29 }
 0x164   : > { %698 = vmatprep.subr.bf16.mxu1 %v688_v30 }
 0x166   : > { %v1076_v31 = vpop.permute.xlu0 %1075  ;;  %v1078_v32 = vpop.permute.xlu1 %1077 }
 0x167   : > { %v1083_v33 = vsel %vm1079_vm7, %v1076_v31, %v1078_v32 }
 0x168   : > { %1093 = vmatprep.subr.bf16.mxu0 %v1083_v33 }
 0x16a   : > { %v679_v35 = vpop.permute.xlu0 %678  ;;  %v1074_v36 = vpop.permute.xlu1 %1073 }
 0x16b   : > { %v687_v37 = vsel %vm684_vm6, %v679_v35, %v681_v28  ;;  %v1082_v38 = vsel %vm1079_vm7, %v1074_v36, %v1076_v31 }
 0x16c   : > { %699 = vmatpush1.bf16.msra.mxu1 %v687_v37  ;;  %1094 = vmatpush1.bf16.msra.mxu0 %v1082_v38 }
 0x16e   : > { %v754_v41 = vpop.permute.xlu0 %753  ;;  %v756_v42 = vpop.permute.xlu1 %755 }
 0x16f   : > { %v765_v43 = vsel %vm763_vm8, %v754_v41, %v756_v42  ;;  %1404 = vmatmul.mubr.msk.bf16.vlgmr.msra.gmra.mrb[0].mxu1 %vm566_vm3, %v1561_v39  ;;  %1424 = vmatmul.mubr.msk.bf16.vlgmr.msra.gmra.mrb[0].mxu0 %vm566_vm3, %v1562_v40 }
 0x170   : > { %775 = vmatprep.subr.bf16.mxu1 %v765_v43  ;;  %807 = vmatprep.mubr.bf16.mxu1 %v1623_v34 }
 0x171   : > { %1202 = vmatprep.mubr.bf16.mxu0 %v1623_v34 }
 0x172   : > { %v1149_v44 = vpop.permute.xlu0 %1148  ;;  %v1151_v45 = vpop.permute.xlu1 %1150 }
 0x173   : > { %v1160_v46 = vsel %vm1158_vm9, %v1149_v44, %v1151_v45 }
 0x174   : > { %1170 = vmatprep.subr.bf16.mxu0 %v1160_v46 }
 0x176   : > { %v752_v47 = vpop.permute.xlu0 %751  ;;  %v1147_v48 = vpop.permute.xlu1 %1146 }
 0x177   : > { %v764_v49 = vsel %vm763_vm8, %v752_v47, %v754_v41  ;;  %v1159_v50 = vsel %vm1158_vm9, %v1147_v48, %v1149_v44 }
 0x178   : > { %776 = vmatpush1.bf16.msra.mxu1 %v764_v49  ;;  %1171 = vmatpush1.bf16.msra.mxu0 %v1159_v50 }
 0x17a   : > { %v760_v51 = vpop.permute.xlu0 %759  ;;  %v762_v52 = vpop.permute.xlu1 %761 }
 0x17b   : > { %v767_v53 = vsel %vm763_vm8, %v760_v51, %v762_v52 }
 0x17c   : > { %777 = vmatprep.subr.bf16.mxu1 %v767_v53 }
 0x17e   : > { %v1155_v54 = vpop.permute.xlu0 %1154  ;;  %v1157_v34 = vpop.permute.xlu1 %1156 }
 0x17f   : > { %v1162_v55 = vsel %vm1158_vm9, %v1155_v54, %v1157_v34 }
 0x180   : > { %1172 = vmatprep.subr.bf16.mxu0 %v1162_v55 }
 0x182   : > { %v758_v56 = vpop.permute.xlu0 %757  ;;  %v1153_v57 = vpop.permute.xlu1 %1152 }
 0x183   : > { %v766_v58 = vsel %vm763_vm8, %v758_v56, %v760_v51  ;;  %v1161_v59 = vsel %vm1158_vm9, %v1153_v57, %v1155_v54 }
 0x184   : > { %778 = vmatpush1.bf16.msra.mxu1 %v766_v58  ;;  %1173 = vmatpush1.bf16.msra.mxu0 %v1161_v59 }
 0x187   : > { %1408 = vmatmul.mubr.msk.bf16.vlgmr.msra.gmra.mrb[0].mxu1 %vm566_vm3, %v1563_v60  ;;  %1428 = vmatmul.mubr.msk.bf16.vlgmr.msra.gmra.mrb[0].mxu0 %vm566_vm3, %v1564_v61 }
 0x193   : > { %v1222_v62 = vpop.permute.xlu0 %1221  ;;  %v1227_v63 = vpop.permute.xlu1 %1226 }
 0x25a   : > { %v809_v0 = vpop.f32.mrb[0].mxu1  ;;  %v1204_v1 = vpop.f32.mrb[0].mxu0 }
 0x25b   : > { %v1446_v2 = vadd.f32 %v1204_v1, %v809_v0  ;;  %v811_v3 = vpop.f32.mrb[1].mxu1  ;;  %v1206_v4 = vpop.f32.mrb[1].mxu0 }
 0x25c   : > { %v1447_v5 = vadd.f32 %v1206_v4, %v811_v3  ;;  %v813_v6 = vpop.f32.mrb[2].mxu1  ;;  %v1208_v7 = vpop.f32.mrb[2].mxu0  ;;  %1243 = sbr.rel (!%p1749_p0) target bundleno = 619 (0x26b), region = 164 }
 0x25d   : > { %v1229_v8 = vadd.f32 %v1446_v2, %v1222_v62  ;;  %v1448_v9 = vadd.f32 %v1208_v7, %v813_v6  ;;  %v815_v10 = vpop.f32.mrb[3].mxu1  ;;  %v1210_v11 = vpop.f32.mrb[3].mxu0 }
 0x25e   : > { %v1230_v12 = vadd.f32 %v1447_v5, %v1222_v62  ;;  %v1449_v13 = vadd.f32 %v1210_v11, %v815_v10 }
 0x25f   : > { %1233 = vst [vmem:[%s435_s12] sm:$0xff] %v1229_v8  ;;  %v1231_v14 = vadd.f32 %v1448_v9, %v1227_v63 }
 0x260   : > { %1234 = vst [vmem:[%s435_s12 + $0x8] sm:$0xff] %v1230_v12  ;;  %v1232_v15 = vadd.f32 %v1449_v13, %v1227_v63 }
 0x261   : > { %1235 = vst [vmem:[%s435_s12 + $0x10] sm:$0xff] %v1231_v14 }
 0x262   : > { %1236 = vst [vmem:[%s435_s12 + $0x18] sm:$0xff] %v1232_v15 }
 0x266   : > { %v1259_v16 = vld [vmem:[%s435_s12] sm:$0xff] }
 0x267   : > { %v1261_v17 = vld [vmem:[%s435_s12 + $0x8] sm:$0xff]  ;;  %1260 = vst [vmem:[%s1246_s9] sm:$0xff] %v1259_v16 }
 0x268   : > { %v1263_v18 = vld [vmem:[%s435_s12 + $0x10] sm:$0xff]  ;;  %1262 = vst [vmem:[%s1246_s9 + $0x8] sm:$0xff] %v1261_v17 }
 0x269   : > { %v1265_v19 = vld [vmem:[%s435_s12 + $0x18] sm:$0xff]  ;;  %1264 = vst [vmem:[%s1246_s9 + $0x20] sm:$0xff] %v1263_v18 }
 0x26a   : > { %1266 = vst [vmem:[%s1246_s9 + $0x28] sm:$0xff] %v1265_v19 }
 0x26b PF: > { %s1962_s24 = sld [smem:[#allocation6_spill]]  ;;  %p12_p6 = scmp.ge.s32.totalorder %s1697_s25, 4  }
 0x26c   : > { %s1963_s18 = smov %s1599_s19  ;;  %s1964_s19 = smov %s1756_s27 }
 0x26d   : > { %s1965_s20 = smov %s1607_s21  ;;  %s1966_s21 = smov %s1722_s11 }
 0x26e   : > { %s1967_s22 = smov %s1615_s23  ;;  %14 = sbr.rel (!%p12_p6) target bundleno = 4 (0x4), region = 242 }
 0x271   : > { %s1968_s23 = smov %s1962_s24  ;;  %s1969_s24 = smov %s1697_s25 }

</bundles_post_ra>
